<compile_context>
chip_gen: v5e
topology: v5e:2x2
jax: 0.10.0
libtpu: 0.0.40
codegen_flags: <defaults>
</compile_context>

<pallas_src>
import functools
import math

import jax
import jax.numpy as jnp
from jax.experimental import pallas as pl
from jax.experimental.pallas import tpu as pltpu


def _attention_kernel(*refs, scale, dropout_p):
    if dropout_p > 0.0:
        q_ref, k_ref, v_ref, bits_ref, o_ref = refs
    else:
        q_ref, k_ref, v_ref, o_ref = refs
        bits_ref = None

    # Fold the scale into q (S*D multiplies), then cast MXU operands to bf16.
    q = (q_ref[...] * scale).astype(jnp.bfloat16)          # (G, S, D)
    k = k_ref[...].astype(jnp.bfloat16)                    # (G, S, D)
    v = v_ref[...].astype(jnp.bfloat16)                    # (G, S, D)

    # scores = q @ k^T as a contraction over D (no explicit transpose), f32 acc.
    s = jnp.einsum("gqd,gkd->gqk", q, k,
                   preferred_element_type=jnp.float32)     # (G, S, S)

    # Numerically stable softmax along the last axis (kept in f32).
    m = jnp.max(s, axis=-1, keepdims=True)
    p = jnp.exp(s - m)
    denom = jnp.sum(p, axis=-1, keepdims=True)
    inv = pl.reciprocal(denom, approx=True)                # (G, S, 1), EUP slot

    if dropout_p > 0.0:
        # Inverted dropout: fold 1/(1-p) into the row reciprocal and decide
        # keep/drop in the integer domain (bits uniform in [0, 2^24)).
        inv = inv * jnp.float32(1.0 / (1.0 - dropout_p))
        thresh = jnp.int32(int(round(dropout_p * (1 << 24))))
        keep = bits_ref[...] >= thresh                     # (G, S, S) bool
        sm = jnp.where(keep, p * inv, 0.0)
    else:
        sm = p * inv

    out = jnp.einsum("gqk,gkd->gqd", sm.astype(jnp.bfloat16), v,
                     preferred_element_type=jnp.float32)   # (G, S, D)
    o_ref[...] = out.astype(o_ref.dtype)


def _pick_group_size(bh, s, d, with_bits, budget_bytes=24 * 1024 * 1024):
    """Largest divisor of bh whose block (double-buffered IO + f32 score
    temporaries) fits the VMEM budget, preferring a grid extent >= 2."""
    best = 1
    for g in range(1, bh + 1):
        if bh % g != 0:
            continue
        io = 4 * g * s * d * 4 + (g * s * s * 4 if with_bits else 0)
        temps = 4 * g * s * s * 4
        need = 2 * io + temps
        if need > budget_bytes:
            continue
        if bh // g >= 2 or bh == 1:
            best = g
    return best


def pallas_attention(query, key, value, *, scale_factor, dropout_p, seed=0):
    """query/key/value: [B, H, S, D] float32. Returns [B, H, S, D]."""
    B, H, S, D = query.shape
    assert key.shape == (B, H, S, D) and value.shape == (B, H, S, D)
    assert 0.0 <= dropout_p < 1.0
    BH = B * H

    q = query.reshape(BH, S, D)
    k = key.reshape(BH, S, D)
    v = value.reshape(BH, S, D)

    use_dropout = dropout_p > 0.0
    G = _pick_group_size(BH, S, D, use_dropout)
    grid = (BH // G,)

    kernel = functools.partial(
        _attention_kernel, scale=float(scale_factor), dropout_p=float(dropout_p)
    )

    blk_qkv = pl.BlockSpec((G, S, D), lambda i: (i, 0, 0))
    in_specs = [blk_qkv, blk_qkv, blk_qkv]
    inputs = [q, k, v]
    bytes_accessed = 4 * 4 * BH * S * D            # q, k, v, o in f32

    if use_dropout:
        # Uniform integer bits in [0, 2^24); keep iff bits >= p * 2^24.
        rng = jax.random.PRNGKey(seed)
        bits = jax.random.randint(rng, (BH, S, S), 0, 1 << 24, dtype=jnp.int32)
        in_specs.append(pl.BlockSpec((G, S, S), lambda i: (i, 0, 0)))
        inputs.append(bits)
        bytes_accessed += 4 * BH * S * S

    # Rough per-step VMEM need (double-buffered IO blocks + score temporaries).
    io = 4 * G * S * D * 4 + (G * S * S * 4 if use_dropout else 0)
    need = 2 * io + 4 * G * S * S * 4
    vmem_limit = min(max(2 * need, 32 * 1024 * 1024), 64 * 1024 * 1024)

    out = pl.pallas_call(
        kernel,
        out_shape=jax.ShapeDtypeStruct((BH, S, D), query.dtype),
        grid_spec=pltpu.PrefetchScalarGridSpec(
            num_scalar_prefetch=0,
            grid=grid,
            in_specs=in_specs,
            out_specs=blk_qkv,
        ),
        compiler_params=pltpu.CompilerParams(
            dimension_semantics=("parallel",),
            vmem_limit_bytes=vmem_limit,
        ),
        cost_estimate=pl.CostEstimate(
            flops=4 * BH * S * S * D,          # two matmuls, 2*S*S*D each/head
            transcendentals=BH * S * S,        # exp in softmax
            bytes_accessed=bytes_accessed,
        ),
    )(*inputs)
    return out.reshape(B, H, S, D)


def _reference_attention(query, key, value, scale_factor):
    # Pure-JAX reference (dropout_p = 0 path).
    qk = jnp.einsum("bhqd,bhkd->bhqk", query, key) * scale_factor
    sm = jax.nn.softmax(qk, axis=-1)
    return jnp.einsum("bhqk,bhkd->bhqd", sm, value)


if __name__ == "__main__":
    B, H, S, D = 2, 4, 128, 128
    scale_factor = 1.0 / math.sqrt(D)

    k0, k1, k2 = jax.random.split(jax.random.PRNGKey(0), 3)
    query = jax.random.normal(k0, (B, H, S, D), dtype=jnp.float32)
    key = jax.random.normal(k1, (B, H, S, D), dtype=jnp.float32)
    value = jax.random.normal(k2, (B, H, S, D), dtype=jnp.float32)

    # No-dropout run: must match the pure-JAX reference (bf16 MXU tolerance).
    out = pallas_attention(query, key, value,
                           scale_factor=scale_factor, dropout_p=0.0)
    out = jax.block_until_ready(out)
    ref = _reference_attention(query, key, value, scale_factor)
    max_diff = float(jnp.max(jnp.abs(out - ref)))
    assert jnp.allclose(out, ref, atol=3e-2, rtol=3e-2), (
        f"mismatch vs reference, max abs diff = {max_diff}")

    # Dropout run (stochastic; exercise the masked path and check finiteness).
    out_drop = pallas_attention(query, key, value,
                                scale_factor=scale_factor, dropout_p=0.2, seed=7)
    out_drop = jax.block_until_ready(out_drop)
    assert bool(jnp.isfinite(out_drop).all())

    print("KERNEL_OK")
</pallas_src>

<mosaic_0001>
module attributes {stable_mosaic.version = 11 : i64} {
  func.func @_attention_kernel(%arg0: i32, %arg1: memref<4x128x128xf32, #tpu.memory_space<vmem>>, %arg2: memref<4x128x128xf32, #tpu.memory_space<vmem>>, %arg3: memref<4x128x128xf32, #tpu.memory_space<vmem>>, %arg4: memref<4x128x128xf32, #tpu.memory_space<vmem>>) attributes {dimension_semantics = [#tpu.dimension_semantics<parallel>], iteration_bounds = array<i64: 2>, scalar_prefetch = 0 : i64, scratch_operands = 0 : i64, tpu.core_type = #tpu.core_type<tc>, window_params = [{transform_indices = @transform_0, window_bounds = array<i64: 4, 128, 128>}, {transform_indices = @transform_1, window_bounds = array<i64: 4, 128, 128>}, {transform_indices = @transform_2, window_bounds = array<i64: 4, 128, 128>}, {transform_indices = @transform_3, window_bounds = array<i64: 4, 128, 128>}]} {
    %c0 = arith.constant 0 : index
    %c0_0 = arith.constant 0 : index
    %c0_1 = arith.constant 0 : index
    %0 = vector.load %arg1[%c0, %c0_0, %c0_1] : memref<4x128x128xf32, #tpu.memory_space<vmem>>, vector<4x128x128xf32>
    %cst = arith.constant 0.0883883461 : f32
    %1 = vector.broadcast %cst : f32 to vector<4x128x128xf32>
    %2 = arith.mulf %0, %1 : vector<4x128x128xf32>
    %3 = arith.truncf %2 : vector<4x128x128xf32> to vector<4x128x128xbf16>
    %c0_2 = arith.constant 0 : index
    %c0_3 = arith.constant 0 : index
    %c0_4 = arith.constant 0 : index
    %4 = vector.load %arg2[%c0_2, %c0_3, %c0_4] : memref<4x128x128xf32, #tpu.memory_space<vmem>>, vector<4x128x128xf32>
    %5 = arith.truncf %4 : vector<4x128x128xf32> to vector<4x128x128xbf16>
    %c0_5 = arith.constant 0 : index
    %c0_6 = arith.constant 0 : index
    %c0_7 = arith.constant 0 : index
    %6 = vector.load %arg3[%c0_5, %c0_6, %c0_7] : memref<4x128x128xf32, #tpu.memory_space<vmem>>, vector<4x128x128xf32>
    %7 = arith.truncf %6 : vector<4x128x128xf32> to vector<4x128x128xbf16>
    "tpu.trace_start"() <{level = 10 : i32, message = "gqd,gkd->gqk"}> : () -> ()
    %cst_8 = arith.constant dense<0.000000e+00> : vector<4x128x128xf32>
    %8 = tpu.matmul %3, %5, %cst_8 {dimension_numbers = #tpu.dot_dimension_numbers<[2], [2], [1], [1], [0, 0, 0, 1, 1, 1], [0], [0]>} : vector<4x128x128xbf16>, vector<4x128x128xbf16>, vector<4x128x128xf32> -> vector<4x128x128xf32>
    "tpu.trace_stop"() : () -> ()
    %cst_9 = arith.constant dense<0xFF800000> : vector<4x128xf32>
    %9 = vector.multi_reduction <maximumf>, %8, %cst_9 [2] : vector<4x128x128xf32> to vector<4x128xf32>
    %10 = vector.shape_cast %9 : vector<4x128xf32> to vector<4x128x1xf32>
    %11 = vector.broadcast %10 : vector<4x128x1xf32> to vector<4x128x128xf32>
    %12 = arith.subf %8, %11 : vector<4x128x128xf32>
    %13 = math.exp %12 : vector<4x128x128xf32>
    %cst_10 = arith.constant dense<0.000000e+00> : vector<4x128xf32>
    %14 = vector.multi_reduction <add>, %13, %cst_10 [2] : vector<4x128x128xf32> to vector<4x128xf32>
    %15 = vector.shape_cast %14 : vector<4x128xf32> to vector<4x128x1xf32>
    %16 = tpu.reciprocal %15 {approx = true} : vector<4x128x1xf32> -> vector<4x128x1xf32>
    %17 = vector.broadcast %16 : vector<4x128x1xf32> to vector<4x128x128xf32>
    %18 = arith.mulf %13, %17 : vector<4x128x128xf32>
    %19 = arith.truncf %18 : vector<4x128x128xf32> to vector<4x128x128xbf16>
    "tpu.trace_start"() <{level = 10 : i32, message = "gqk,gkd->gqd"}> : () -> ()
    %cst_11 = arith.constant dense<0.000000e+00> : vector<4x128x128xf32>
    %20 = tpu.matmul %19, %7, %cst_11 {dimension_numbers = #tpu.dot_dimension_numbers<[2], [1], [1], [2], [0, 0, 0, 1, 1, 2], [0], [0]>} : vector<4x128x128xbf16>, vector<4x128x128xbf16>, vector<4x128x128xf32> -> vector<4x128x128xf32>
    "tpu.trace_stop"() : () -> ()
    %c0_12 = arith.constant 0 : index
    %c0_13 = arith.constant 0 : index
    %c0_14 = arith.constant 0 : index
    %21 = vector.load %arg4[%c0_12, %c0_13, %c0_14] : memref<4x128x128xf32, #tpu.memory_space<vmem>>, vector<4x128x128xf32>
    tpu.vector_store %arg4[%c0_12, %c0_13, %c0_14], %20 {strides = array<i32>} : memref<4x128x128xf32, #tpu.memory_space<vmem>>, vector<4x128x128xf32>,
    return
  }
  func.func @transform_0(%arg0: i32) -> (i32, i32, i32) {
    %c0_i32 = arith.constant 0 : i32
    %c0_i32_0 = arith.constant 0 : i32
    %c0_i32_1 = arith.constant 0 : i32
    return %arg0, %c0_i32, %c0_i32_0 : i32, i32, i32
  }
  func.func @transform_1(%arg0: i32) -> (i32, i32, i32) {
    %c0_i32 = arith.constant 0 : i32
    %c0_i32_0 = arith.constant 0 : i32
    %c0_i32_1 = arith.constant 0 : i32
    return %arg0, %c0_i32, %c0_i32_0 : i32, i32, i32
  }
  func.func @transform_2(%arg0: i32) -> (i32, i32, i32) {
    %c0_i32 = arith.constant 0 : i32
    %c0_i32_0 = arith.constant 0 : i32
    %c0_i32_1 = arith.constant 0 : i32
    return %arg0, %c0_i32, %c0_i32_0 : i32, i32, i32
  }
  func.func @transform_3(%arg0: i32) -> (i32, i32, i32) {
    %c0_i32 = arith.constant 0 : i32
    %c0_i32_0 = arith.constant 0 : i32
    %c0_i32_1 = arith.constant 0 : i32
    return %arg0, %c0_i32, %c0_i32_0 : i32, i32, i32
  }
}

</mosaic_0001>

<bundles_post_ra>
// kernel: tpu_custom_call.1
= control target key start
LH: loop header
LB: loop body
LE: loop exit
PB: predicated region body
PF: predicated region fallthrough
CT: control target
= control target key end

     0   :  { %s4409_s0 = inlined_call_operand.hbm [shape: f32[8,128,128], index: 0, kind: input, shape index: {}]   ;;  %s4410_s1 = inlined_call_operand.hbm [shape: f32[8,128,128], index: 1, kind: input, shape index: {}]   ;;  %s4411_s2 = inlined_call_operand.hbm [shape: f32[8,128,128], index: 2, kind: input, shape index: {}]   ;;  %s4412_s3 = inlined_call_operand.hbm [shape: f32[8,128,128], index: 3, kind: output, shape index: {}]  }
   0x1   :  { %4468 = sst [smem:[#allocation58_spill]] %s4409_s0 }
   0x2   :  { %4469 = sst [smem:[#allocation59_spill]] %s4410_s1 }
   0x3   :  { %8 = vsyncpa [#allocation3], 0 }
   0x4   :  { %10 = vsyncpa [#allocation3 + $0x1], 0 }
   0x5   :  { %11 = vsyncpa [#allocation6], 0 }
   0x6   :  { %13 = vsyncpa [#allocation6 + $0x1], 0 }
   0x7   :  { %14 = vsyncpa [#allocation4], 0 }
   0x8   :  { %16 = vsyncpa [#allocation4 + $0x1], 0  ;;  %s3260_s12 = smov 0   ;;  %s3262_s13 = smov 0  }
   0x9   :  { %s3264_s14 = smov 0   ;;  %s3266_s15 = smov 0  }
   0xa LB: > { %s3281_s16 = sadd.s32 4294967295, %s3234_s15   ;;  %s2724_s17 = sadd.s32 4294967294, %s3234_s15   ;;  %s3234_s15 = sphi %s3266_s15, %s4589_s15   ;;  %s3230_s14 = sphi %s3264_s14, %s4588_s14   ;;  %s3226_s13 = sphi %s3262_s13, %s4587_s13   ;;  %s3222_s12 = sphi %s3260_s12, %s4586_s12  }
   0xb   : > { %s3285_s18 = sadd.s32 1, %s3234_s15   ;;  %s29_s19 = sadd.s32 1, %s3230_s14 }
   0xc   : > { %s26_s20 = ssub.s32 %s3234_s15, %s3285_s18  ;;  %p36_p0 = scmp.ne.s32.totalorder %s3230_s14, %s3226_s13 }
   0xd   : > { %p27_p1 = scmp.eq.s32.totalorder %s26_s20, 0  ;;  %p37_p2 = scmp.eq.s32.totalorder %s3234_s15, 0 }
   0xe   : > { %p42_p3 = scmp.ne.s32.totalorder %s3226_s13, %s3222_s12  ;;  %p43_p4 = scmp.eq.s32.totalorder %s3281_s16, 0 }
   0xf   : > { %s3297_s21 = scalar_select %p27_p1, %s3230_s14, %s29_s19  }
  0x10   : > { %p38_p5 = por %p37_p2, %p36_p0  ;;  %p3299_p6 = por %p43_p4, %p42_p3 }
  0x11   : > { %4470 = sst [smem:[#allocation12_spill]] %s3297_s21  ;;  %p118_p7 = scmp.eq.s32.totalorder %s3281_s16, 1 }
  0x12   : > { %p124_p8 = scmp.eq.s32.totalorder %s2724_s17, 1  ;;  %p2726_p9 = scmp.ge.s32.totalorder %s3234_s15, 2 }
  0x13   : > { %p2780_p10 = scmp.lt.s32.totalorder %s3234_s15, 2  ;;  %p3306_p11 = por %p118_p7, %p36_p0 }
  0x14   : > { %p3310_p12 = por %p124_p8, %p42_p3  ;;  %s144_s25 = sand.u32 1, %s3230_s14  }
  0x15   : > { %s3316_s26 = sshll.u32 %s3234_s15, 9  ;;  %s3320_s27 = sshll.u32 %s144_s25, 9 }
  0x16   : > { %p3322_p13 = pnand %p2780_p10, %p38_p5  ;;  %s167_s29 = sand.u32 1, %s3234_s15  }
  0x17   : > { %s4475_s1 = sld [smem:[#allocation59_spill]]  ;;  %s171_s6 = scalar_lea.vmem [#allocation5], %s3320_s27 }
  0x18   : > { %s180_s7 = sshll.u32 %s171_s6, 4  ;;  %p2739_p0 = scmp.ge.s32.totalorder %s3234_s15, 1  ;;  %s181_s7 = int_to_ptr.vmem [resolvable:$true] %s180_s7 }
  0x19   : > { %s3333_s9 = scalar_lea.sflag [#allocation6], %s167_s29  ;;  %p3078_p2 = pneg %p3322_p13 }
  0x1d   : > { %s177_s5 = scalar_lea.hbm %s4475_s1, %s3316_s26  ;;  %s3081_s20 = scalar_lea.hbm %s4475_s1, 1024 }
  0x1e   : > { %s178_s8 = sshll.u32 %s177_s5, 4  ;;  %s179_s8 = int_to_ptr.hbm [resolvable:$true] %s178_s8 }
  0x1f   : > { %s3074_s10 = sshra.s32 %s179_s8, 4  ;;  %s3075_s10 = int_to_ptr.hbm [resolvable:$true] %s3074_s10 }
  0x20   : > { %s3076_s11 = scalar_lea.hbm %s3075_s10, 512  ;;  %p3082_p5 = scmp.lt.s32.totalorder %s3075_s10, %s4475_s1 }
  0x21   : > { %p3077_p1 = scmp.ne.s32.totalorder %s3075_s10, %s3076_s11  ;;  %p3083_p7 = scmp.lt.s32.totalorder %s3081_s20, %s3076_s11 }
  0x23   : > { %p3079_p3 = pnand %p3078_p2, %p3077_p1  ;;  %p3084_p8 = por %p3083_p7, %p3082_p5 }
  0x25   : > { %p3080_p4 = pneg %p3079_p3 }
  0x27   : > { %p3085_p10 = pnand %p3084_p8, %p3080_p4 }
  0x29   : > { %3088 = shalt.err (!%p3085_p10)
}
  0x2a   : > { %s4413_s29 = smov 128   ;;  %s3237_s5 = smov 8  }
  0x2b   : > { %2772 = dma.hbm_to_vmem [thread:$0]  (!%p3322_p13), %s179_s8, 8192, %s181_s7, %s3333_s9, %s4413_s29, %s4413_s29, %s3237_s5  }
  0x2c   : > { %p211_p1 = scmp.lt.s32.totalorder %s3234_s15, 3  ;;  %s4476_s0 = sld [smem:[#allocation58_spill]] }
  0x2d   : > { %s148_s20 = scalar_lea.vmem [#allocation2], %s3320_s27  ;;  %s145_s4 = scalar_lea.sflag [#allocation3], %s144_s25 }
  0x2e   : > { %p3359_p3 = pnand %p2739_p0, %p211_p1  ;;  %s157_s30 = sshll.u32 %s148_s20, 4  ;;  %s158_s30 = int_to_ptr.vmem [resolvable:$true] %s157_s30 }
  0x32   : > { %s154_s11 = scalar_lea.hbm %s4476_s0, %s3316_s26  ;;  %s3111_s10 = scalar_lea.hbm %s4476_s0, 1024 }
  0x33   : > { %s155_s19 = sshll.u32 %s154_s11, 4  ;;  %s156_s19 = int_to_ptr.hbm [resolvable:$true] %s155_s19 }
  0x34   : > { %s3104_s1 = sshra.s32 %s156_s19, 4  ;;  %s3105_s1 = int_to_ptr.hbm [resolvable:$true] %s3104_s1 }
  0x35   : > { %s3106_s7 = scalar_lea.hbm %s3105_s1, 512  ;;  %p3112_p0 = scmp.lt.s32.totalorder %s3105_s1, %s4476_s0 }
  0x36   : > { %p3107_p4 = scmp.ne.s32.totalorder %s3105_s1, %s3106_s7  ;;  %p3113_p8 = scmp.lt.s32.totalorder %s3111_s10, %s3106_s7 }
  0x38   : > { %p3109_p5 = pnand %p3107_p4, %p3078_p2  ;;  %p3114_p10 = por %p3113_p8, %p3112_p0 }
  0x3a   : > { %p3110_p7 = pneg %p3109_p5 }
  0x3c   : > { %p3115_p1 = pnand %p3114_p10, %p3110_p7 }
  0x3e   : > { %3118 = shalt.err (!%p3115_p1)
}
  0x3f   : > { %s4478_s25 = smov 128   ;;  %s200_s6 = scalar_lea.hbm %s4411_s2, %s3316_s26 }
  0x40   : > { %2769 = dma.hbm_to_vmem [thread:$0]  (!%p3322_p13), %s156_s19, 8192, %s158_s30, %s145_s4, %s4478_s25, %s4478_s25, %s3237_s5  }
  0x41   : > { %s194_s21 = scalar_lea.vmem [#allocation7], %s3320_s27  ;;  %s201_s1 = sshll.u32 %s200_s6, 4  ;;  %s202_s1 = int_to_ptr.hbm [resolvable:$true] %s201_s1 }
  0x42   : > { %s203_s29 = sshll.u32 %s194_s21, 4  ;;  %s3134_s7 = sshra.s32 %s202_s1, 4  ;;  %s204_s29 = int_to_ptr.vmem [resolvable:$true] %s203_s29  ;;  %s3135_s7 = int_to_ptr.hbm [resolvable:$true] %s3134_s7 }
  0x43   : > { %s3136_s10 = scalar_lea.hbm %s3135_s7, 512  ;;  %s3141_s19 = scalar_lea.hbm %s4411_s2, 1024 }
  0x44   : > { %p3137_p4 = scmp.ne.s32.totalorder %s3135_s7, %s3136_s10  ;;  %p3142_p0 = scmp.lt.s32.totalorder %s3135_s7, %s4411_s2 }
  0x45   : > { %p3143_p8 = scmp.lt.s32.totalorder %s3141_s19, %s3136_s10 }
  0x46   : > { %p3139_p5 = pnand %p3137_p4, %p3078_p2 }
  0x47   : > { %p3144_p10 = por %p3143_p8, %p3142_p0 }
  0x48   : > { %p3140_p7 = pneg %p3139_p5 }
  0x4a   : > { %p3145_p1 = pnand %p3144_p10, %p3140_p7 }
  0x4c   : > { %3148 = shalt.err (!%p3145_p1)
}
  0x4d   : > { %2775 = dma.hbm_to_vmem [thread:$0]  (!%p3322_p13), %s202_s1, 8192, %s204_s29, %s3333_s9, %s4478_s25, %s4478_s25, %s3237_s5  }
  0x4e   : > { %215 = sbr.rel (%p3359_p3) target bundleno = 899 (0x383), region = 32 }
  0x53   : > { %s3403_s0 = sand.u32 1, %s3226_s13  }
  0x54   : > { %s3406_s21 = sshll.u32 %s3403_s0, 9  ;;  %s218_s26 = scalar_lea.sflag [#allocation3], %s3403_s0 }
  0x55   : > { %s3410_s27 = scalar_lea.vmem [#allocation2], %s3406_s21 }
  0x56   : > { %3209 = dma.done.wait (%p3299_p6), %s218_s26, 8192  }
  0x57   : > { %3211 = vsyncadd (%p3299_p6), %s218_s26, 4294959104  ;;  %s227_s28 = sand.u32 1, %s3281_s16   ;;  %s3418_s5 = scalar_lea.vmem [#allocation5], %s3406_s21 }
  0x58   : > { %s228_s9 = scalar_lea.sflag [#allocation6], %s227_s28 }
  0x59   : > { %3213 = dma.done.wait (%p3299_p6), %s228_s9, 16384  }
  0x5a   : > { %3215 = vsyncadd (%p3299_p6), %s228_s9, 4294950912  ;;  %v485_v0 = vld [vmem:[%s3418_s5 + $0x70] sm:$0xff]  ;;  %v486_v1 = vld [vmem:[%s3418_s5 + $0x78] sm:$0xff]  ;;  %s3861_s22 = scalar_lea.vmem [#allocation7], %s3406_s21  ;;  %s4298_s17 = scalar_lea.vmem [#allocation8], %s3406_s21 }
  0x5b   : > { %v501_v2 = vld [vmem:[%s3418_s5 + $0xf0] sm:$0xff]  ;;  %v549_v3 = vpack.c.bf16 %v485_v0, %v485_v0  ;;  %v550_v4 = vpack.c.bf16 %v486_v1, %v486_v1  ;;  %v502_v5 = vld [vmem:[%s3418_s5 + $0xf8] sm:$0xff]  ;;  %v483_v14 = vld [vmem:[%s3418_s5 + $0x60] sm:$0xff]  ;;  %s2757_s25 = sshll.u32 %s3281_s16, 9  ;;  %s2605_s29 = sshll.u32 %s4298_s17, 4  ;;  %s2606_s29 = int_to_ptr.vmem [resolvable:$true] %s2605_s29 }
  0x5c   : > { %v565_v6 = vpack.c.bf16 %v501_v2, %v501_v2  ;;  %v517_v7 = vld [vmem:[%s3418_s5 + $0x170] sm:$0xff]  ;;  %v518_v8 = vld [vmem:[%s3418_s5 + $0x178] sm:$0xff]  ;;  %v566_v9 = vpack.c.bf16 %v502_v5, %v502_v5  ;;  %v484_v19 = vld [vmem:[%s3418_s5 + $0x68] sm:$0xff]  ;;  %v547_v29 = vpack.c.bf16 %v483_v14, %v483_v14  ;;  %s2604_s6 = scalar_lea.hbm %s4412_s3, %s2757_s25  ;;  %s2592_s16 = scalar_lea.sflag [#allocation4], %s3403_s0 }
  0x5d   : > { %v581_v10 = vpack.c.bf16 %v517_v7, %v517_v7  ;;  %v582_v11 = vpack.c.bf16 %v518_v8, %v518_v8  ;;  %v533_v12 = vld [vmem:[%s3418_s5 + $0x1f0] sm:$0xff]  ;;  %v534_v13 = vld [vmem:[%s3418_s5 + $0x1f8] sm:$0xff]  ;;  %v805_v15 = vunpack.c.l.b16 %v549_v3  ;;  %v806_v16 = vunpack.c.l.b16 %v550_v4  ;;  %v499_v20 = vld [vmem:[%s3418_s5 + $0xe0] sm:$0xff]  ;;  %s2607_s1 = sshll.u32 %s2604_s6, 4  ;;  %s3184_s30 = scalar_lea.hbm %s4412_s3, 1024  ;;  %s2608_s1 = int_to_ptr.hbm [resolvable:$true] %s2607_s1 }
  0x5e   : > { %v950_v17 = vunpack.c.l.b16 %v565_v6  ;;  %v597_v18 = vpack.c.bf16 %v533_v12, %v533_v12  ;;  %v951_v21 = vunpack.c.l.b16 %v566_v9  ;;  %v598_v24 = vpack.c.bf16 %v534_v13, %v534_v13  ;;  %v500_v25 = vld [vmem:[%s3418_s5 + $0xe8] sm:$0xff]  ;;  %v515_v26 = vld [vmem:[%s3418_s5 + $0x160] sm:$0xff]  ;;  %v481_v42 = vld [vmem:[%s3418_s5 + $0x50] sm:$0xff]  ;;  %s3178_s7 = sshra.s32 %s2608_s1, 4  ;;  %s3179_s7 = int_to_ptr.hbm [resolvable:$true] %s3178_s7 }
  0x5f   : > { %v1095_v22 = vunpack.c.l.b16 %v581_v10  ;;  %v1096_v23 = vunpack.c.l.b16 %v582_v11  ;;  %v814_v27 = vpack.c.b16 %v806_v16, %v805_v15  ;;  %v548_v30 = vpack.c.bf16 %v484_v19, %v484_v19  ;;  %v516_v31 = vld [vmem:[%s3418_s5 + $0x168] sm:$0xff]  ;;  %v531_v32 = vld [vmem:[%s3418_s5 + $0x1e0] sm:$0xff]  ;;  %v482_v47 = vld [vmem:[%s3418_s5 + $0x58] sm:$0xff]  ;;  %s3180_s10 = scalar_lea.hbm %s3179_s7, 512  ;;  %p3185_p3 = scmp.lt.s32.totalorder %s3179_s7, %s4412_s3 }
  0x60   : > { %v1240_v28 = vunpack.c.l.b16 %v597_v18  ;;  %v959_v33 = vpack.c.b16 %v951_v21, %v950_v17  ;;  %v1241_v35 = vunpack.c.l.b16 %v598_v24  ;;  %v563_v36 = vpack.c.bf16 %v499_v20, %v499_v20  ;;  %v532_v37 = vld [vmem:[%s3418_s5 + $0x1e8] sm:$0xff]  ;;  %v497_v48 = vld [vmem:[%s3418_s5 + $0xd0] sm:$0xff]  ;;  %v498_v49 = vld [vmem:[%s3418_s5 + $0xd8] sm:$0xff]  ;;  %p3181_p6 = scmp.ne.s32.totalorder %s3179_s7, %s3180_s10  ;;  %p3186_p4 = scmp.lt.s32.totalorder %s3184_s30, %s3180_s10 }
  0x61   : > { %v1104_v34 = vpack.c.b16 %v1096_v23, %v1095_v22  ;;  %823 = vmatpush.bf16.xpose.msra.mxu0 %v814_v27  ;;  %v803_v38 = vunpack.c.l.b16 %v547_v29  ;;  %v804_v39 = vunpack.c.l.b16 %v548_v30  ;;  %v564_v40 = vpack.c.bf16 %v500_v25, %v500_v25  ;;  %v513_v53 = vld [vmem:[%s3418_s5 + $0x150] sm:$0xff]  ;;  %v514_v58 = vld [vmem:[%s3418_s5 + $0x158] sm:$0xff]  ;;  %v479_v8 = vld [vmem:[%s3418_s5 + $0x40] sm:$0xff] }
  0x62   : > { %v579_v41 = vpack.c.bf16 %v515_v26, %v515_v26  ;;  %968 = vmatpush.bf16.xpose.msra.mxu1 %v959_v33  ;;  %v1249_v43 = vpack.c.b16 %v1241_v35, %v1240_v28  ;;  %v948_v44 = vunpack.c.l.b16 %v563_v36  ;;  %v580_v45 = vpack.c.bf16 %v516_v31, %v516_v31  ;;  %v529_v63 = vld [vmem:[%s3418_s5 + $0x1d0] sm:$0xff]  ;;  %v530_v0 = vld [vmem:[%s3418_s5 + $0x1d8] sm:$0xff]  ;;  %v480_v13 = vld [vmem:[%s3418_s5 + $0x48] sm:$0xff]  ;;  %p3182_p13 = pnand %p3181_p6, %p3306_p11  ;;  %p3187_p5 = por %p3186_p4, %p3185_p3 }
  0x63   : > { %1113 = vmatpush.bf16.xpose.msra.mxu2 %v1104_v34  ;;  %v595_v46 = vpack.c.bf16 %v531_v32, %v531_v32  ;;  %v949_v50 = vunpack.c.l.b16 %v564_v40  ;;  %v596_v52 = vpack.c.bf16 %v532_v37, %v532_v37  ;;  %v813_v54 = vpack.c.b16 %v804_v39, %v803_v38  ;;  %v495_v16 = vld [vmem:[%s3418_s5 + $0xc0] sm:$0xff]  ;;  %v496_v18 = vld [vmem:[%s3418_s5 + $0xc8] sm:$0xff]  ;;  %v477_v38 = vld [vmem:[%s3418_s5 + $0x30] sm:$0xff] }
  0x64   : > { %v1093_v51 = vunpack.c.l.b16 %v579_v41  ;;  %1258 = vmatpush.bf16.xpose.msra.mxu3 %v1249_v43  ;;  %v1094_v55 = vunpack.c.l.b16 %v580_v45  ;;  %v545_v57 = vpack.c.bf16 %v481_v42, %v481_v42  ;;  %v546_v60 = vpack.c.bf16 %v482_v47, %v482_v47  ;;  %v511_v19 = vld [vmem:[%s3418_s5 + $0x140] sm:$0xff]  ;;  %v512_v20 = vld [vmem:[%s3418_s5 + $0x148] sm:$0xff]  ;;  %v478_v43 = vld [vmem:[%s3418_s5 + $0x38] sm:$0xff]  ;;  %p3183_p2 = pneg %p3182_p13 }
  0x65   : > { %v1238_v56 = vunpack.c.l.b16 %v595_v46  ;;  %v1239_v59 = vunpack.c.l.b16 %v596_v52  ;;  %v561_v61 = vpack.c.bf16 %v497_v48, %v497_v48  ;;  %v562_v62 = vpack.c.bf16 %v498_v49, %v498_v49  ;;  %v527_v27 = vld [vmem:[%s3418_s5 + $0x1c0] sm:$0xff]  ;;  %v528_v28 = vld [vmem:[%s3418_s5 + $0x1c8] sm:$0xff]  ;;  %v494_v45 = vld [vmem:[%s3418_s5 + $0xb8] sm:$0xff] }
  0x66   : > { %v958_v1 = vpack.c.b16 %v949_v50, %v948_v44  ;;  %v1103_v2 = vpack.c.b16 %v1094_v55, %v1093_v51  ;;  %v577_v3 = vpack.c.bf16 %v513_v53, %v513_v53  ;;  %v578_v4 = vpack.c.bf16 %v514_v58, %v514_v58  ;;  %v493_v44 = vld [vmem:[%s3418_s5 + $0xb0] sm:$0xff]  ;;  %v510_v47 = vld [vmem:[%s3418_s5 + $0x138] sm:$0xff]  ;;  %p3188_p7 = pnand %p3187_p5, %p3183_p2 }
  0x67   : > { %v1248_v5 = vpack.c.b16 %v1239_v59, %v1238_v56  ;;  %v593_v6 = vpack.c.bf16 %v529_v63, %v529_v63  ;;  %v594_v7 = vpack.c.bf16 %v530_v0, %v530_v0  ;;  %v801_v9 = vunpack.c.l.b16 %v545_v57  ;;  %v509_v46 = vld [vmem:[%s3418_s5 + $0x130] sm:$0xff]  ;;  %v526_v56 = vld [vmem:[%s3418_s5 + $0x1b8] sm:$0xff]  ;;  %v475_v0 = vld [vmem:[%s3418_s5 + $0x20] sm:$0xff] }
  0x68   : > { %v802_v10 = vunpack.c.l.b16 %v546_v60  ;;  %v946_v11 = vunpack.c.l.b16 %v561_v61  ;;  %v947_v12 = vunpack.c.l.b16 %v562_v62  ;;  %v1091_v14 = vunpack.c.l.b16 %v577_v3  ;;  %v525_v55 = vld [vmem:[%s3418_s5 + $0x1b0] sm:$0xff] }
  0x69   : > { %824 = vmatpush.bf16.xpose.msra.mxu0 %v813_v54  ;;  %v1092_v15 = vunpack.c.l.b16 %v578_v4  ;;  %v543_v17 = vpack.c.bf16 %v479_v8, %v479_v8  ;;  %v1236_v21 = vunpack.c.l.b16 %v593_v6  ;;  %v1237_v22 = vunpack.c.l.b16 %v594_v7  ;;  %v491_v8 = vld [vmem:[%s3418_s5 + $0xa0] sm:$0xff] }
  0x6a   : > { %969 = vmatpush.bf16.xpose.msra.mxu1 %v958_v1  ;;  %v544_v23 = vpack.c.bf16 %v480_v13, %v480_v13  ;;  %v812_v24 = vpack.c.b16 %v802_v10, %v801_v9  ;;  %v957_v25 = vpack.c.b16 %v947_v12, %v946_v11  ;;  %v559_v26 = vpack.c.bf16 %v495_v16, %v495_v16  ;;  %v492_v10 = vld [vmem:[%s3418_s5 + $0xa8] sm:$0xff]  ;;  %v507_v11 = vld [vmem:[%s3418_s5 + $0x120] sm:$0xff] }
  0x6b   : > { %1114 = vmatpush.bf16.xpose.msra.mxu2 %v1103_v2  ;;  %v1102_v29 = vpack.c.b16 %v1092_v15, %v1091_v14  ;;  %v560_v30 = vpack.c.bf16 %v496_v18, %v496_v18  ;;  %v575_v31 = vpack.c.bf16 %v511_v19, %v511_v19  ;;  %v576_v32 = vpack.c.bf16 %v512_v20, %v512_v20  ;;  %v508_v12 = vld [vmem:[%s3418_s5 + $0x128] sm:$0xff]  ;;  %v523_v19 = vld [vmem:[%s3418_s5 + $0x1a0] sm:$0xff] }
  0x6c   : > { %1259 = vmatpush.bf16.xpose.msra.mxu3 %v1248_v5  ;;  %v799_v33 = vunpack.c.l.b16 %v543_v17  ;;  %v1247_v34 = vpack.c.b16 %v1237_v22, %v1236_v21  ;;  %v800_v35 = vunpack.c.l.b16 %v544_v23  ;;  %v591_v36 = vpack.c.bf16 %v527_v27, %v527_v27  ;;  %v476_v5 = vld [vmem:[%s3418_s5 + $0x28] sm:$0xff] }
  0x6d   : > { %v592_v37 = vpack.c.bf16 %v528_v28, %v528_v28  ;;  %v944_v39 = vunpack.c.l.b16 %v559_v26  ;;  %v945_v40 = vunpack.c.l.b16 %v560_v30  ;;  %v1089_v41 = vunpack.c.l.b16 %v575_v31  ;;  %v524_v20 = vld [vmem:[%s3418_s5 + $0x1a8] sm:$0xff]  ;;  %v473_v30 = vld [vmem:[%s3418_s5 + $0x10] sm:$0xff] }
  0x6e   : > { %v1090_v42 = vunpack.c.l.b16 %v576_v32  ;;  %v811_v48 = vpack.c.b16 %v800_v35, %v799_v33  ;;  %v1234_v49 = vunpack.c.l.b16 %v591_v36  ;;  %v541_v51 = vpack.c.bf16 %v477_v38, %v477_v38  ;;  %v474_v35 = vld [vmem:[%s3418_s5 + $0x18] sm:$0xff]  ;;  %v489_v36 = vld [vmem:[%s3418_s5 + $0x90] sm:$0xff] }
  0x6f   : > { %v1235_v50 = vunpack.c.l.b16 %v592_v37  ;;  %v542_v52 = vpack.c.bf16 %v478_v43, %v478_v43  ;;  %v557_v53 = vpack.c.bf16 %v493_v44, %v493_v44  ;;  %v558_v54 = vpack.c.bf16 %v494_v45, %v494_v45  ;;  %v490_v37 = vld [vmem:[%s3418_s5 + $0x98] sm:$0xff]  ;;  %v505_v38 = vld [vmem:[%s3418_s5 + $0x110] sm:$0xff] }
  0x70   : > { %v956_v57 = vpack.c.b16 %v945_v40, %v944_v39  ;;  %v1101_v58 = vpack.c.b16 %v1090_v42, %v1089_v41  ;;  %v573_v59 = vpack.c.bf16 %v509_v46, %v509_v46  ;;  %v574_v60 = vpack.c.bf16 %v510_v47, %v510_v47  ;;  %v506_v39 = vld [vmem:[%s3418_s5 + $0x118] sm:$0xff]  ;;  %v521_v43 = vld [vmem:[%s3418_s5 + $0x190] sm:$0xff] }
  0x71   : > { %825 = vmatpush.bf16.xpose.msra.mxu0 %v812_v24  ;;  %v1246_v61 = vpack.c.b16 %v1235_v50, %v1234_v49  ;;  %v589_v62 = vpack.c.bf16 %v525_v55, %v525_v55  ;;  %v590_v63 = vpack.c.bf16 %v526_v56, %v526_v56  ;;  %v797_v1 = vunpack.c.l.b16 %v541_v51  ;;  %v522_v44 = vld [vmem:[%s3418_s5 + $0x198] sm:$0xff]  ;;  %v471_v56 = vld [vmem:[%s3418_s5] sm:$0xff] }
  0x72   : > { %970 = vmatpush.bf16.xpose.msra.mxu1 %v957_v25  ;;  %v798_v2 = vunpack.c.l.b16 %v542_v52  ;;  %v942_v3 = vunpack.c.l.b16 %v557_v53  ;;  %v943_v4 = vunpack.c.l.b16 %v558_v54  ;;  %v1087_v6 = vunpack.c.l.b16 %v573_v59 }
  0x73   : > { %1115 = vmatpush.bf16.xpose.msra.mxu2 %v1102_v29  ;;  %v1088_v7 = vunpack.c.l.b16 %v574_v60  ;;  %v539_v9 = vpack.c.bf16 %v475_v0, %v475_v0  ;;  %v1232_v13 = vunpack.c.l.b16 %v589_v62  ;;  %v1233_v14 = vunpack.c.l.b16 %v590_v63  ;;  %v487_v0 = vld [vmem:[%s3418_s5 + $0x80] sm:$0xff] }
  0x74   : > { %1260 = vmatpush.bf16.xpose.msra.mxu3 %v1247_v34  ;;  %v540_v15 = vpack.c.bf16 %v476_v5, %v476_v5  ;;  %v810_v16 = vpack.c.b16 %v798_v2, %v797_v1  ;;  %v955_v17 = vpack.c.b16 %v943_v4, %v942_v3  ;;  %v555_v18 = vpack.c.bf16 %v491_v8, %v491_v8  ;;  %v488_v5 = vld [vmem:[%s3418_s5 + $0x88] sm:$0xff]  ;;  %v519_v8 = vld [vmem:[%s3418_s5 + $0x180] sm:$0xff] }
  0x75   : > { %v1100_v21 = vpack.c.b16 %v1088_v7, %v1087_v6  ;;  %v556_v22 = vpack.c.bf16 %v492_v10, %v492_v10  ;;  %v571_v23 = vpack.c.bf16 %v507_v11, %v507_v11  ;;  %v572_v24 = vpack.c.bf16 %v508_v12, %v508_v12  ;;  %v503_v6 = vld [vmem:[%s3418_s5 + $0x100] sm:$0xff]  ;;  %v504_v7 = vld [vmem:[%s3418_s5 + $0x108] sm:$0xff] }
  0x76   : > { %v795_v25 = vunpack.c.l.b16 %v539_v9  ;;  %v1245_v26 = vpack.c.b16 %v1233_v14, %v1232_v13  ;;  %v796_v27 = vunpack.c.l.b16 %v540_v15  ;;  %v587_v28 = vpack.c.bf16 %v523_v19, %v523_v19  ;;  %v520_v9 = vld [vmem:[%s3418_s5 + $0x188] sm:$0xff]  ;;  %v279_v13 = vld [vmem:[%s3410_s27] sm:$0xff] }
  0x77   : > { %v588_v29 = vpack.c.bf16 %v524_v20, %v524_v20  ;;  %v940_v31 = vunpack.c.l.b16 %v555_v18  ;;  %v941_v32 = vunpack.c.l.b16 %v556_v22  ;;  %v1085_v33 = vunpack.c.l.b16 %v571_v23  ;;  %v280_v14 = vld [vmem:[%s3410_s27 + $0x8] sm:$0xff]  ;;  %v295_v15 = vld [vmem:[%s3410_s27 + $0x80] sm:$0xff] }
  0x78   : > { %v1086_v34 = vunpack.c.l.b16 %v572_v24  ;;  %v809_v40 = vpack.c.b16 %v796_v27, %v795_v25  ;;  %v1230_v41 = vunpack.c.l.b16 %v587_v28  ;;  %v537_v45 = vpack.c.bf16 %v473_v30, %v473_v30  ;;  %v296_v20 = vld [vmem:[%s3410_s27 + $0x88] sm:$0xff]  ;;  %v327_v27 = vld [vmem:[%s3410_s27 + $0x180] sm:$0xff] }
  0x79   : > { %826 = vmatpush.bf16.xpose.msra.mxu0 %v811_v48  ;;  %v1231_v42 = vunpack.c.l.b16 %v588_v29  ;;  %v538_v46 = vpack.c.bf16 %v474_v35, %v474_v35  ;;  %v553_v47 = vpack.c.bf16 %v489_v36, %v489_v36  ;;  %v554_v48 = vpack.c.bf16 %v490_v37, %v490_v37  ;;  %v312_v22 = vld [vmem:[%s3410_s27 + $0x108] sm:$0xff] }
  0x7a   : > { %971 = vmatpush.bf16.xpose.msra.mxu1 %v956_v57  ;;  %v954_v49 = vpack.c.b16 %v941_v32, %v940_v31  ;;  %v1099_v50 = vpack.c.b16 %v1086_v34, %v1085_v33  ;;  %v569_v51 = vpack.c.bf16 %v505_v38, %v505_v38  ;;  %v570_v52 = vpack.c.bf16 %v506_v39, %v506_v39  ;;  %v472_v57 = vld [vmem:[%s3418_s5 + $0x8] sm:$0xff] }
  0x7b   : > { %1116 = vmatpush.bf16.xpose.msra.mxu2 %v1101_v58  ;;  %v585_v53 = vpack.c.bf16 %v521_v43, %v521_v43  ;;  %v586_v54 = vpack.c.bf16 %v522_v44, %v522_v44  ;;  %v1244_v55 = vpack.c.b16 %v1231_v42, %v1230_v41  ;;  %v793_v58 = vunpack.c.l.b16 %v537_v45  ;;  %v328_v28 = vld [vmem:[%s3410_s27 + $0x188] sm:$0xff] }
  0x7c   : > { %1261 = vmatpush.bf16.xpose.msra.mxu3 %v1246_v61  ;;  %v794_v59 = vunpack.c.l.b16 %v538_v46  ;;  %v938_v60 = vunpack.c.l.b16 %v553_v47  ;;  %v939_v61 = vunpack.c.l.b16 %v554_v48  ;;  %v1083_v62 = vunpack.c.l.b16 %v569_v51 }
  0x7d   : > { %v1084_v63 = vunpack.c.l.b16 %v570_v52  ;;  %v1228_v1 = vunpack.c.l.b16 %v585_v53  ;;  %v1229_v2 = vunpack.c.l.b16 %v586_v54  ;;  %v535_v3 = vpack.c.bf16 %v471_v56, %v471_v56 }
  0x7e   : > { %v536_v4 = vpack.c.bf16 %v472_v57, %v472_v57  ;;  %v808_v10 = vpack.c.b16 %v794_v59, %v793_v58  ;;  %v953_v11 = vpack.c.b16 %v939_v61, %v938_v60  ;;  %v551_v12 = vpack.c.bf16 %v487_v0, %v487_v0 }
  0x7f   : > { %v567_v18 = vpack.c.bf16 %v503_v6, %v503_v6  ;;  %v568_v19 = vpack.c.bf16 %v504_v7, %v504_v7  ;;  %v1243_v23 = vpack.c.b16 %v1229_v2, %v1228_v1  ;;  %v791_v24 = vunpack.c.l.b16 %v535_v3  ;;  %v281_v1 = vld [vmem:[%s3410_s27 + $0x10] sm:$0xff]  ;;  %v298_v6 = vld [vmem:[%s3410_s27 + $0x98] sm:$0xff] }
  0x80   : > { %v792_v25 = vunpack.c.l.b16 %v536_v4  ;;  %v584_v29 = vpack.c.bf16 %v520_v9, %v520_v9  ;;  %v343_v30 = vmul.f32 0.088388346, %v279_v13  ;;  %v344_v31 = vmul.f32 0.088388346, %v280_v14  ;;  %v282_v4 = vld [vmem:[%s3410_s27 + $0x18] sm:$0xff]  ;;  %v313_v7 = vld [vmem:[%s3410_s27 + $0x110] sm:$0xff] }
  0x81   : > { %827 = vmatpush.bf16.xpose.msra.mxu0 %v810_v16  ;;  %v1098_v16 = vpack.c.b16 %v1084_v63, %v1083_v62  ;;  %v359_v32 = vmul.f32 0.088388346, %v295_v15  ;;  %v360_v33 = vmul.f32 0.088388346, %v296_v20  ;;  %v376_v35 = vmul.f32 0.088388346, %v312_v22 }
  0x82   : > { %972 = vmatpush.bf16.xpose.msra.mxu1 %v955_v17  ;;  %v552_v17 = vpack.c.bf16 %v488_v5, %v488_v5  ;;  %v936_v36 = vunpack.c.l.b16 %v551_v12  ;;  %v1081_v38 = vunpack.c.l.b16 %v567_v18  ;;  %v1082_v39 = vunpack.c.l.b16 %v568_v19  ;;  %v297_v5 = vld [vmem:[%s3410_s27 + $0x90] sm:$0xff]  ;;  %v330_v13 = vld [vmem:[%s3410_s27 + $0x198] sm:$0xff] }
  0x83   : > { %1117 = vmatpush.bf16.xpose.msra.mxu2 %v1100_v21  ;;  %v311_v21 = vld [vmem:[%s3410_s27 + $0x100] sm:$0xff]  ;;  %v391_v41 = vmul.f32 0.088388346, %v327_v27  ;;  %v392_v42 = vmul.f32 0.088388346, %v328_v28  ;;  %v1227_v44 = vunpack.c.l.b16 %v584_v29  ;;  %v407_v45 = vpack.c.bf16 %v343_v30, %v343_v30  ;;  %v329_v12 = vld [vmem:[%s3410_s27 + $0x190] sm:$0xff] }
  0x84   : > { %1262 = vmatpush.bf16.xpose.msra.mxu3 %v1245_v26  ;;  %v583_v26 = vpack.c.bf16 %v519_v8, %v519_v8  ;;  %v375_v34 = vmul.f32 0.088388346, %v311_v21  ;;  %v937_v37 = vunpack.c.l.b16 %v552_v17  ;;  %v408_v46 = vpack.c.bf16 %v344_v31, %v344_v31  ;;  %v314_v8 = vld [vmem:[%s3410_s27 + $0x118] sm:$0xff] }
  0x85   : > { %v423_v47 = vpack.c.bf16 %v359_v32, %v359_v32  ;;  %v424_v48 = vpack.c.bf16 %v360_v33, %v360_v33  ;;  %v1097_v52 = vpack.c.b16 %v1082_v39, %v1081_v38  ;;  %v455_v53 = vpack.c.bf16 %v391_v41, %v391_v41  ;;  %v315_v41 = vld [vmem:[%s3410_s27 + $0x120] sm:$0xff] }
  0x86   : > { %v1226_v43 = vunpack.c.l.b16 %v583_v26  ;;  %v952_v51 = vpack.c.b16 %v937_v37, %v936_v36  ;;  %v456_v54 = vpack.c.bf16 %v392_v42, %v392_v42  ;;  %v743_v56 = vunpack.c.l.b16 %v407_v45  ;;  %v283_v37 = vld [vmem:[%s3410_s27 + $0x20] sm:$0xff]  ;;  %v316_v42 = vld [vmem:[%s3410_s27 + $0x128] sm:$0xff] }
  0x87   : > { %v744_v57 = vunpack.c.l.b16 %v408_v46  ;;  %v888_v58 = vunpack.c.l.b16 %v423_v47  ;;  %v889_v59 = vunpack.c.l.b16 %v424_v48  ;;  %v1178_v62 = vunpack.c.l.b16 %v455_v53 }
  0x88   : > { %v1179_v63 = vunpack.c.l.b16 %v456_v54  ;;  %v361_v14 = vmul.f32 0.088388346, %v297_v5  ;;  %v362_v15 = vmul.f32 0.088388346, %v298_v6  ;;  %v378_v17 = vmul.f32 0.088388346, %v314_v8 }
  0x89   : > { %828 = vmatpush.bf16.xpose.msra.mxu0 %v809_v40  ;;  %v807_v40 = vpack.c.b16 %v792_v25, %v791_v24  ;;  %v759_v0 = vpack.c.b16 %v744_v57, %v743_v56  ;;  %v904_v2 = vpack.c.b16 %v889_v59, %v888_v58  ;;  %v393_v18 = vmul.f32 0.088388346, %v329_v12  ;;  %v286_v12 = vld [vmem:[%s3410_s27 + $0x38] sm:$0xff] }
  0x8a   : > { %973 = vmatpush.bf16.xpose.msra.mxu1 %v954_v49  ;;  %v439_v49 = vpack.c.bf16 %v375_v34, %v375_v34  ;;  %v1194_v9 = vpack.c.b16 %v1179_v63, %v1178_v62  ;;  %v394_v19 = vmul.f32 0.088388346, %v330_v13  ;;  %v425_v22 = vpack.c.bf16 %v361_v14, %v361_v14  ;;  %v317_v13 = vld [vmem:[%s3410_s27 + $0x130] sm:$0xff]  ;;  %v318_v14 = vld [vmem:[%s3410_s27 + $0x138] sm:$0xff] }
  0x8b   : > { %1118 = vmatpush.bf16.xpose.msra.mxu2 %v1099_v50  ;;  %v440_v50 = vpack.c.bf16 %v376_v35, %v376_v35  ;;  %v442_v25 = vpack.c.bf16 %v378_v17, %v378_v17  ;;  %v457_v26 = vpack.c.bf16 %v393_v18, %v393_v18  ;;  %v347_v46 = vmul.f32 0.088388346, %v283_v37 }
  0x8c   : > { %1263 = vmatpush.bf16.xpose.msra.mxu3 %v1244_v55  ;;  %v1242_v55 = vpack.c.b16 %v1227_v44, %v1226_v43  ;;  %v1033_v60 = vunpack.c.l.b16 %v439_v49  ;;  %v458_v27 = vpack.c.bf16 %v394_v19, %v394_v19  ;;  %v890_v30 = vunpack.c.l.b16 %v425_v22  ;;  %v299_v43 = vld [vmem:[%s3410_s27 + $0xa0] sm:$0xff]  ;;  %v300_v44 = vld [vmem:[%s3410_s27 + $0xa8] sm:$0xff]  ;;  %v334_v22 = vld [vmem:[%s3410_s27 + $0x1b8] sm:$0xff] }
  0x8d   : > { %v1034_v61 = vunpack.c.l.b16 %v440_v50  ;;  %v1036_v33 = vunpack.c.l.b16 %v442_v25  ;;  %v1180_v34 = vunpack.c.l.b16 %v457_v26  ;;  %v379_v48 = vmul.f32 0.088388346, %v315_v41  ;;  %v331_v49 = vld [vmem:[%s3410_s27 + $0x1a0] sm:$0xff]  ;;  %v332_v50 = vld [vmem:[%s3410_s27 + $0x1a8] sm:$0xff] }
  0x8e   : > { %v1181_v35 = vunpack.c.l.b16 %v458_v27  ;;  %v364_v53 = vmul.f32 0.088388346, %v300_v44  ;;  %v395_v54 = vmul.f32 0.088388346, %v331_v49  ;;  %v411_v56 = vpack.c.bf16 %v347_v46, %v347_v46  ;;  %v319_v49 = vld [vmem:[%s3410_s27 + $0x140] sm:$0xff] }
  0x8f   : > { %v1049_v3 = vpack.c.b16 %v1034_v61, %v1033_v60  ;;  %v443_v58 = vpack.c.bf16 %v379_v48, %v379_v48  ;;  %v350_v19 = vmul.f32 0.088388346, %v286_v12  ;;  %v398_v27 = vmul.f32 0.088388346, %v334_v22  ;;  %v288_v48 = vld [vmem:[%s3410_s27 + $0x48] sm:$0xff]  ;;  %v322_v22 = vld [vmem:[%s3410_s27 + $0x158] sm:$0xff] }
  0x90   : > { %v1195_v45 = vpack.c.b16 %v1181_v35, %v1180_v34  ;;  %v428_v61 = vpack.c.bf16 %v364_v53, %v364_v53  ;;  %v459_v62 = vpack.c.bf16 %v395_v54, %v395_v54  ;;  %v335_v54 = vld [vmem:[%s3410_s27 + $0x1c0] sm:$0xff] }
  0x91   : > { %829 = vmatpush.bf16.xpose.msra.mxu0 %v808_v10  ;;  %v345_v10 = vmul.f32 0.088388346, %v281_v1  ;;  %v462_v35 = vpack.c.bf16 %v398_v27, %v398_v27 }
  0x92   : > { %974 = vmatpush.bf16.xpose.msra.mxu1 %v953_v11  ;;  %v346_v11 = vmul.f32 0.088388346, %v282_v4  ;;  %v893_v5 = vunpack.c.l.b16 %v428_v61  ;;  %v1182_v6 = vunpack.c.l.b16 %v459_v62  ;;  %v399_v62 = vmul.f32 0.088388346, %v335_v54 }
  0x93   : > { %1119 = vmatpush.bf16.xpose.msra.mxu2 %v1098_v16  ;;  %v377_v16 = vmul.f32 0.088388346, %v313_v7  ;;  %v409_v20 = vpack.c.bf16 %v345_v10, %v345_v10 }
  0x94   : > { %1264 = vmatpush.bf16.xpose.msra.mxu3 %v1243_v23  ;;  %v410_v21 = vpack.c.bf16 %v346_v11, %v346_v11  ;;  %v426_v23 = vpack.c.bf16 %v362_v15, %v362_v15  ;;  %v301_v15 = vld [vmem:[%s3410_s27 + $0xb0] sm:$0xff] }
  0x95   : > { %v441_v24 = vpack.c.bf16 %v377_v16, %v377_v16  ;;  %v745_v28 = vunpack.c.l.b16 %v409_v20  ;;  %v302_v16 = vld [vmem:[%s3410_s27 + $0xb8] sm:$0xff]  ;;  %v381_v20 = vmul.f32 0.088388346, %v317_v13 }
  0x96   : > { %v746_v29 = vunpack.c.l.b16 %v410_v21  ;;  %v891_v31 = vunpack.c.l.b16 %v426_v23  ;;  %v333_v21 = vld [vmem:[%s3410_s27 + $0x1b0] sm:$0xff]  ;;  %v382_v23 = vmul.f32 0.088388346, %v318_v14  ;;  %v366_v25 = vmul.f32 0.088388346, %v302_v16 }
  0x97   : > { %v1035_v32 = vunpack.c.l.b16 %v441_v24  ;;  %v365_v24 = vmul.f32 0.088388346, %v301_v15  ;;  %v397_v26 = vmul.f32 0.088388346, %v333_v21  ;;  %v321_v21 = vld [vmem:[%s3410_s27 + $0x150] sm:$0xff] }
  0x98   : > { %v760_v36 = vpack.c.b16 %v746_v29, %v745_v28  ;;  %v905_v38 = vpack.c.b16 %v891_v31, %v890_v30  ;;  %v414_v29 = vpack.c.bf16 %v350_v19, %v350_v19  ;;  %v445_v30 = vpack.c.bf16 %v381_v20, %v381_v20  ;;  %v290_v20 = vld [vmem:[%s3410_s27 + $0x58] sm:$0xff] }
  0x99   : > { %830 = vmatpush.bf16.xpose.msra.mxu0 %v807_v40  ;;  %v1050_v39 = vpack.c.b16 %v1036_v33, %v1035_v32  ;;  %v284_v40 = vld [vmem:[%s3410_s27 + $0x28] sm:$0xff]  ;;  %v446_v31 = vpack.c.bf16 %v382_v23, %v382_v23  ;;  %v429_v32 = vpack.c.bf16 %v365_v24, %v365_v24  ;;  %v430_v33 = vpack.c.bf16 %v366_v25, %v366_v25  ;;  %v305_v23 = vld [vmem:[%s3410_s27 + $0xd0] sm:$0xff]  ;;  %v306_v24 = vld [vmem:[%s3410_s27 + $0xd8] sm:$0xff] }
  0x9a   : > { %975 = vmatpush.bf16.xpose.msra.mxu1 %v952_v51  ;;  %v348_v47 = vmul.f32 0.088388346, %v284_v40  ;;  %v380_v51 = vmul.f32 0.088388346, %v316_v42  ;;  %v461_v34 = vpack.c.bf16 %v397_v26, %v397_v26  ;;  %v750_v37 = vunpack.c.l.b16 %v414_v29  ;;  %v337_v29 = vld [vmem:[%s3410_s27 + $0x1d0] sm:$0xff] }
  0x9b   : > { %1120 = vmatpush.bf16.xpose.msra.mxu2 %v1097_v52  ;;  %v363_v52 = vmul.f32 0.088388346, %v299_v43  ;;  %v894_v40 = vunpack.c.l.b16 %v429_v32  ;;  %v895_v41 = vunpack.c.l.b16 %v430_v33  ;;  %v1185_v43 = vunpack.c.l.b16 %v462_v35 }
  0x9c   : > { %1265 = vmatpush.bf16.xpose.msra.mxu3 %v1242_v55  ;;  %v396_v55 = vmul.f32 0.088388346, %v332_v50  ;;  %v412_v57 = vpack.c.bf16 %v348_v47, %v348_v47  ;;  %v444_v59 = vpack.c.bf16 %v380_v51, %v380_v51  ;;  %v1184_v42 = vunpack.c.l.b16 %v461_v34  ;;  %v287_v47 = vld [vmem:[%s3410_s27 + $0x40] sm:$0xff]  ;;  %v320_v50 = vld [vmem:[%s3410_s27 + $0x148] sm:$0xff] }
  0x9d   : > { %v427_v60 = vpack.c.bf16 %v363_v52, %v363_v52  ;;  %v907_v46 = vpack.c.b16 %v895_v41, %v894_v40  ;;  %v303_v51 = vld [vmem:[%s3410_s27 + $0xc0] sm:$0xff]  ;;  %v304_v52 = vld [vmem:[%s3410_s27 + $0xc8] sm:$0xff]  ;;  %v354_v27 = vmul.f32 0.088388346, %v290_v20  ;;  %v369_v32 = vmul.f32 0.088388346, %v305_v23 }
  0x9e   : > { %v460_v63 = vpack.c.bf16 %v396_v55, %v396_v55  ;;  %v748_v1 = vunpack.c.l.b16 %v412_v57  ;;  %v1197_v53 = vpack.c.b16 %v1185_v43, %v1184_v42  ;;  %v336_v55 = vld [vmem:[%s3410_s27 + $0x1c8] sm:$0xff]  ;;  %v352_v57 = vmul.f32 0.088388346, %v288_v48 }
  0x9f   : > { %v892_v4 = vunpack.c.l.b16 %v427_v60  ;;  %v367_v60 = vmul.f32 0.088388346, %v303_v51  ;;  %v368_v61 = vmul.f32 0.088388346, %v304_v52  ;;  %v370_v33 = vmul.f32 0.088388346, %v306_v24 }
  0xa0   : > { %831 = vmatmul.bf16.vlgmr.msra.gmra.mxu0 %v759_v0  ;;  %v747_v0 = vunpack.c.l.b16 %v411_v56  ;;  %v1183_v7 = vunpack.c.l.b16 %v460_v63  ;;  %v351_v56 = vmul.f32 0.088388346, %v287_v47  ;;  %v400_v63 = vmul.f32 0.088388346, %v336_v55 }
  0xa1   : > { %976 = vmatmul.bf16.vlgmr.msra.gmra.mxu1 %v904_v2  ;;  %v1037_v2 = vunpack.c.l.b16 %v443_v58  ;;  %v906_v11 = vpack.c.b16 %v893_v5, %v892_v4  ;;  %v383_v58 = vmul.f32 0.088388346, %v319_v49  ;;  %v431_v4 = vpack.c.bf16 %v367_v60, %v367_v60  ;;  %v308_v60 = vld [vmem:[%s3410_s27 + $0xe8] sm:$0xff] }
  0xa2   : > { %1121 = vmatmul.bf16.vlgmr.msra.gmra.mxu2 %v1049_v3  ;;  %v1038_v3 = vunpack.c.l.b16 %v444_v59  ;;  %v761_v8 = vpack.c.b16 %v748_v1, %v747_v0  ;;  %v1196_v17 = vpack.c.b16 %v1183_v7, %v1182_v6  ;;  %v384_v59 = vmul.f32 0.088388346, %v320_v50 }
  0xa3   : > { %1266 = vmatmul.bf16.vlgmr.msra.gmra.mxu3 %v1194_v9  ;;  %v285_v9 = vld [vmem:[%s3410_s27 + $0x30] sm:$0xff]  ;;  %v415_v0 = vpack.c.bf16 %v351_v56, %v351_v56  ;;  %v416_v1 = vpack.c.bf16 %v352_v57, %v352_v57  ;;  %v432_v5 = vpack.c.bf16 %v368_v61, %v368_v61  ;;  %v463_v6 = vpack.c.bf16 %v399_v62, %v399_v62  ;;  %v291_v56 = vld [vmem:[%s3410_s27 + $0x60] sm:$0xff]  ;;  %v292_v57 = vld [vmem:[%s3410_s27 + $0x68] sm:$0xff] }
  0xa4   : > { %v1051_v10 = vpack.c.b16 %v1038_v3, %v1037_v2  ;;  %v349_v18 = vmul.f32 0.088388346, %v285_v9  ;;  %v447_v2 = vpack.c.bf16 %v383_v58, %v383_v58  ;;  %v448_v3 = vpack.c.bf16 %v384_v59, %v384_v59  ;;  %v324_v58 = vld [vmem:[%s3410_s27 + $0x168] sm:$0xff]  ;;  %v307_v59 = vld [vmem:[%s3410_s27 + $0xe0] sm:$0xff] }
  0xa5   : > { %v464_v7 = vpack.c.bf16 %v400_v63, %v400_v63  ;;  %v752_v9 = vunpack.c.l.b16 %v416_v1  ;;  %v896_v12 = vunpack.c.l.b16 %v431_v4  ;;  %v897_v13 = vunpack.c.l.b16 %v432_v5  ;;  %v339_v1 = vld [vmem:[%s3410_s27 + $0x1e0] sm:$0xff] }
  0xa6   : > { %v413_v28 = vpack.c.bf16 %v349_v18, %v349_v18  ;;  %v1186_v14 = vunpack.c.l.b16 %v463_v6  ;;  %v401_v34 = vmul.f32 0.088388346, %v337_v29  ;;  %v433_v40 = vpack.c.bf16 %v369_v32, %v369_v32  ;;  %v294_v32 = vld [vmem:[%s3410_s27 + $0x78] sm:$0xff] }
  0xa7   : > { %v1187_v15 = vunpack.c.l.b16 %v464_v7  ;;  %v908_v19 = vpack.c.b16 %v897_v13, %v896_v12  ;;  %v434_v41 = vpack.c.bf16 %v370_v33, %v370_v33  ;;  %v355_v63 = vmul.f32 0.088388346, %v291_v56  ;;  %v310_v56 = vld [vmem:[%s3410_s27 + $0xf8] sm:$0xff] }
  0xa8   : > { %v465_v42 = vpack.c.bf16 %v401_v34, %v401_v34  ;;  %v898_v48 = vunpack.c.l.b16 %v433_v40  ;;  %v371_v4 = vmul.f32 0.088388346, %v307_v59  ;;  %v372_v5 = vmul.f32 0.088388346, %v308_v60 }
  0xa9   : > { %v1198_v25 = vpack.c.b16 %v1187_v15, %v1186_v14  ;;  %v899_v49 = vunpack.c.l.b16 %v434_v41  ;;  %v403_v6 = vmul.f32 0.088388346, %v339_v1 }
  0xaa   : > { %v1188_v50 = vunpack.c.l.b16 %v465_v42  ;;  %v435_v12 = vpack.c.bf16 %v371_v4, %v371_v4  ;;  %v436_v13 = vpack.c.bf16 %v372_v5, %v372_v5 }
  0xab   : > { %v909_v55 = vpack.c.b16 %v899_v49, %v898_v48  ;;  %v467_v14 = vpack.c.bf16 %v403_v6, %v403_v6 }
  0xac   : > { %v900_v20 = vunpack.c.l.b16 %v435_v12 }
  0xb0   : > { %836 = vmatmul.bf16.gmra.mxu0 %v760_v36  ;;  %v749_v36 = vunpack.c.l.b16 %v413_v28  ;;  %v385_v28 = vmul.f32 0.088388346, %v321_v21  ;;  %v901_v21 = vunpack.c.l.b16 %v436_v13 }
  0xb1   : > { %981 = vmatmul.bf16.gmra.mxu1 %v905_v38  ;;  %v1039_v38 = vunpack.c.l.b16 %v445_v30  ;;  %v338_v30 = vld [vmem:[%s3410_s27 + $0x1d8] sm:$0xff] }
  0xb2   : > { %1126 = vmatmul.bf16.gmra.mxu2 %v1050_v39  ;;  %v1040_v39 = vunpack.c.l.b16 %v446_v31  ;;  %v762_v44 = vpack.c.b16 %v750_v37, %v749_v36  ;;  %v386_v31 = vmul.f32 0.088388346, %v322_v22  ;;  %v402_v35 = vmul.f32 0.088388346, %v338_v30 }
  0xb3   : > { %1271 = vmatmul.bf16.gmra.mxu3 %v1195_v45  ;;  %v418_v37 = vpack.c.bf16 %v354_v27, %v354_v27  ;;  %v1190_v22 = vunpack.c.l.b16 %v467_v14  ;;  %v325_v27 = vld [vmem:[%s3410_s27 + $0x170] sm:$0xff] }
  0xb4   : > { %v1052_v45 = vpack.c.b16 %v1040_v39, %v1039_v38  ;;  %v449_v38 = vpack.c.bf16 %v385_v28, %v385_v28  ;;  %v450_v39 = vpack.c.bf16 %v386_v31, %v386_v31  ;;  %v466_v43 = vpack.c.bf16 %v402_v35, %v402_v35  ;;  %v326_v28 = vld [vmem:[%s3410_s27 + $0x178] sm:$0xff]  ;;  %v293_v31 = vld [vmem:[%s3410_s27 + $0x70] sm:$0xff] }
  0xb5   : > { %v389_v30 = vmul.f32 0.088388346, %v325_v27  ;;  %v390_v33 = vmul.f32 0.088388346, %v326_v28  ;;  %v357_v34 = vmul.f32 0.088388346, %v293_v31 }
  0xb6   : > { %v1044_v47 = vunpack.c.l.b16 %v450_v39  ;;  %v1189_v51 = vunpack.c.l.b16 %v466_v43  ;;  %v358_v35 = vmul.f32 0.088388346, %v294_v32 }
  0xb7   : > { %v421_v40 = vpack.c.bf16 %v357_v34, %v357_v34  ;;  %v453_v42 = vpack.c.bf16 %v389_v30, %v389_v30  ;;  %v454_v43 = vpack.c.bf16 %v390_v33, %v390_v33 }
  0xb8   : > { %v1199_v61 = vpack.c.b16 %v1189_v51, %v1188_v50  ;;  %v422_v41 = vpack.c.bf16 %v358_v35, %v358_v35 }
  0xb9   : > { %v1047_v48 = vunpack.c.l.b16 %v453_v42  ;;  %v1048_v49 = vunpack.c.l.b16 %v454_v43 }
  0xc0   : > { %841 = vmatmul.bf16.gmra.mxu0 %v761_v8  ;;  %v751_v8 = vunpack.c.l.b16 %v415_v0  ;;  %v356_v0 = vmul.f32 0.088388346, %v292_v57 }
  0xc1   : > { %986 = vmatmul.bf16.gmra.mxu1 %v906_v11  ;;  %v1042_v11 = vunpack.c.l.b16 %v448_v3  ;;  %v388_v3 = vmul.f32 0.088388346, %v324_v58  ;;  %v374_v58 = vmul.f32 0.088388346, %v310_v56 }
  0xc2   : > { %1131 = vmatmul.bf16.gmra.mxu2 %v1051_v10  ;;  %v1041_v10 = vunpack.c.l.b16 %v447_v2  ;;  %v763_v16 = vpack.c.b16 %v752_v9, %v751_v8  ;;  %v340_v2 = vld [vmem:[%s3410_s27 + $0x1e8] sm:$0xff]  ;;  %v419_v8 = vpack.c.bf16 %v355_v63, %v355_v63  ;;  %v420_v9 = vpack.c.bf16 %v356_v0, %v356_v0 }
  0xc3   : > { %1276 = vmatmul.bf16.gmra.mxu3 %v1196_v17  ;;  %v289_v17 = vld [vmem:[%s3410_s27 + $0x50] sm:$0xff]  ;;  %v404_v7 = vmul.f32 0.088388346, %v340_v2  ;;  %v438_v60 = vpack.c.bf16 %v374_v58, %v374_v58 }
  0xc4   : > { %v1053_v18 = vpack.c.b16 %v1042_v11, %v1041_v10  ;;  %v353_v26 = vmul.f32 0.088388346, %v289_v17  ;;  %v452_v11 = vpack.c.bf16 %v388_v3, %v388_v3  ;;  %v756_v17 = vunpack.c.l.b16 %v420_v9 }
  0xc5   : > { %v468_v15 = vpack.c.bf16 %v404_v7, %v404_v7  ;;  %v903_v63 = vunpack.c.l.b16 %v438_v60 }
  0xc6   : > { %v417_v36 = vpack.c.bf16 %v353_v26, %v353_v26  ;;  %v910_v26 = vpack.c.b16 %v901_v21, %v900_v20 }
  0xc7   : > { %v1191_v23 = vunpack.c.l.b16 %v468_v15 }
  0xc9   : > { %v1200_v29 = vpack.c.b16 %v1191_v23, %v1190_v22 }
  0xd0   : > { %846 = vmatmul.bf16.gmra.mxu0 %v762_v44  ;;  %v753_v44 = vunpack.c.l.b16 %v417_v36  ;;  %v341_v36 = vld [vmem:[%s3410_s27 + $0x1f0] sm:$0xff] }
  0xd1   : > { %991 = vmatmul.bf16.gmra.mxu1 %v907_v46  ;;  %v1043_v46 = vunpack.c.l.b16 %v449_v38  ;;  %v405_v38 = vmul.f32 0.088388346, %v341_v36 }
  0xd2   : > { %1136 = vmatmul.bf16.gmra.mxu2 %v1052_v45  ;;  %v754_v45 = vunpack.c.l.b16 %v418_v37  ;;  %v342_v37 = vld [vmem:[%s3410_s27 + $0x1f8] sm:$0xff] }
  0xd3   : > { %1281 = vmatmul.bf16.gmra.mxu3 %v1197_v53  ;;  %v323_v53 = vld [vmem:[%s3410_s27 + $0x160] sm:$0xff]  ;;  %v1054_v54 = vpack.c.b16 %v1044_v47, %v1043_v46  ;;  %v406_v39 = vmul.f32 0.088388346, %v342_v37  ;;  %v757_v46 = vunpack.c.l.b16 %v421_v40  ;;  %v758_v47 = vunpack.c.l.b16 %v422_v41 }
  0xd4   : > { %v764_v52 = vpack.c.b16 %v754_v45, %v753_v44  ;;  %v387_v62 = vmul.f32 0.088388346, %v323_v53  ;;  %v469_v44 = vpack.c.bf16 %v405_v38, %v405_v38  ;;  %v1056_v53 = vpack.c.b16 %v1048_v49, %v1047_v48 }
  0xd5   : > { %v470_v45 = vpack.c.bf16 %v406_v39, %v406_v39 }
  0xd6   : > { %v451_v10 = vpack.c.bf16 %v387_v62, %v387_v62  ;;  %v1192_v50 = vunpack.c.l.b16 %v469_v44 }
  0xd7   : > { %v1193_v51 = vunpack.c.l.b16 %v470_v45 }
  0xe0   : > { %851 = vmatmul.bf16.gmra.mxu0 %v763_v16  ;;  %v755_v16 = vunpack.c.l.b16 %v419_v8 }
  0xe1   : > { %996 = vmatmul.bf16.gmra.mxu1 %v908_v19  ;;  %v1046_v19 = vunpack.c.l.b16 %v452_v11 }
  0xe2   : > { %1141 = vmatmul.bf16.gmra.mxu2 %v1053_v18  ;;  %v1045_v18 = vunpack.c.l.b16 %v451_v10  ;;  %v765_v24 = vpack.c.b16 %v756_v17, %v755_v16 }
  0xe3   : > { %1286 = vmatmul.bf16.gmra.mxu3 %v1198_v25 }
  0xe4   : > { %v1055_v25 = vpack.c.b16 %v1046_v19, %v1045_v18 }
  0xf0   : > { %856 = vmatmul.bf16.gmra.mxu0 %v764_v52  ;;  %v766_v52 = vpack.c.b16 %v758_v47, %v757_v46 }
  0xf1   : > { %1001 = vmatmul.bf16.gmra.mxu1 %v909_v55  ;;  %v309_v55 = vld [vmem:[%s3410_s27 + $0xf0] sm:$0xff] }
  0xf2   : > { %1146 = vmatmul.bf16.gmra.mxu2 %v1054_v54  ;;  %v1201_v54 = vpack.c.b16 %v1193_v51, %v1192_v50  ;;  %v373_v57 = vmul.f32 0.088388346, %v309_v55 }
  0xf3   : > { %1291 = vmatmul.bf16.gmra.mxu3 %v1199_v61 }
  0xf4   : > { %v437_v59 = vpack.c.bf16 %v373_v57, %v373_v57 }
  0xf6   : > { %v902_v62 = vunpack.c.l.b16 %v437_v59 }
  0xf8   : > { %v911_v1 = vpack.c.b16 %v903_v63, %v902_v62 }
 0x100   : > { %861 = vmatmul.bf16.gmra.mxu0 %v765_v24 }
 0x101   : > { %1006 = vmatmul.bf16.gmra.mxu1 %v910_v26 }
 0x102   : > { %1151 = vmatmul.bf16.gmra.mxu2 %v1055_v25 }
 0x103   : > { %1296 = vmatmul.bf16.gmra.mxu3 %v1200_v29 }
 0x110   : > { %866 = vmatmul.bf16.gmra.mxu0 %v766_v52 }
 0x111   : > { %1011 = vmatmul.bf16.gmra.mxu1 %v911_v1 }
 0x112   : > { %1156 = vmatmul.bf16.gmra.mxu2 %v1056_v53 }
 0x113   : > { %1301 = vmatmul.bf16.gmra.mxu3 %v1201_v54 }
 0x11d   : > { %v3552_v61 = vpop.f32.mrf.mxu0 }
 0x11e   : > { %v3554_v0 = vpop.f32.mrf.mxu1  ;;  %1307 = vmax.xlane.f32.xlu0 %v3552_v61 }
 0x11f   : > { %1339 = vmax.xlane.f32.xlu1 %v3554_v0 }
 0x125   : > { %v3558_v2 = vpop.f32.mrf.mxu2  ;;  %v3564_v4 = vpop.f32.mrf.mxu0 }
 0x126   : > { %v3560_v3 = vpop.f32.mrf.mxu3  ;;  %1371 = vmax.xlane.f32.xlu0 %v3558_v2  ;;  %v3566_v5 = vpop.f32.mrf.mxu1 }
 0x127   : > { %1403 = vmax.xlane.f32.xlu2 %v3560_v3 }
 0x12d   : > { %v3568_v6 = vpop.f32.mrf.mxu2  ;;  %v3575_v8 = vpop.f32.mrf.mxu0 }
 0x12e   : > { %1373 = vmax.xlane.f32.xlu1 %v3568_v6  ;;  %v3571_v7 = vpop.f32.mrf.mxu3  ;;  %1309 = vmax.xlane.f32.xlu0 %v3564_v4  ;;  %v3577_v9 = vpop.f32.mrf.mxu1 }
 0x12f   : > { %1341 = vmax.xlane.f32.xlu2 %v3566_v5 }
 0x135   : > { %v3583_v11 = vpop.f32.mrf.mxu2  ;;  %v3586_v12 = vpop.f32.mrf.mxu0 }
 0x136   : > { %1311 = vmax.xlane.f32.xlu1 %v3575_v8  ;;  %v3580_v10 = vpop.f32.mrf.mxu3  ;;  %1405 = vmax.xlane.f32.xlu0 %v3571_v7  ;;  %v3588_v13 = vpop.f32.mrf.mxu1 }
 0x137   : > { %1407 = vmax.xlane.f32.xlu2 %v3580_v10 }
 0x13d   : > { %v3593_v14 = vpop.f32.mrf.mxu2  ;;  %v3597_v16 = vpop.f32.mrf.mxu0 }
 0x13e   : > { %1343 = vmax.xlane.f32.xlu1 %v3577_v9  ;;  %1375 = vmax.xlane.f32.xlu0 %v3583_v11  ;;  %v3595_v15 = vpop.f32.mrf.mxu3  ;;  %v3606_v19 = vpop.f32.mrf.mxu1 }
 0x13f   : > { %1345 = vmax.xlane.f32.xlu2 %v3588_v13 }
 0x145   : > { %v3602_v17 = vpop.f32.mrf.mxu2  ;;  %v3611_v20 = vpop.f32.mrf.mxu0 }
 0x146   : > { %1313 = vmax.xlane.f32.xlu1 %v3586_v12  ;;  %1409 = vmax.xlane.f32.xlu0 %v3595_v15  ;;  %v3604_v18 = vpop.f32.mrf.mxu3  ;;  %v3619_v23 = vpop.f32.mrf.mxu1 }
 0x147   : > { %1315 = vmax.xlane.f32.xlu2 %v3597_v16 }
 0x14d   : > { %v3613_v21 = vpop.f32.mrf.mxu2  ;;  %v3622_v24 = vpop.f32.mrf.mxu0 }
 0x14e   : > { %1377 = vmax.xlane.f32.xlu1 %v3593_v14  ;;  %1379 = vmax.xlane.f32.xlu0 %v3602_v17  ;;  %v3615_v22 = vpop.f32.mrf.mxu3  ;;  %v3629_v26 = vpop.f32.mrf.mxu1 }
 0x14f   : > { %1411 = vmax.xlane.f32.xlu2 %v3604_v18 }
 0x155   : > { %v3625_v25 = vpop.f32.mrf.mxu2  ;;  %v3633_v28 = vpop.f32.mrf.mxu0 }
 0x156   : > { %1347 = vmax.xlane.f32.xlu1 %v3606_v19  ;;  %1413 = vmax.xlane.f32.xlu0 %v3615_v22  ;;  %v3631_v27 = vpop.f32.mrf.mxu3  ;;  %v3640_v30 = vpop.f32.mrf.mxu1 }
 0x157   : > { %1317 = vmax.xlane.f32.xlu2 %v3611_v20 }
 0x15d   : > { %v3638_v29 = vpop.f32.mrf.mxu2  ;;  %v3646_v32 = vpop.f32.mrf.mxu0 }
 0x15e   : > { %1381 = vmax.xlane.f32.xlu1 %v3613_v21  ;;  %1319 = vmax.xlane.f32.xlu0 %v3622_v24  ;;  %v3642_v31 = vpop.f32.mrf.mxu3  ;;  %v3651_v34 = vpop.f32.mrf.mxu1 }
 0x15f   : > { %1349 = vmax.xlane.f32.xlu2 %v3619_v23 }
 0x165   : > { %v3649_v33 = vpop.f32.mrf.mxu2  ;;  %v3658_v36 = vpop.f32.mrf.mxu0 }
 0x166   : > { %1321 = vmax.xlane.f32.xlu1 %v3633_v28  ;;  %1383 = vmax.xlane.f32.xlu0 %v3625_v25  ;;  %v3653_v35 = vpop.f32.mrf.mxu3  ;;  %v3662_v38 = vpop.f32.mrf.mxu1 }
 0x167   : > { %1351 = vmax.xlane.f32.xlu2 %v3629_v26  ;;  %4480 = vst [vmem:[#allocation14_spill] sm:$0xff] %v3662_v38 }
 0x16d   : > { %v3660_v37 = vpop.f32.mrf.mxu2  ;;  %v3667_v39 = vpop.f32.mrf.mxu0 }
 0x16e   : > { %1385 = vmax.xlane.f32.xlu1 %v3638_v29  ;;  %1353 = vmax.xlane.f32.xlu0 %v3640_v30  ;;  %4479 = vst [vmem:[#allocation13_spill] sm:$0xff] %v3660_v37  ;;  %v3669_v40 = vpop.f32.mrf.mxu3  ;;  %v3676_v42 = vpop.f32.mrf.mxu1 }
 0x16f   : > { %1415 = vmax.xlane.f32.xlu2 %v3631_v27  ;;  %4481 = vst [vmem:[#allocation15_spill] sm:$0xff] %v3667_v39 }
 0x170   : > { %4482 = vst [vmem:[#allocation16_spill] sm:$0xff] %v3669_v40 }
 0x171   : > { %4484 = vst [vmem:[#allocation18_spill] sm:$0xff] %v3676_v42 }
 0x175   : > { %v3671_v41 = vpop.f32.mrf.mxu2  ;;  %v3681_v44 = vpop.f32.mrf.mxu0 }
 0x176   : > { %1419 = vmax.xlane.f32.xlu1 %v3653_v35  ;;  %1417 = vmax.xlane.f32.xlu0 %v3642_v31  ;;  %4483 = vst [vmem:[#allocation17_spill] sm:$0xff] %v3671_v41  ;;  %v3678_v43 = vpop.f32.mrf.mxu3  ;;  %v3687_v47 = vpop.f32.mrf.mxu1 }
 0x177   : > { %1323 = vmax.xlane.f32.xlu2 %v3646_v32  ;;  %4485 = vst [vmem:[#allocation19_spill] sm:$0xff] %v3678_v43 }
 0x178   : > { %4486 = vst [vmem:[#allocation20_spill] sm:$0xff] %v3681_v44 }
 0x179   : > { %4488 = vst [vmem:[#allocation22_spill] sm:$0xff] %v3687_v47 }
 0x17d   : > { %v3683_v45 = vpop.f32.mrf.mxu2  ;;  %v3692_v49 = vpop.f32.mrf.mxu0 }
 0x17e   : > { %1325 = vmax.xlane.f32.xlu1 %v3658_v36  ;;  %1357 = vmax.xlane.f32.xlu0 %v3662_v38  ;;  %4487 = vst [vmem:[#allocation21_spill] sm:$0xff] %v3683_v45  ;;  %v3690_v48 = vpop.f32.mrf.mxu3  ;;  %v3700_v54 = vpop.f32.mrf.mxu1 }
 0x17f   : > { %1355 = vmax.xlane.f32.xlu2 %v3651_v34  ;;  %4489 = vst [vmem:[#allocation23_spill] sm:$0xff] %v3690_v48 }
 0x180   : > { %4490 = vst [vmem:[#allocation24_spill] sm:$0xff] %v3692_v49 }
 0x181   : > { %4492 = vst [vmem:[#allocation26_spill] sm:$0xff] %v3700_v54 }
 0x185   : > { %v3696_v51 = vpop.f32.mrf.mxu2  ;;  %v3707_v56 = vpop.f32.mrf.mxu0 }
 0x186   : > { %1327 = vmax.xlane.f32.xlu1 %v3667_v39  ;;  %1389 = vmax.xlane.f32.xlu0 %v3660_v37  ;;  %4491 = vst [vmem:[#allocation25_spill] sm:$0xff] %v3696_v51  ;;  %v3703_v55 = vpop.f32.mrf.mxu3 }
 0x187   : > { %1387 = vmax.xlane.f32.xlu2 %v3649_v33  ;;  %4493 = vst [vmem:[#allocation27_spill] sm:$0xff] %v3703_v55 }
 0x188   : > { %4494 = vst [vmem:[#allocation28_spill] sm:$0xff] %v3707_v56 }
 0x18d   : > { %v3711_v59 = vpop.f32.mrf.mxu2 }
 0x18e   : > { %1423 = vmax.xlane.f32.xlu1 %v3678_v43  ;;  %1359 = vmax.xlane.f32.xlu0 %v3676_v42  ;;  %4495 = vst [vmem:[#allocation29_spill] sm:$0xff] %v3711_v59  ;;  %v3716_v62 = vpop.f32.mrf.mxu3 }
 0x18f   : > { %1421 = vmax.xlane.f32.xlu2 %v3669_v40  ;;  %4496 = vst [vmem:[#allocation30_spill] sm:$0xff] %v3716_v62 }
 0x191   : > { %v1308_v46 = vpop.xlane.xlu0 %1307 }
 0x192   : > { %v1340_v50 = vpop.xlane.xlu1 %1339  ;;  %v1435_v43 = vsub.f32 %v3552_v61, %v1308_v46 }
 0x193   : > { %v1451_v46 = vsub.f32 %v3554_v0, %v1340_v50 }
 0x195   : > { %v1531_v40 = vmul.f32 1.442695, %v1451_v46 }
 0x196   : > { %1361 = vmax.xlane.f32.xlu1 %v3687_v47  ;;  %1393 = vmax.xlane.f32.xlu0 %v3683_v45 }
 0x197   : > { %1391 = vmax.xlane.f32.xlu2 %v3671_v41  ;;  %v3737_v41 = vpop.f32.mrf.mxu1 }
 0x199   : > { %v1372_v52 = vpop.xlane.xlu0 %1371 }
 0x19a   : > { %v3698_v53 = vpop.xlane.xlu2 %1403  ;;  %v1467_v61 = vsub.f32 %v3558_v2, %v1372_v52 }
 0x19b   : > { %v1483_v0 = vsub.f32 %v3560_v3, %v3698_v53 }
 0x19e   : > { %1363 = vmax.xlane.f32.xlu1 %v3700_v54  ;;  %1395 = vmax.xlane.f32.xlu0 %v3696_v51  ;;  %v3722_v51 = vpop.f32.mrf.mxu0 }
 0x19f   : > { %1329 = vmax.xlane.f32.xlu2 %v3681_v44  ;;  %4497 = vst [vmem:[#allocation31_spill] sm:$0xff] %v3722_v51  ;;  %v3726_v44 = vpop.f32.mrf.mxu2  ;;  %v3751_v39 = vpop.f32.mrf.mxu1 }
 0x1a0   : > { %4498 = vst [vmem:[#allocation32_spill] sm:$0xff] %v3726_v44 }
 0x1a1   : > { %v3709_v57 = vpop.xlane.xlu1 %1373  ;;  %v1310_v58 = vpop.xlane.xlu0 %1309  ;;  %4501 = vst [vmem:[#allocation35_spill] sm:$0xff] %v3751_v39 }
 0x1a2   : > { %v1342_v60 = vpop.xlane.xlu2 %1341  ;;  %v1468_v53 = vsub.f32 %v3568_v6, %v3709_v57 }
 0x1a3   : > { %v1452_v2 = vsub.f32 %v3566_v5, %v1342_v60 }
 0x1a6   : > { %1397 = vmax.xlane.f32.xlu1 %v3711_v59  ;;  %1333 = vmax.xlane.f32.xlu0 %v3707_v56  ;;  %v3739_v47 = vpop.f32.mrf.mxu0 }
 0x1a7   : > { %1425 = vmax.xlane.f32.xlu2 %v3690_v48  ;;  %v3733_v48 = vpop.f32.mrf.mxu3  ;;  %4500 = vst [vmem:[#allocation34_spill] sm:$0xff] %v3739_v47 }
 0x1a8   : > { %4499 = vst [vmem:[#allocation33_spill] sm:$0xff] %v3733_v48 }
 0x1a9   : > { %v3718_v63 = vpop.xlane.xlu1 %1311  ;;  %v3720_v1 = vpop.xlane.xlu0 %1405 }
 0x1aa   : > { %v3724_v54 = vpop.xlane.xlu2 %1407  ;;  %v1484_v3 = vsub.f32 %v3571_v7, %v3720_v1  ;;  %v1437_v6 = vsub.f32 %v3575_v8, %v3718_v63 }
 0x1ae   : > { %1399 = vmax.xlane.f32.xlu1 %v3726_v44  ;;  %1429 = vmax.xlane.f32.xlu0 %v3716_v62 }
 0x1af   : > { %1331 = vmax.xlane.f32.xlu2 %v3692_v49  ;;  %v1499_v49 = vmul.f32 1.442695, %v1435_v43  ;;  %v3753_v38 = vpop.f32.mrf.mxu3 }
 0x1b0   : > { %4502 = vst [vmem:[#allocation36_spill] sm:$0xff] %v3753_v38 }
 0x1b1   : > { %v1344_v59 = vpop.xlane.xlu1 %1343  ;;  %v3731_v56 = vpop.xlane.xlu0 %1375  ;;  %2818 = vpow2.f32 %v1499_v49  ;;  %v1436_v49 = vsub.f32 %v3564_v4, %v1310_v58 }
 0x1b2   : > { %v3735_v45 = vpop.xlane.xlu2 %1345  ;;  %v3790_v4 = vpop.f32.mrf.mxu2  ;;  %v1469_v57 = vsub.f32 %v3583_v11, %v3731_v56 }
 0x1b3   : > { %v1501_v5 = vmul.f32 1.442695, %v1436_v49  ;;  %4505 = vst [vmem:[#allocation39_spill] sm:$0xff] %v3790_v4 }
 0x1b4   : > { %v1567_v8 = vmul.f32 1.442695, %v1469_v57 }
 0x1b6   : > { %1337 = vmax.xlane.f32.xlu1 %v3739_v47  ;;  %1335 = vmax.xlane.f32.xlu0 %v3722_v51  ;;  %v1563_v51 = vmul.f32 1.442695, %v1467_v61  ;;  %v1533_v61 = vmul.f32 1.442695, %v1452_v2 }
 0x1b7   : > { %1427 = vmax.xlane.f32.xlu2 %v3703_v55  ;;  %v3766_v37 = vpop.eup %2818 }
 0x1b8   : > { %2820 = vpow2.f32 %v1563_v51  ;;  %v1595_v51 = vmul.f32 1.442695, %v1483_v0  ;;  %v1597_v0 = vmul.f32 1.442695, %v1484_v3 }
 0x1b9   : > { %v3745_v44 = vpop.xlane.xlu1 %1313  ;;  %v3747_v62 = vpop.xlane.xlu0 %1409  ;;  %2822 = vpow2.f32 %v1531_v40  ;;  %v1453_v40 = vsub.f32 %v3577_v9, %v1344_v59  ;;  %v1485_v59 = vsub.f32 %v3580_v10, %v3724_v54  ;;  %v1454_v10 = vsub.f32 %v3588_v13, %v3735_v45 }
 0x1ba   : > { %v3749_v42 = vpop.xlane.xlu2 %1315  ;;  %2824 = vpow2.f32 %v1533_v61  ;;  %v1565_v61 = vmul.f32 1.442695, %v1468_v53  ;;  %v1486_v54 = vsub.f32 %v3595_v15, %v3747_v62  ;;  %v1438_v56 = vsub.f32 %v3586_v12, %v3745_v44 }
 0x1bb   : > { %2826 = vpow2.f32 %v1595_v51  ;;  %v1535_v7 = vmul.f32 1.442695, %v1453_v40  ;;  %v1503_v40 = vmul.f32 1.442695, %v1437_v6  ;;  %v1537_v57 = vmul.f32 1.442695, %v1454_v10 }
 0x1bc   : > { %2828 = vpow2.f32 %v1501_v5  ;;  %v1601_v13 = vmul.f32 1.442695, %v1486_v54  ;;  %v1439_v44 = vsub.f32 %v3597_v16, %v3749_v42  ;;  %v613_v54 = vld [vmem:[%s3861_s22 + $0x70] sm:$0xff] }
 0x1bd   : > { %2830 = vpow2.f32 %v1597_v0  ;;  %v1599_v0 = vmul.f32 1.442695, %v1485_v59 }
 0x1be   : > { %1433 = vmax.xlane.f32.xlu1 %v3753_v38  ;;  %1431 = vmax.xlane.f32.xlu0 %v3733_v48  ;;  %v3768_v38 = vpop.f32.mrf.mxu1  ;;  %v3783_v48 = vpop.eup %2820  ;;  %2832 = vpow2.f32 %v1535_v7 }
 0x1bf   : > { %1365 = vmax.xlane.f32.xlu2 %v3737_v41  ;;  %4503 = vst [vmem:[#allocation37_spill] sm:$0xff] %v3768_v38  ;;  %v3785_v60 = vpop.eup %2822  ;;  %2834 = vpow2.f32 %v1565_v61 }
 0x1c0   : > { %4504 = vst [vmem:[#allocation38_spill] sm:$0xff] %v3783_v48  ;;  %v3803_v1 = vpop.eup %2824  ;;  %2836 = vpow2.f32 %v1503_v40  ;;  %v1505_v40 = vmul.f32 1.442695, %v1438_v56  ;;  %v614_v56 = vld [vmem:[%s3861_s22 + $0x78] sm:$0xff] }
 0x1c1   : > { %v3760_v47 = vpop.xlane.xlu1 %1377  ;;  %v3762_v43 = vpop.xlane.xlu0 %1379  ;;  %4506 = vst [vmem:[#allocation40_spill] sm:$0xff] %v3803_v1  ;;  %2838 = vpow2.f32 %v1567_v8 }
 0x1c2   : > { %v3764_v55 = vpop.xlane.xlu2 %1411  ;;  %v3805_v51 = vpop.eup %2826  ;;  %2840 = vpow2.f32 %v1599_v0  ;;  %v1470_v12 = vsub.f32 %v3593_v14, %v3760_v47  ;;  %v1471_v62 = vsub.f32 %v3602_v17, %v3762_v43  ;;  %v645_v14 = vld [vmem:[%s3861_s22 + $0x170] sm:$0xff]  ;;  %v646_v47 = vld [vmem:[%s3861_s22 + $0x178] sm:$0xff] }
 0x1c3   : > { %4507 = vst [vmem:[#allocation41_spill] sm:$0xff] %v3805_v51  ;;  %v3808_v9 = vpop.eup %2828  ;;  %2842 = vpow2.f32 %v1537_v57  ;;  %v661_v0 = vld [vmem:[%s3861_s22 + $0x1f0] sm:$0xff]  ;;  %v709_v42 = vpack.c.bf16 %v645_v14, %v645_v14  ;;  %v710_v17 = vpack.c.bf16 %v646_v47, %v646_v47  ;;  %v662_v43 = vld [vmem:[%s3861_s22 + $0x1f8] sm:$0xff] }
 0x1c4   : > { %4508 = vst [vmem:[#allocation42_spill] sm:$0xff] %v3808_v9  ;;  %v3824_v63 = vpop.eup %2830  ;;  %2844 = vpow2.f32 %v1601_v13  ;;  %v725_v10 = vpack.c.bf16 %v661_v0, %v661_v0  ;;  %v726_v13 = vpack.c.bf16 %v662_v43, %v662_v43  ;;  %v1571_v14 = vmul.f32 1.442695, %v1471_v62  ;;  %v644_v62 = vld [vmem:[%s3861_s22 + $0x168] sm:$0xff] }
 0x1c5   : > { %4509 = vst [vmem:[#allocation43_spill] sm:$0xff] %v3824_v63  ;;  %v3826_v7 = vpop.eup %2832  ;;  %2846 = vpow2.f32 %v1505_v40  ;;  %v2316_v40 = vunpack.c.l.b16 %v710_v17  ;;  %v1507_v0 = vmul.f32 1.442695, %v1439_v44  ;;  %v643_v44 = vld [vmem:[%s3861_s22 + $0x160] sm:$0xff] }
 0x1c6   : > { %1627 = vadd.xlane.f32.xlu1 %v3766_v37  ;;  %1369 = vmax.xlane.f32.xlu0 %v3768_v38  ;;  %4510 = vst [vmem:[#allocation44_spill] sm:$0xff] %v3826_v7  ;;  %v3829_v11 = vpop.eup %2834  ;;  %v629_v38 = vld [vmem:[%s3861_s22 + $0xf0] sm:$0xff] }
 0x1c7   : > { %1367 = vmax.xlane.f32.xlu2 %v3751_v39  ;;  %4511 = vst [vmem:[#allocation45_spill] sm:$0xff] %v3829_v11  ;;  %v3845_v45 = vpop.eup %2836  ;;  %v2315_v39 = vunpack.c.l.b16 %v709_v42 }
 0x1c8   : > { %4512 = vst [vmem:[#allocation46_spill] sm:$0xff] %v3845_v45  ;;  %v3847_v8 = vpop.eup %2838 }
 0x1c9   : > { %v3777_v50 = vpop.xlane.xlu1 %1347  ;;  %v3779_v52 = vpop.xlane.xlu0 %1413  ;;  %4513 = vst [vmem:[#allocation47_spill] sm:$0xff] %v3847_v8 }
 0x1ca   : > { %v3781_v46 = vpop.xlane.xlu2 %1317  ;;  %v3850_v15 = vpop.eup %2840 }
 0x1cb   : > { %4514 = vst [vmem:[#allocation48_spill] sm:$0xff] %v3850_v15 }
 0x1ce   : > { %1691 = vadd.xlane.f32.xlu1 %v3783_v48  ;;  %1659 = vadd.xlane.f32.xlu0 %v3785_v60  ;;  %v3877_v48 = vpop.eup %2842 }
 0x1cf   : > { %1401 = vmax.xlane.f32.xlu2 %v3790_v4  ;;  %v2460_v4 = vunpack.c.l.b16 %v725_v10  ;;  %v3879_v43 = vpop.eup %2844 }
 0x1d0   : > { %v3884_v10 = vpop.eup %2846 }
 0x1d1   : > { %v3797_v58 = vpop.xlane.xlu1 %1381  ;;  %v3799_v2 = vpop.xlane.xlu0 %1319 }
 0x1d2   : > { %v3801_v49 = vpop.xlane.xlu2 %1349 }
 0x1d6   : > { %1661 = vadd.xlane.f32.xlu1 %v3803_v1  ;;  %1723 = vadd.xlane.f32.xlu0 %v3805_v51  ;;  %v2324_v51 = vpack.c.b16 %v2316_v40, %v2315_v39  ;;  %v693_v1 = vpack.c.bf16 %v629_v38, %v629_v38  ;;  %v707_v40 = vpack.c.bf16 %v643_v44, %v643_v44 }
 0x1d7   : > { %1629 = vadd.xlane.f32.xlu2 %v3808_v9 }
 0x1d8   : > { %2333 = vmatpush.bf16.msrb.mxu2 %v2324_v51  ;;  %v2170_v38 = vunpack.c.l.b16 %v693_v1 }
 0x1d9   : > { %v3818_v5 = vpop.xlane.xlu1 %1321  ;;  %v3820_v3 = vpop.xlane.xlu0 %1383 }
 0x1da   : > { %v3822_v53 = vpop.xlane.xlu2 %1351 }
 0x1de   : > { %1725 = vadd.xlane.f32.xlu1 %v3824_v63  ;;  %1663 = vadd.xlane.f32.xlu0 %v3826_v7  ;;  %v2461_v63 = vunpack.c.l.b16 %v726_v13 }
 0x1df   : > { %1693 = vadd.xlane.f32.xlu2 %v3829_v11  ;;  %v630_v11 = vld [vmem:[%s3861_s22 + $0xf8] sm:$0xff] }
 0x1e0   : > { %v2469_v42 = vpack.c.b16 %v2461_v63, %v2460_v4  ;;  %v694_v17 = vpack.c.bf16 %v630_v11, %v630_v11  ;;  %v1472_v11 = vsub.f32 %v3613_v21, %v3797_v58  ;;  %v708_v21 = vpack.c.bf16 %v644_v62, %v644_v62  ;;  %v660_v58 = vld [vmem:[%s3861_s22 + $0x1e8] sm:$0xff] }
 0x1e1   : > { %v3839_v61 = vpop.xlane.xlu1 %1385  ;;  %v3841_v6 = vpop.xlane.xlu0 %1353 }
 0x1e2   : > { %v3843_v59 = vpop.xlane.xlu2 %1415  ;;  %2478 = vmatpush.bf16.msrb.mxu3 %v2469_v42 }
 0x1e6   : > { %1631 = vadd.xlane.f32.xlu1 %v3845_v45  ;;  %1695 = vadd.xlane.f32.xlu0 %v3847_v8  ;;  %v677_v8 = vpack.c.bf16 %v613_v54, %v613_v54  ;;  %v678_v45 = vpack.c.bf16 %v614_v56, %v614_v56  ;;  %v659_v54 = vld [vmem:[%s3861_s22 + $0x1e0] sm:$0xff]  ;;  %v1456_v56 = vsub.f32 %v3619_v23, %v3801_v49  ;;  %v2314_v23 = vunpack.c.l.b16 %v708_v21 }
 0x1e7   : > { %1727 = vadd.xlane.f32.xlu2 %v3850_v15  ;;  %v1569_v15 = vmul.f32 1.442695, %v1470_v12  ;;  %v1487_v12 = vsub.f32 %v3604_v18, %v3764_v55  ;;  %v2171_v18 = vunpack.c.l.b16 %v694_v17  ;;  %v627_v17 = vld [vmem:[%s3861_s22 + $0xe0] sm:$0xff] }
 0x1e8   : > { %v2025_v47 = vunpack.c.l.b16 %v677_v8  ;;  %v2026_v9 = vunpack.c.l.b16 %v678_v45  ;;  %v1455_v8 = vsub.f32 %v3606_v19, %v3777_v50  ;;  %v1440_v45 = vsub.f32 %v3611_v20, %v3781_v46 }
 0x1e9   : > { %v3866_v16 = vpop.xlane.xlu1 %1419  ;;  %v3871_v57 = vpop.xlane.xlu0 %1417  ;;  %2848 = vpow2.f32 %v1569_v15  ;;  %v1603_v4 = vmul.f32 1.442695, %v1487_v12  ;;  %v2179_v19 = vpack.c.b16 %v2171_v18, %v2170_v38  ;;  %v1488_v15 = vsub.f32 %v3615_v22, %v3779_v52 }
 0x1ea   : > { %v3874_v7 = vpop.xlane.xlu2 %1323  ;;  %v2034_v39 = vpack.c.b16 %v2026_v9, %v2025_v47  ;;  %2850 = vpow2.f32 %v1571_v14  ;;  %v1539_v50 = vmul.f32 1.442695, %v1455_v8  ;;  %v1509_v51 = vmul.f32 1.442695, %v1440_v45  ;;  %v611_v47 = vld [vmem:[%s3861_s22 + $0x60] sm:$0xff]  ;;  %v628_v45 = vld [vmem:[%s3861_s22 + $0xe8] sm:$0xff] }
 0x1eb   : > { %2852 = vpow2.f32 %v1507_v0  ;;  %2188 = vmatpush.bf16.msrb.mxu1 %v2179_v19  ;;  %v723_v14 = vpack.c.bf16 %v659_v54, %v659_v54  ;;  %v612_v0 = vld [vmem:[%s3861_s22 + $0x68] sm:$0xff]  ;;  %v724_v22 = vpack.c.bf16 %v660_v58, %v660_v58  ;;  %v675_v52 = vpack.c.bf16 %v611_v47, %v611_v47 }
 0x1ec   : > { %2043 = vmatpush.bf16.msrb.mxu0 %v2034_v39  ;;  %2854 = vpow2.f32 %v1603_v4  ;;  %v676_v42 = vpack.c.bf16 %v612_v0, %v612_v0  ;;  %v1573_v8 = vmul.f32 1.442695, %v1472_v11  ;;  %v2313_v38 = vunpack.c.l.b16 %v707_v40 }
 0x1ed   : > { %2856 = vpow2.f32 %v1539_v50  ;;  %v2458_v49 = vunpack.c.l.b16 %v723_v14  ;;  %v1605_v4 = vmul.f32 1.442695, %v1488_v15  ;;  %v2459_v19 = vunpack.c.l.b16 %v724_v22 }
 0x1ee   : > { %1665 = vadd.xlane.f32.xlu1 %v3877_v48  ;;  %1729 = vadd.xlane.f32.xlu0 %v3879_v43  ;;  %2858 = vpow2.f32 %v1509_v51  ;;  %v2023_v50 = vunpack.c.l.b16 %v675_v52  ;;  %v1541_v44 = vmul.f32 1.442695, %v1456_v56  ;;  %v2323_v62 = vpack.c.b16 %v2314_v23, %v2313_v38 }
 0x1ef   : > { %1633 = vadd.xlane.f32.xlu2 %v3884_v10  ;;  %v3898_v20 = vpop.eup %2848  ;;  %v2024_v54 = vunpack.c.l.b16 %v676_v42  ;;  %v691_v58 = vpack.c.bf16 %v627_v17, %v627_v17  ;;  %v1441_v11 = vsub.f32 %v3622_v24, %v3799_v2  ;;  %v2468_v40 = vpack.c.b16 %v2459_v19, %v2458_v49  ;;  %v641_v49 = vld [vmem:[%s3861_s22 + $0x150] sm:$0xff] }
 0x1f0   : > { %v3900_v46 = vpop.eup %2850  ;;  %v692_v21 = vpack.c.bf16 %v628_v45, %v628_v45  ;;  %2860 = vpow2.f32 %v1573_v8  ;;  %v1473_v15 = vsub.f32 %v3625_v25, %v3820_v3  ;;  %2334 = vmatpush.bf16.msrb.mxu2 %v2323_v62  ;;  %v1457_v0 = vsub.f32 %v3629_v26, %v3822_v53  ;;  %v642_v45 = vld [vmem:[%s3861_s22 + $0x158] sm:$0xff] }
 0x1f1   : > { %v3892_v55 = vpop.xlane.xlu1 %1325  ;;  %v3894_v63 = vpop.xlane.xlu0 %1357  ;;  %v2033_v56 = vpack.c.b16 %v2024_v54, %v2023_v50  ;;  %v2168_v14 = vunpack.c.l.b16 %v691_v58  ;;  %2862 = vpow2.f32 %v1605_v4  ;;  %2479 = vmatpush.bf16.msrb.mxu3 %v2468_v40  ;;  %v1511_v22 = vmul.f32 1.442695, %v1441_v11  ;;  %v657_v4 = vld [vmem:[%s3861_s22 + $0x1d0] sm:$0xff]  ;;  %v610_v58 = vld [vmem:[%s3861_s22 + $0x58] sm:$0xff] }
 0x1f2   : > { %v3896_v1 = vpop.xlane.xlu2 %1355  ;;  %v3903_v9 = vpop.eup %2852  ;;  %v2169_v24 = vunpack.c.l.b16 %v692_v21  ;;  %2864 = vpow2.f32 %v1541_v44  ;;  %v1575_v3 = vmul.f32 1.442695, %v1473_v15  ;;  %v1543_v17 = vmul.f32 1.442695, %v1457_v0  ;;  %v658_v44 = vld [vmem:[%s3861_s22 + $0x1d8] sm:$0xff]  ;;  %v609_v54 = vld [vmem:[%s3861_s22 + $0x50] sm:$0xff] }
 0x1f3   : > { %v3927_v18 = vpop.eup %2854  ;;  %2044 = vmatpush.bf16.msrb.mxu0 %v2033_v56  ;;  %2866 = vpow2.f32 %v1511_v22  ;;  %v1442_v38 = vsub.f32 %v3633_v28, %v3818_v5  ;;  %v1489_v23 = vsub.f32 %v3631_v27, %v3843_v59  ;;  %v1474_v19 = vsub.f32 %v3638_v29, %v3839_v61  ;;  %v625_v21 = vld [vmem:[%s3861_s22 + $0xd0] sm:$0xff]  ;;  %v626_v0 = vld [vmem:[%s3861_s22 + $0xd8] sm:$0xff] }
 0x1f4   : > { %v3929_v51 = vpop.eup %2856  ;;  %v2178_v25 = vpack.c.b16 %v2169_v24, %v2168_v14  ;;  %2868 = vpow2.f32 %v1575_v3  ;;  %v705_v28 = vpack.c.bf16 %v641_v49, %v641_v49  ;;  %v706_v5 = vpack.c.bf16 %v642_v45, %v642_v45 }
 0x1f5   : > { %v3931_v47 = vpop.eup %2858  ;;  %2870 = vpow2.f32 %v1543_v17  ;;  %v721_v62 = vpack.c.bf16 %v657_v4, %v657_v4  ;;  %v722_v27 = vpack.c.bf16 %v658_v44, %v658_v44  ;;  %v673_v59 = vpack.c.bf16 %v609_v54, %v609_v54 }
 0x1f6   : > { %1697 = vadd.xlane.f32.xlu1 %v3898_v20  ;;  %1699 = vadd.xlane.f32.xlu0 %v3900_v46  ;;  %v3948_v26 = vpop.eup %2860  ;;  %v674_v40 = vpack.c.bf16 %v610_v58, %v610_v58  ;;  %v1513_v15 = vmul.f32 1.442695, %v1442_v38  ;;  %v2311_v14 = vunpack.c.l.b16 %v705_v28  ;;  %v2312_v29 = vunpack.c.l.b16 %v706_v5 }
 0x1f7   : > { %1635 = vadd.xlane.f32.xlu2 %v3903_v9  ;;  %2189 = vmatpush.bf16.msrb.mxu1 %v2178_v25  ;;  %v3950_v53 = vpop.eup %2862  ;;  %v2456_v61 = vunpack.c.l.b16 %v721_v62  ;;  %v1607_v22 = vmul.f32 1.442695, %v1489_v23  ;;  %v2457_v25 = vunpack.c.l.b16 %v722_v27  ;;  %v2021_v3 = vunpack.c.l.b16 %v673_v59 }
 0x1f8   : > { %v3953_v8 = vpop.eup %2864  ;;  %v1577_v49 = vmul.f32 1.442695, %v1474_v19  ;;  %v2322_v45 = vpack.c.b16 %v2312_v29, %v2311_v14  ;;  %v2022_v4 = vunpack.c.l.b16 %v674_v40  ;;  %v689_v44 = vpack.c.bf16 %v625_v21, %v625_v21 }
 0x1f9   : > { %v3916_v13 = vpop.xlane.xlu1 %1327  ;;  %v3921_v12 = vpop.xlane.xlu0 %1389  ;;  %v2467_v38 = vpack.c.b16 %v2457_v25, %v2456_v61  ;;  %v690_v28 = vpack.c.bf16 %v626_v0, %v626_v0  ;;  %2872 = vpow2.f32 %v1513_v15  ;;  %v1490_v5 = vsub.f32 %v3642_v31, %v3871_v57  ;;  %v639_v0 = vld [vmem:[%s3861_s22 + $0x140] sm:$0xff] }
 0x1fa   : > { %v3924_v39 = vpop.xlane.xlu2 %1387  ;;  %v3977_v24 = vpop.eup %2866  ;;  %2335 = vmatpush.bf16.msrb.mxu2 %v2322_v45  ;;  %v2032_v23 = vpack.c.b16 %v2022_v4, %v2021_v3  ;;  %v2166_v62 = vunpack.c.l.b16 %v689_v44  ;;  %2874 = vpow2.f32 %v1607_v22  ;;  %v1458_v19 = vsub.f32 %v3640_v30, %v3841_v6  ;;  %v640_v22 = vld [vmem:[%s3861_s22 + $0x148] sm:$0xff]  ;;  %v655_v25 = vld [vmem:[%s3861_s22 + $0x1c0] sm:$0xff] }
 0x1fb   : > { %v3979_v17 = vpop.eup %2868  ;;  %2480 = vmatpush.bf16.msrb.mxu3 %v2467_v38  ;;  %v2167_v58 = vunpack.c.l.b16 %v690_v28  ;;  %2876 = vpow2.f32 %v1577_v49  ;;  %v1475_v27 = vsub.f32 %v3649_v33, %v3924_v39  ;;  %v1609_v40 = vmul.f32 1.442695, %v1490_v5  ;;  %v656_v49 = vld [vmem:[%s3861_s22 + $0x1c8] sm:$0xff]  ;;  %v607_v4 = vld [vmem:[%s3861_s22 + $0x40] sm:$0xff] }
 0x1fc   : > { %4515 = vst [vmem:[#allocation49_spill] sm:$0xff] %v3979_v17  ;;  %v3981_v54 = vpop.eup %2870  ;;  %2045 = vmatpush.bf16.msrb.mxu0 %v2032_v23  ;;  %v1545_v30 = vmul.f32 1.442695, %v1458_v19  ;;  %v1443_v39 = vsub.f32 %v3646_v32, %v3874_v7  ;;  %v1459_v29 = vsub.f32 %v3651_v34, %v3896_v1  ;;  %v1444_v61 = vsub.f32 %v3658_v36, %v3892_v55  ;;  %v608_v44 = vld [vmem:[%s3861_s22 + $0x48] sm:$0xff]  ;;  %v623_v38 = vld [vmem:[%s3861_s22 + $0xc0] sm:$0xff] }
 0x1fd   : > { %4516 = vst [vmem:[#allocation50_spill] sm:$0xff] %v3981_v54  ;;  %v2177_v57 = vpack.c.b16 %v2167_v58, %v2166_v62  ;;  %v1579_v15 = vmul.f32 1.442695, %v1475_v27  ;;  %2878 = vpow2.f32 %v1609_v40  ;;  %v703_v7 = vpack.c.bf16 %v639_v0, %v639_v0  ;;  %v624_v58 = vld [vmem:[%s3861_s22 + $0xc8] sm:$0xff] }
 0x1fe   : > { %1667 = vadd.xlane.f32.xlu1 %v3929_v51  ;;  %1637 = vadd.xlane.f32.xlu0 %v3931_v47  ;;  %2880 = vpow2.f32 %v1545_v30  ;;  %v704_v3 = vpack.c.bf16 %v640_v22, %v640_v22  ;;  %v719_v45 = vpack.c.bf16 %v655_v25, %v655_v25  ;;  %v720_v1 = vpack.c.bf16 %v656_v49, %v656_v49 }
 0x1ff   : > { %1731 = vadd.xlane.f32.xlu2 %v3927_v18  ;;  %2190 = vmatpush.bf16.msrb.mxu1 %v2177_v57  ;;  %v3998_v6 = vpop.eup %2872  ;;  %2882 = vpow2.f32 %v1579_v15  ;;  %v671_v36 = vpack.c.bf16 %v607_v4, %v607_v4  ;;  %v672_v55 = vpack.c.bf16 %v608_v44, %v608_v44  ;;  %v1515_v28 = vmul.f32 1.442695, %v1443_v39 }
 0x200   : > { %4517 = vst [vmem:[#allocation51_spill] sm:$0xff] %v3998_v6  ;;  %v4000_v14 = vpop.eup %2874  ;;  %v2309_v23 = vunpack.c.l.b16 %v703_v7  ;;  %v2310_v62 = vunpack.c.l.b16 %v704_v3  ;;  %v2454_v19 = vunpack.c.l.b16 %v719_v45  ;;  %v1547_v27 = vmul.f32 1.442695, %v1459_v29  ;;  %v4523_v29 = vld [vmem:[#allocation13_spill] sm:$0xff] }
 0x201   : > { %v3942_v2 = vpop.xlane.xlu1 %1423  ;;  %v3944_v52 = vpop.xlane.xlu0 %1359  ;;  %4518 = vst [vmem:[#allocation52_spill] sm:$0xff] %v4000_v14  ;;  %v2455_v57 = vunpack.c.l.b16 %v720_v1  ;;  %v2019_v40 = vunpack.c.l.b16 %v671_v36  ;;  %v1517_v15 = vmul.f32 1.442695, %v1444_v61  ;;  %v2020_v22 = vunpack.c.l.b16 %v672_v55  ;;  %v4524_v1 = vld [vmem:[#allocation16_spill] sm:$0xff]  ;;  %v4525_v55 = vld [vmem:[#allocation14_spill] sm:$0xff] }
 0x202   : > { %v3946_v42 = vpop.xlane.xlu2 %1421  ;;  %v4003_v33 = vpop.eup %2876  ;;  %v2321_v0 = vpack.c.b16 %v2310_v62, %v2309_v23  ;;  %v687_v25 = vpack.c.bf16 %v623_v38, %v623_v38  ;;  %v1491_v39 = vsub.f32 %v3653_v35, %v3866_v16  ;;  %v688_v3 = vpack.c.bf16 %v624_v58, %v624_v58 }
 0x203   : > { %4519 = vst [vmem:[#allocation53_spill] sm:$0xff] %v4003_v33  ;;  %v4027_v30 = vpop.eup %2878  ;;  %v2466_v7 = vpack.c.b16 %v2455_v57, %v2454_v19  ;;  %2884 = vpow2.f32 %v1515_v28  ;;  %v1476_v4 = vsub.f32 %v4523_v29, %v3921_v12  ;;  %v2031_v61 = vpack.c.b16 %v2020_v22, %v2019_v40  ;;  %v4526_v19 = vld [vmem:[#allocation15_spill] sm:$0xff] }
 0x204   : > { %4520 = vst [vmem:[#allocation54_spill] sm:$0xff] %v4027_v30  ;;  %v4029_v49 = vpop.eup %2880  ;;  %2336 = vmatpush.bf16.msrb.mxu2 %v2321_v0  ;;  %v2164_v44 = vunpack.c.l.b16 %v687_v25  ;;  %2886 = vpow2.f32 %v1547_v27  ;;  %v1492_v36 = vsub.f32 %v4524_v1, %v3946_v42  ;;  %v2165_v35 = vunpack.c.l.b16 %v688_v3  ;;  %v605_v40 = vld [vmem:[%s3861_s22 + $0x30] sm:$0xff]  ;;  %v4530_v3 = vld [vmem:[#allocation18_spill] sm:$0xff] }
 0x205   : > { %4521 = vst [vmem:[#allocation55_spill] sm:$0xff] %v4029_v49  ;;  %v4034_v45 = vpop.eup %2882  ;;  %2481 = vmatpush.bf16.msrb.mxu3 %v2466_v7  ;;  %2888 = vpow2.f32 %v1517_v15  ;;  %2046 = vmatpush.bf16.msrb.mxu0 %v2031_v61  ;;  %v1611_v12 = vmul.f32 1.442695, %v1491_v39  ;;  %v1460_v38 = vsub.f32 %v4525_v55, %v3894_v63  ;;  %v1581_v42 = vmul.f32 1.442695, %v1476_v4  ;;  %v606_v15 = vld [vmem:[%s3861_s22 + $0x38] sm:$0xff] }
 0x206   : > { %1701 = vadd.xlane.f32.xlu1 %v3948_v26  ;;  %1733 = vadd.xlane.f32.xlu0 %v3950_v53  ;;  %4522 = vst [vmem:[#allocation56_spill] sm:$0xff] %v4034_v45  ;;  %v2176_v23 = vpack.c.b16 %v2165_v35, %v2164_v44  ;;  %v1445_v58 = vsub.f32 %v4526_v19, %v3916_v13  ;;  %v1613_v27 = vmul.f32 1.442695, %v1492_v36  ;;  %v621_v0 = vld [vmem:[%s3861_s22 + $0xb0] sm:$0xff]  ;;  %v622_v7 = vld [vmem:[%s3861_s22 + $0xb8] sm:$0xff] }
 0x207   : > { %1669 = vadd.xlane.f32.xlu2 %v3953_v8  ;;  %2890 = vpow2.f32 %v1611_v12  ;;  %v1549_v63 = vmul.f32 1.442695, %v1460_v38  ;;  %v669_v25 = vpack.c.bf16 %v605_v40, %v605_v40  ;;  %v670_v39 = vpack.c.bf16 %v606_v15, %v606_v15  ;;  %v637_v1 = vld [vmem:[%s3861_s22 + $0x130] sm:$0xff]  ;;  %v638_v36 = vld [vmem:[%s3861_s22 + $0x138] sm:$0xff] }
 0x208   : > { %2191 = vmatpush.bf16.msrb.mxu1 %v2176_v23  ;;  %2892 = vpow2.f32 %v1581_v42  ;;  %v1461_v29 = vsub.f32 %v4530_v3, %v3944_v52  ;;  %v685_v4 = vpack.c.bf16 %v621_v0, %v621_v0  ;;  %v686_v61 = vpack.c.bf16 %v622_v7, %v622_v7  ;;  %v653_v35 = vld [vmem:[%s3861_s22 + $0x1b0] sm:$0xff]  ;;  %v654_v52 = vld [vmem:[%s3861_s22 + $0x1b8] sm:$0xff] }
 0x209   : > { %v3966_v50 = vpop.xlane.xlu1 %1361  ;;  %v3971_v11 = vpop.xlane.xlu0 %1393  ;;  %v1519_v44 = vmul.f32 1.442695, %v1445_v58  ;;  %2894 = vpow2.f32 %v1613_v27  ;;  %v2017_v12 = vunpack.c.l.b16 %v669_v25  ;;  %v2018_v55 = vunpack.c.l.b16 %v670_v39  ;;  %v4531_v58 = vld [vmem:[#allocation19_spill] sm:$0xff]  ;;  %v604_v25 = vld [vmem:[%s3861_s22 + $0x28] sm:$0xff] }
 0x20a   : > { %v3974_v56 = vpop.xlane.xlu2 %1391  ;;  %v4052_v57 = vpop.eup %2884  ;;  %v701_v23 = vpack.c.bf16 %v637_v1, %v637_v1  ;;  %v702_v42 = vpack.c.bf16 %v638_v36, %v638_v36  ;;  %v717_v19 = vpack.c.bf16 %v653_v35, %v653_v35  ;;  %v2162_v40 = vunpack.c.l.b16 %v685_v4  ;;  %v619_v4 = vld [vmem:[%s3861_s22 + $0xa0] sm:$0xff] }
 0x20b   : > { %4527 = vst [vmem:[#allocation13_spill] sm:$0xff] %v4052_v57  ;;  %v4057_v22 = vpop.eup %2886  ;;  %v1493_v27 = vsub.f32 %v4531_v58, %v3942_v2  ;;  %v718_v0 = vpack.c.bf16 %v654_v52, %v654_v52  ;;  %v2030_v7 = vpack.c.b16 %v2018_v55, %v2017_v12  ;;  %v2163_v3 = vunpack.c.l.b16 %v686_v61  ;;  %v4533_v2 = vld [vmem:[#allocation22_spill] sm:$0xff] }
 0x20c   : > { %4528 = vst [vmem:[#allocation16_spill] sm:$0xff] %v4057_v22  ;;  %v4061_v13 = vpop.eup %2888  ;;  %v1551_v39 = vmul.f32 1.442695, %v1461_v29  ;;  %v2307_v1 = vunpack.c.l.b16 %v701_v23  ;;  %v2308_v36 = vunpack.c.l.b16 %v702_v42  ;;  %v2452_v35 = vunpack.c.l.b16 %v717_v19  ;;  %v620_v55 = vld [vmem:[%s3861_s22 + $0xa8] sm:$0xff]  ;;  %v601_v19 = vld [vmem:[%s3861_s22 + $0x10] sm:$0xff] }
 0x20d   : > { %4529 = vst [vmem:[#allocation14_spill] sm:$0xff] %v4061_v13  ;;  %2896 = vpow2.f32 %v1549_v63  ;;  %v1462_v52 = vsub.f32 %v4533_v2, %v3966_v50  ;;  %v2453_v12 = vunpack.c.l.b16 %v718_v0  ;;  %2047 = vmatpush.bf16.msrb.mxu0 %v2030_v7  ;;  %v2175_v61 = vpack.c.b16 %v2163_v3, %v2162_v40  ;;  %v617_v7 = vld [vmem:[%s3861_s22 + $0x90] sm:$0xff]  ;;  %v618_v3 = vld [vmem:[%s3861_s22 + $0x98] sm:$0xff] }
 0x20e   : > { %1703 = vadd.xlane.f32.xlu1 %v3979_v17  ;;  %1639 = vadd.xlane.f32.xlu0 %v3977_v24  ;;  %2898 = vpow2.f32 %v1519_v44  ;;  %v2320_v23 = vpack.c.b16 %v2308_v36, %v2307_v1  ;;  %v668_v58 = vpack.c.bf16 %v604_v25, %v604_v25  ;;  %v1615_v63 = vmul.f32 1.442695, %v1493_v27 }
 0x20f   : > { %1671 = vadd.xlane.f32.xlu2 %v3981_v54  ;;  %v2465_v40 = vpack.c.b16 %v2453_v12, %v2452_v35  ;;  %2192 = vmatpush.bf16.msrb.mxu1 %v2175_v61  ;;  %v683_v0 = vpack.c.bf16 %v619_v4, %v619_v4  ;;  %2900 = vpow2.f32 %v1551_v39  ;;  %v684_v25 = vpack.c.bf16 %v620_v55, %v620_v55  ;;  %v635_v12 = vld [vmem:[%s3861_s22 + $0x120] sm:$0xff]  ;;  %v636_v61 = vld [vmem:[%s3861_s22 + $0x128] sm:$0xff] }
 0x210   : > { %2337 = vmatpush.bf16.msrb.mxu2 %v2320_v23  ;;  %v2016_v44 = vunpack.c.l.b16 %v668_v58  ;;  %v1553_v27 = vmul.f32 1.442695, %v1462_v52  ;;  %v681_v4 = vpack.c.bf16 %v617_v7, %v617_v7  ;;  %v682_v2 = vpack.c.bf16 %v618_v3, %v618_v3 }
 0x211   : > { %v3992_v59 = vpop.xlane.xlu1 %1363  ;;  %v3994_v31 = vpop.xlane.xlu0 %1395  ;;  %2482 = vmatpush.bf16.msrb.mxu3 %v2465_v40  ;;  %v2161_v39 = vunpack.c.l.b16 %v684_v25  ;;  %2902 = vpow2.f32 %v1615_v63  ;;  %v700_v25 = vpack.c.bf16 %v636_v61, %v636_v61  ;;  %v633_v61 = vld [vmem:[%s3861_s22 + $0x110] sm:$0xff] }
 0x212   : > { %v3996_v21 = vpop.xlane.xlu2 %1329  ;;  %v2158_v3 = vunpack.c.l.b16 %v681_v4  ;;  %2904 = vpow2.f32 %v1553_v27 }
 0x213   : > { %v2306_v63 = vunpack.c.l.b16 %v700_v25 }
 0x216   : > { %1641 = vadd.xlane.f32.xlu1 %v3998_v6  ;;  %1735 = vadd.xlane.f32.xlu0 %v4000_v14  ;;  %v4543_v6 = vld [vmem:[#allocation26_spill] sm:$0xff] }
 0x217   : > { %1705 = vadd.xlane.f32.xlu2 %v4003_v33  ;;  %v1463_v17 = vsub.f32 %v4543_v6, %v3992_v59 }
 0x219   : > { %v4016_v32 = vpop.xlane.xlu1 %1397  ;;  %v4021_v34 = vpop.xlane.xlu0 %1333 }
 0x21a   : > { %v4024_v5 = vpop.xlane.xlu2 %1425 }
 0x21e   : > { %1737 = vadd.xlane.f32.xlu1 %v4027_v30  ;;  %1673 = vadd.xlane.f32.xlu0 %v4029_v49  ;;  %v4536_v30 = vld [vmem:[#allocation17_spill] sm:$0xff] }
 0x21f   : > { %1707 = vadd.xlane.f32.xlu2 %v4034_v45  ;;  %v1477_v50 = vsub.f32 %v4536_v30, %v3974_v56  ;;  %v2160_v56 = vunpack.c.l.b16 %v683_v0  ;;  %v665_v30 = vpack.c.bf16 %v601_v19, %v601_v19  ;;  %v699_v19 = vpack.c.bf16 %v635_v12, %v635_v12 }
 0x221   : > { %v4042_v16 = vpop.xlane.xlu1 %1399  ;;  %v4046_v28 = vpop.xlane.xlu0 %1429  ;;  %v1583_v55 = vmul.f32 1.442695, %v1477_v50  ;;  %v2174_v7 = vpack.c.b16 %v2161_v39, %v2160_v56  ;;  %v4540_v56 = vld [vmem:[#allocation21_spill] sm:$0xff] }
 0x222   : > { %v4048_v62 = vpop.xlane.xlu2 %1331  ;;  %v1478_v39 = vsub.f32 %v4540_v56, %v3971_v11  ;;  %v4542_v11 = vld [vmem:[#allocation23_spill] sm:$0xff]  ;;  %v697_v56 = vpack.c.bf16 %v633_v61, %v633_v61 }
 0x223   : > { %2193 = vmatpush.bf16.msrb.mxu1 %v2174_v7  ;;  %2906 = vpow2.f32 %v1583_v55  ;;  %v1494_v7 = vsub.f32 %v4542_v11, %v4024_v5 }
 0x226   : > { %1643 = vadd.xlane.f32.xlu1 %v4052_v57  ;;  %1675 = vadd.xlane.f32.xlu0 %v4057_v22  ;;  %v603_v22 = vld [vmem:[%s3861_s22 + $0x20] sm:$0xff]  ;;  %v602_v57 = vld [vmem:[%s3861_s22 + $0x18] sm:$0xff] }
 0x227   : > { %1645 = vadd.xlane.f32.xlu2 %v4061_v13  ;;  %v4082_v13 = vpop.eup %2890  ;;  %v667_v42 = vpack.c.bf16 %v603_v22, %v603_v22  ;;  %v666_v1 = vpack.c.bf16 %v602_v57, %v602_v57  ;;  %v651_v57 = vld [vmem:[%s3861_s22 + $0x1a0] sm:$0xff] }
 0x228   : > { %4532 = vst [vmem:[#allocation15_spill] sm:$0xff] %v4082_v13  ;;  %v4087_v29 = vpop.eup %2892 }
 0x229   : > { %v4070_v38 = vpop.xlane.xlu1 %1337  ;;  %v4075_v15 = vpop.xlane.xlu0 %1335  ;;  %4534 = vst [vmem:[#allocation18_spill] sm:$0xff] %v4087_v29  ;;  %v2015_v22 = vunpack.c.l.b16 %v667_v42  ;;  %v2013_v42 = vunpack.c.l.b16 %v665_v30  ;;  %v2014_v58 = vunpack.c.l.b16 %v666_v1  ;;  %v600_v30 = vld [vmem:[%s3861_s22 + $0x8] sm:$0xff] }
 0x22a   : > { %v4079_v45 = vpop.xlane.xlu2 %1427  ;;  %v4091_v49 = vpop.eup %2894  ;;  %v664_v55 = vpack.c.bf16 %v600_v30, %v600_v30  ;;  %v650_v30 = vld [vmem:[%s3861_s22 + $0x198] sm:$0xff] }
 0x22b   : > { %4535 = vst [vmem:[#allocation19_spill] sm:$0xff] %v4091_v49  ;;  %v2029_v35 = vpack.c.b16 %v2016_v44, %v2015_v22  ;;  %v4104_v23 = vpop.eup %2896  ;;  %v2159_v22 = vunpack.c.l.b16 %v682_v2  ;;  %v652_v44 = vld [vmem:[%s3861_s22 + $0x1a8] sm:$0xff]  ;;  %v2028_v50 = vpack.c.b16 %v2014_v58, %v2013_v42  ;;  %v4541_v42 = vld [vmem:[#allocation20_spill] sm:$0xff] }
 0x22c   : > { %4537 = vst [vmem:[#allocation22_spill] sm:$0xff] %v4104_v23  ;;  %v4109_v40 = vpop.eup %2898  ;;  %v716_v4 = vpack.c.bf16 %v652_v44, %v652_v44  ;;  %v616_v2 = vld [vmem:[%s3861_s22 + $0x88] sm:$0xff]  ;;  %v1446_v58 = vsub.f32 %v4541_v42, %v3996_v21  ;;  %v2012_v25 = vunpack.c.l.b16 %v664_v55  ;;  %v2303_v55 = vunpack.c.l.b16 %v697_v56 }
 0x22d   : > { %4538 = vst [vmem:[#allocation17_spill] sm:$0xff] %v4109_v40  ;;  %2048 = vmatpush.bf16.msrb.mxu0 %v2029_v35  ;;  %v4116_v1 = vpop.eup %2900  ;;  %v2173_v12 = vpack.c.b16 %v2159_v22, %v2158_v3  ;;  %v715_v35 = vpack.c.bf16 %v651_v57, %v651_v57  ;;  %v634_v57 = vld [vmem:[%s3861_s22 + $0x118] sm:$0xff] }
 0x22e   : > { %1739 = vadd.xlane.f32.xlu1 %v4082_v13  ;;  %1709 = vadd.xlane.f32.xlu0 %v4087_v29  ;;  %4539 = vst [vmem:[#allocation57_spill] sm:$0xff] %v4116_v1  ;;  %v2305_v29 = vunpack.c.l.b16 %v699_v19  ;;  %v615_v13 = vld [vmem:[%s3861_s22 + $0x80] sm:$0xff]  ;;  %v2451_v22 = vunpack.c.l.b16 %v716_v4  ;;  %v4135_v42 = vpop.eup %2902  ;;  %v632_v4 = vld [vmem:[%s3861_s22 + $0x108] sm:$0xff] }
 0x22f   : > { %1741 = vadd.xlane.f32.xlu2 %v4091_v49  ;;  %v599_v49 = vld [vmem:[%s3861_s22] sm:$0xff]  ;;  %v2450_v27 = vunpack.c.l.b16 %v715_v35  ;;  %v679_v44 = vpack.c.bf16 %v615_v13, %v615_v13  ;;  %2194 = vmatpush.bf16.msrb.mxu1 %v2173_v12  ;;  %v680_v35 = vpack.c.bf16 %v616_v2, %v616_v2  ;;  %v4141_v11 = vpop.eup %2904  ;;  %v1521_v12 = vmul.f32 1.442695, %v1446_v58  ;;  %v648_v58 = vld [vmem:[%s3861_s22 + $0x188] sm:$0xff] }
 0x230   : > { %v663_v19 = vpack.c.bf16 %v599_v49, %v599_v49  ;;  %v2319_v3 = vpack.c.b16 %v2306_v63, %v2305_v29  ;;  %v649_v49 = vld [vmem:[%s3861_s22 + $0x190] sm:$0xff]  ;;  %v698_v63 = vpack.c.bf16 %v634_v57, %v634_v57  ;;  %v631_v13 = vld [vmem:[%s3861_s22 + $0x100] sm:$0xff]  ;;  %v1617_v57 = vmul.f32 1.442695, %v1494_v7 }
 0x231   : > { %v4100_v36 = vpop.xlane.xlu1 %1433  ;;  %v4106_v52 = vpop.xlane.xlu0 %1431  ;;  %2049 = vmatpush.bf16.msrb.mxu0 %v2028_v50  ;;  %v2464_v5 = vpack.c.b16 %v2451_v22, %v2450_v27  ;;  %v2156_v29 = vunpack.c.l.b16 %v679_v44  ;;  %v2157_v61 = vunpack.c.l.b16 %v680_v35  ;;  %v713_v27 = vpack.c.bf16 %v649_v49, %v649_v49  ;;  %v647_v44 = vld [vmem:[%s3861_s22 + $0x180] sm:$0xff]  ;;  %v4544_v49 = vld [vmem:[#allocation27_spill] sm:$0xff] }
 0x232   : > { %v4111_v0 = vpop.xlane.xlu2 %1365  ;;  %v2011_v50 = vunpack.c.l.b16 %v663_v19  ;;  %2338 = vmatpush.bf16.msrb.mxu2 %v2319_v3  ;;  %v2304_v3 = vunpack.c.l.b16 %v698_v63  ;;  %v714_v22 = vpack.c.bf16 %v650_v30, %v650_v30  ;;  %v695_v14 = vpack.c.bf16 %v631_v13, %v631_v13 }
 0x233   : > { %2483 = vmatpush.bf16.msrb.mxu3 %v2464_v5  ;;  %v2172_v54 = vpack.c.b16 %v2157_v61, %v2156_v29  ;;  %v696_v33 = vpack.c.bf16 %v632_v4, %v632_v4  ;;  %2908 = vpow2.f32 %v1521_v12  ;;  %v711_v7 = vpack.c.bf16 %v647_v44, %v647_v44  ;;  %v4545_v5 = vld [vmem:[#allocation24_spill] sm:$0xff]  ;;  %v4548_v44 = vld [vmem:[#allocation29_spill] sm:$0xff] }
 0x234   : > { %v2027_v2 = vpack.c.b16 %v2012_v25, %v2011_v50  ;;  %v2318_v50 = vpack.c.b16 %v2304_v3, %v2303_v55  ;;  %v2448_v25 = vunpack.c.l.b16 %v713_v27  ;;  %v2449_v35 = vunpack.c.l.b16 %v714_v22  ;;  %v4547_v27 = vld [vmem:[#allocation28_spill] sm:$0xff] }
 0x235   : > { %2195 = vmatpush.bf16.msrb.mxu1 %v2172_v54  ;;  %v2302_v56 = vunpack.c.l.b16 %v696_v33  ;;  %v1495_v30 = vsub.f32 %v4544_v49, %v4079_v45  ;;  %v712_v6 = vpack.c.bf16 %v648_v58, %v648_v58  ;;  %v1447_v29 = vsub.f32 %v4545_v5, %v4048_v62 }
 0x236   : > { %1677 = vadd.xlane.f32.xlu1 %v4104_v23  ;;  %1647 = vadd.xlane.f32.xlu0 %v4109_v40  ;;  %v1585_v23 = vmul.f32 1.442695, %v1478_v39  ;;  %v2301_v39 = vunpack.c.l.b16 %v695_v14  ;;  %v2463_v59 = vpack.c.b16 %v2449_v35, %v2448_v25  ;;  %v2446_v4 = vunpack.c.l.b16 %v711_v7 }
 0x237   : > { %1679 = vadd.xlane.f32.xlu2 %v4116_v1  ;;  %v4145_v1 = vpop.eup %2906  ;;  %2050 = vmatpush.bf16.msrb.mxu0 %v2027_v2  ;;  %v2447_v14 = vunpack.c.l.b16 %v712_v6  ;;  %v1555_v33 = vmul.f32 1.442695, %v1463_v17  ;;  %v1619_v12 = vmul.f32 1.442695, %v1495_v30  ;;  %v1523_v61 = vmul.f32 1.442695, %v1447_v29 }
 0x238   : > { %2910 = vpow2.f32 %v1585_v23  ;;  %2339 = vmatpush.bf16.msrb.mxu2 %v2318_v50  ;;  %v2317_v13 = vpack.c.b16 %v2302_v56, %v2301_v39  ;;  %2484 = vmatpush.bf16.msrb.mxu3 %v2463_v59  ;;  %v4546_v17 = vld [vmem:[#allocation25_spill] sm:$0xff]  ;;  %v1448_v22 = vsub.f32 %v4547_v27, %v4021_v34  ;;  %v4550_v29 = vld [vmem:[#allocation32_spill] sm:$0xff] }
 0x239   : > { %v4131_v21 = vpop.xlane.xlu1 %1627  ;;  %v4137_v40 = vpop.xlane.xlu0 %1369  ;;  %2912 = vpow2.f32 %v1617_v57  ;;  %v2462_v45 = vpack.c.b16 %v2447_v14, %v2446_v4  ;;  %v1479_v3 = vsub.f32 %v4546_v17, %v3994_v31  ;;  %v4551_v4 = vld [vmem:[#allocation40_spill] sm:$0xff] }
 0x23a   : > { %v4143_v19 = vpop.xlane.xlu2 %1367  ;;  %v4160_v2 = vpop.eup %2908  ;;  %v1525_v39 = vmul.f32 1.442695, %v1448_v22 }
 0x23b   : > { %v1587_v25 = vmul.f32 1.442695, %v1479_v3 }
 0x23c   : > { %2340 = vmatpush.bf16.msrb.mxu2 %v2317_v13  ;;  %2485 = vmatpush.bf16.msrb.mxu3 %v2462_v45  ;;  %v1464_v13 = vsub.f32 %v3737_v41, %v4111_v0 }
 0x23e   : > { %1743 = vadd.xlane.f32.xlu1 %v4135_v42  ;;  %1681 = vadd.xlane.f32.xlu0 %v4141_v11  ;;  %v4162_v55 = vpop.eup %2910 }
 0x23f   : > { %1711 = vadd.xlane.f32.xlu2 %v4145_v1  ;;  %v4166_v62 = vpop.eup %2912 }
 0x241   : > { %v1692_v63 = vpop.xlane.xlu1 %1691  ;;  %v1660_v54 = vpop.xlane.xlu0 %1659 }
 0x242   : > { %v4158_v23 = vpop.xlane.xlu2 %1401  ;;  %2914 = vrcp.f32 %v1660_v54 }
 0x243   : > { %2916 = vrcp.f32 %v4131_v21  ;;  %v1480_v21 = vsub.f32 %v4548_v44, %v4016_v32  ;;  %v4549_v32 = vld [vmem:[#allocation30_spill] sm:$0xff]  ;;  %v1557_v44 = vmul.f32 1.442695, %v1464_v13  ;;  %v4557_v13 = vld [vmem:[#allocation33_spill] sm:$0xff] }
 0x244   : > { %2918 = vpow2.f32 %v1555_v33  ;;  %v1496_v30 = vsub.f32 %v4549_v32, %v4046_v28 }
 0x245   : > { %2920 = vpow2.f32 %v1619_v12  ;;  %v1589_v34 = vmul.f32 1.442695, %v1480_v21  ;;  %v4554_v21 = vld [vmem:[#allocation36_spill] sm:$0xff] }
 0x246   : > { %1649 = vadd.xlane.f32.xlu1 %v4160_v2  ;;  %1713 = vadd.xlane.f32.xlu0 %v4162_v55  ;;  %2922 = vpow2.f32 %v1523_v61  ;;  %v1621_v12 = vmul.f32 1.442695, %v1496_v30 }
 0x247   : > { %1745 = vadd.xlane.f32.xlu2 %v4166_v62 }
 0x248   : > { %v2915_v58 = vpop.eup %2914 }
 0x249   : > { %v1662_v57 = vpop.xlane.xlu1 %1661  ;;  %v1724_v50 = vpop.xlane.xlu0 %1723  ;;  %v1835_v7 = vmul.f32 %v2915_v58, %v3785_v60  ;;  %v1481_v60 = vsub.f32 %v4550_v29, %v4042_v16  ;;  %v4553_v16 = vld [vmem:[#allocation42_spill] sm:$0xff] }
 0x24a   : > { %2924 = vrcp.f32 %v1662_v57  ;;  %v1630_v35 = vpop.xlane.xlu2 %1629  ;;  %v2917_v31 = vpop.eup %2916  ;;  %v1498_v57 = vsub.f32 %v4554_v21, %v4100_v36 }
 0x24b   : > { %2926 = vrcp.f32 %v1724_v50  ;;  %v4176_v56 = vpop.eup %2918  ;;  %v1819_v6 = vmul.f32 %v2917_v31, %v3766_v37  ;;  %v1899_v14 = vpack.c.bf16 %v1835_v7, %v1835_v7  ;;  %v4552_v37 = vld [vmem:[#allocation31_spill] sm:$0xff]  ;;  %v1591_v22 = vmul.f32 1.442695, %v1481_v60 }
 0x24c   : > { %2928 = vrcp.f32 %v1630_v35  ;;  %v4179_v49 = vpop.eup %2920  ;;  %v1449_v45 = vsub.f32 %v4552_v37, %v4075_v15  ;;  %v4555_v15 = vld [vmem:[#allocation41_spill] sm:$0xff]  ;;  %v1625_v60 = vmul.f32 1.442695, %v1498_v57  ;;  %v4560_v57 = vld [vmem:[#allocation39_spill] sm:$0xff] }
 0x24d   : > { %2930 = vrcp.f32 %v1692_v63  ;;  %v4184_v59 = vpop.eup %2922  ;;  %v1883_v27 = vpack.c.bf16 %v1819_v6, %v1819_v6  ;;  %v4556_v6 = vld [vmem:[#allocation38_spill] sm:$0xff] }
 0x24e   : > { %1683 = vadd.xlane.f32.xlu1 %v4176_v56  ;;  %2932 = vpow2.f32 %v1587_v25  ;;  %1747 = vadd.xlane.f32.xlu0 %v4179_v49  ;;  %v2108_v25 = vunpack.c.l.b16 %v1899_v14 }
 0x24f   : > { %2934 = vpow2.f32 %v1525_v39  ;;  %1651 = vadd.xlane.f32.xlu2 %v4184_v59  ;;  %v1963_v32 = vunpack.c.l.b16 %v1883_v27 }
 0x250   : > { %v2925_v5 = vpop.eup %2924  ;;  %2936 = vpow2.f32 %v1589_v34  ;;  %v1527_v34 = vmul.f32 1.442695, %v1449_v45 }
 0x251   : > { %v2927_v28 = vpop.eup %2926  ;;  %v1726_v63 = vpop.xlane.xlu1 %1725  ;;  %v1836_v54 = vmul.f32 %v2925_v5, %v4551_v4 }
 0x252   : > { %v2929_v33 = vpop.eup %2928  ;;  %2938 = vrcp.f32 %v1726_v63  ;;  %v1664_v61 = vpop.xlane.xlu0 %1663  ;;  %v1867_v31 = vmul.f32 %v2927_v28, %v4555_v15  ;;  %v1497_v28 = vsub.f32 %v4557_v13, %v4106_v52 }
 0x253   : > { %v1694_v17 = vpop.xlane.xlu2 %1693  ;;  %v1820_v3 = vmul.f32 %v2929_v33, %v4553_v16  ;;  %v1900_v41 = vpack.c.bf16 %v1836_v54, %v1836_v54  ;;  %v2931_v0 = vpop.eup %2930  ;;  %v4558_v54 = vld [vmem:[#allocation43_spill] sm:$0xff] }
 0x254   : > { %2940 = vrcp.f32 %v1694_v17  ;;  %v4199_v58 = vpop.eup %2932  ;;  %v1851_v5 = vmul.f32 %v2931_v0, %v4556_v6  ;;  %v1931_v33 = vpack.c.bf16 %v1867_v31, %v1867_v31  ;;  %v4559_v17 = vld [vmem:[#allocation45_spill] sm:$0xff] }
 0x255   : > { %v1884_v50 = vpack.c.bf16 %v1820_v3, %v1820_v3  ;;  %v2109_v35 = vunpack.c.l.b16 %v1900_v41  ;;  %v4202_v39 = vpop.eup %2934  ;;  %2942 = vpow2.f32 %v1621_v12  ;;  %v1623_v41 = vmul.f32 1.442695, %v1497_v28 }
 0x256   : > { %1715 = vadd.xlane.f32.xlu1 %v4199_v58  ;;  %v4205_v7 = vpop.eup %2936  ;;  %1653 = vadd.xlane.f32.xlu0 %v4202_v39  ;;  %2944 = vpow2.f32 %v1591_v22  ;;  %v1915_v3 = vpack.c.bf16 %v1851_v5, %v1851_v5  ;;  %v2398_v22 = vunpack.c.l.b16 %v1931_v33 }
 0x257   : > { %v1964_v36 = vunpack.c.l.b16 %v1884_v50  ;;  %v2124_v30 = vpack.c.b16 %v2109_v35, %v2108_v25  ;;  %1717 = vadd.xlane.f32.xlu2 %v4205_v7  ;;  %2946 = vpow2.f32 %v1557_v44  ;;  %v1482_v50 = vsub.f32 %v4560_v57, %v4158_v23 }
 0x258   : > { %v2939_v29 = vpop.eup %2938  ;;  %2948 = vpow2.f32 %v1527_v34  ;;  %v2253_v25 = vunpack.c.l.b16 %v1915_v3  ;;  %v4561_v34 = vld [vmem:[#allocation35_spill] sm:$0xff]  ;;  %v4566_v3 = vld [vmem:[#allocation46_spill] sm:$0xff] }
 0x259   : > { %v1979_v63 = vpack.c.b16 %v1964_v36, %v1963_v32  ;;  %2196 = vmatmul.bf16.vlgmr.msrb.gmra.mxu1 %v2124_v30  ;;  %v1632_v4 = vpop.xlane.xlu1 %1631  ;;  %v1868_v14 = vmul.f32 %v2939_v29, %v4558_v54  ;;  %2950 = vrcp.f32 %v1664_v61  ;;  %v1465_v32 = vsub.f32 %v4561_v34, %v4143_v19  ;;  %v4562_v30 = vld [vmem:[#allocation34_spill] sm:$0xff]  ;;  %v4563_v54 = vld [vmem:[#allocation44_spill] sm:$0xff] }
 0x25a   : > { %v2941_v12 = vpop.eup %2940  ;;  %v1696_v37 = vpop.xlane.xlu0 %1695  ;;  %2952 = vpow2.f32 %v1625_v60  ;;  %v1450_v6 = vsub.f32 %v4562_v30, %v4070_v38  ;;  %v1593_v28 = vmul.f32 1.442695, %v1482_v50 }
 0x25b   : > { %v1728_v45 = vpop.xlane.xlu2 %1727  ;;  %2051 = vmatmul.bf16.vlgmr.msrb.gmra.mxu0 %v1979_v63  ;;  %v1852_v16 = vmul.f32 %v2941_v12, %v4559_v17  ;;  %v1932_v27 = vpack.c.bf16 %v1868_v14, %v1868_v14  ;;  %v4214_v52 = vpop.eup %2942  ;;  %v4564_v12 = vld [vmem:[#allocation48_spill] sm:$0xff]  ;;  %v4565_v17 = vld [vmem:[#allocation37_spill] sm:$0xff] }
 0x25c   : > { %2954 = vrcp.f32 %v1728_v45  ;;  %v4216_v21 = vpop.eup %2944  ;;  %v1529_v33 = vmul.f32 1.442695, %v1450_v6 }
 0x25d   : > { %v1916_v0 = vpack.c.bf16 %v1852_v16, %v1852_v16  ;;  %v2399_v44 = vunpack.c.l.b16 %v1932_v27  ;;  %2956 = vrcp.f32 %v1632_v4  ;;  %v4219_v61 = vpop.eup %2946  ;;  %v1559_v4 = vmul.f32 1.442695, %v1465_v32 }
 0x25e   : > { %1749 = vadd.xlane.f32.xlu1 %v4214_v52  ;;  %1719 = vadd.xlane.f32.xlu0 %v4216_v21  ;;  %v4224_v31 = vpop.eup %2948  ;;  %2958 = vpow2.f32 %v1623_v41  ;;  %v1466_v16 = vsub.f32 %v4565_v17, %v4137_v40 }
 0x25f   : > { %v2254_v35 = vunpack.c.l.b16 %v1916_v0  ;;  %v2414_v15 = vpack.c.b16 %v2399_v44, %v2398_v22  ;;  %1685 = vadd.xlane.f32.xlu2 %v4219_v61  ;;  %v2951_v36 = vpop.eup %2950  ;;  %2960 = vrcp.f32 %v1696_v37 }
 0x260   : > { %v4231_v29 = vpop.eup %2952  ;;  %v1837_v14 = vmul.f32 %v2951_v36, %v4563_v54 }
 0x261   : > { %v2269_v5 = vpack.c.b16 %v2254_v35, %v2253_v25  ;;  %2486 = vmatmul.bf16.vlgmr.msrb.gmra.mxu3 %v2414_v15  ;;  %v1666_v23 = vpop.xlane.xlu1 %1665  ;;  %v1561_v15 = vmul.f32 1.442695, %v1466_v16 }
 0x262   : > { %2962 = vrcp.f32 %v1666_v23  ;;  %v1730_v60 = vpop.xlane.xlu0 %1729  ;;  %v2955_v13 = vpop.eup %2954  ;;  %v1901_v0 = vpack.c.bf16 %v1837_v14, %v1837_v14 }
 0x263   : > { %v1634_v63 = vpop.xlane.xlu2 %1633  ;;  %2341 = vmatmul.bf16.vlgmr.msrb.gmra.mxu2 %v2269_v5  ;;  %2964 = vrcp.f32 %v1730_v60  ;;  %v2957_v19 = vpop.eup %2956  ;;  %v1869_v37 = vmul.f32 %v2955_v13, %v4564_v12 }
 0x264   : > { %2966 = vrcp.f32 %v1634_v63  ;;  %v4234_v38 = vpop.eup %2958  ;;  %v1821_v27 = vmul.f32 %v2957_v19, %v4566_v3  ;;  %v2110_v6 = vunpack.c.l.b16 %v1901_v0 }
 0x265   : > { %v2961_v45 = vpop.eup %2960  ;;  %2968 = vpow2.f32 %v1593_v28  ;;  %v1933_v35 = vpack.c.bf16 %v1869_v37, %v1869_v37 }
 0x266   : > { %1655 = vadd.xlane.f32.xlu1 %v4224_v31  ;;  %1753 = vadd.xlane.f32.xlu0 %v4231_v29  ;;  %2970 = vpow2.f32 %v1559_v4  ;;  %v1885_v36 = vpack.c.bf16 %v1821_v27, %v1821_v27 }
 0x267   : > { %1751 = vadd.xlane.f32.xlu2 %v4234_v38  ;;  %2972 = vpow2.f32 %v1529_v33 }
 0x268   : > { %v2963_v41 = vpop.eup %2962 }
 0x269   : > { %v2965_v22 = vpop.eup %2964  ;;  %v1698_v44 = vpop.xlane.xlu1 %1697  ;;  %v1838_v57 = vmul.f32 %v2963_v41, %v3877_v48  ;;  %v4567_v48 = vld [vmem:[#allocation47_spill] sm:$0xff] }
 0x26a   : > { %v2967_v50 = vpop.eup %2966  ;;  %2974 = vrcp.f32 %v1698_v44  ;;  %v1700_v25 = vpop.xlane.xlu0 %1699  ;;  %v1870_v40 = vmul.f32 %v2965_v22, %v3879_v43  ;;  %v1853_v28 = vmul.f32 %v2961_v45, %v4567_v48  ;;  %v2400_v43 = vunpack.c.l.b16 %v1933_v35 }
 0x26b   : > { %v1636_v34 = vpop.xlane.xlu2 %1635  ;;  %v1822_v32 = vmul.f32 %v2967_v50, %v3884_v10  ;;  %v1902_v30 = vpack.c.bf16 %v1838_v57, %v1838_v57  ;;  %v4246_v23 = vpop.eup %2968  ;;  %v1965_v10 = vunpack.c.l.b16 %v1885_v36 }
 0x26c   : > { %v1934_v5 = vpack.c.bf16 %v1870_v40, %v1870_v40  ;;  %2976 = vrcp.f32 %v1636_v34  ;;  %v4249_v63 = vpop.eup %2970  ;;  %v1917_v16 = vpack.c.bf16 %v1853_v28, %v1853_v28 }
 0x26d   : > { %v1886_v60 = vpack.c.bf16 %v1822_v32, %v1822_v32  ;;  %v2111_v13 = vunpack.c.l.b16 %v1902_v30  ;;  %v4252_v4 = vpop.eup %2972  ;;  %2978 = vpow2.f32 %v1561_v15 }
 0x26e   : > { %1721 = vadd.xlane.f32.xlu1 %v4246_v23  ;;  %v2401_v19 = vunpack.c.l.b16 %v1934_v5  ;;  %1687 = vadd.xlane.f32.xlu0 %v4249_v63  ;;  %v2255_v44 = vunpack.c.l.b16 %v1917_v16 }
 0x26f   : > { %v1966_v54 = vunpack.c.l.b16 %v1886_v60  ;;  %v2125_v14 = vpack.c.b16 %v2111_v13, %v2110_v6  ;;  %1657 = vadd.xlane.f32.xlu2 %v4252_v4 }
 0x270   : > { %v2975_v33 = vpop.eup %2974  ;;  %v2415_v12 = vpack.c.b16 %v2401_v19, %v2400_v43 }
 0x271   : > { %v1980_v37 = vpack.c.b16 %v1966_v54, %v1965_v10  ;;  %2201 = vmatmul.bf16.gmra.mxu1 %v2125_v14  ;;  %v1668_v45 = vpop.xlane.xlu1 %1667  ;;  %v1854_v17 = vmul.f32 %v2975_v33, %v3898_v20 }
 0x272   : > { %v1638_v3 = vpop.xlane.xlu0 %1637  ;;  %2491 = vmatmul.bf16.gmra.mxu3 %v2415_v12  ;;  %v2977_v27 = vpop.eup %2976 }
 0x273   : > { %v1732_v41 = vpop.xlane.xlu2 %1731  ;;  %2056 = vmatmul.bf16.gmra.mxu0 %v1980_v37  ;;  %2980 = vrcp.f32 %v1638_v3  ;;  %v1918_v0 = vpack.c.bf16 %v1854_v17, %v1854_v17  ;;  %v4257_v22 = vpop.eup %2978  ;;  %v1823_v50 = vmul.f32 %v2977_v27, %v3903_v9 }
 0x274   : > { %2982 = vrcp.f32 %v1700_v25 }
 0x275   : > { %2984 = vrcp.f32 %v1732_v41  ;;  %v2256_v57 = vunpack.c.l.b16 %v1918_v0  ;;  %v1887_v25 = vpack.c.bf16 %v1823_v50, %v1823_v50 }
 0x276   : > { %2986 = vrcp.f32 %v1668_v45  ;;  %1689 = vadd.xlane.f32.xlu1 %v4257_v22 }
 0x277   : > { %v2270_v20 = vpack.c.b16 %v2256_v57, %v2255_v44  ;;  %v1967_v13 = vunpack.c.l.b16 %v1887_v25  ;;  %v4568_v25 = vld [vmem:[#allocation49_spill] sm:$0xff] }
 0x279   : > { %v2981_v40 = vpop.eup %2980  ;;  %2346 = vmatmul.bf16.gmra.mxu2 %v2270_v20  ;;  %v1702_v35 = vpop.xlane.xlu1 %1701 }
 0x27a   : > { %v2983_v15 = vpop.eup %2982  ;;  %2988 = vrcp.f32 %v1702_v35  ;;  %v1734_v34 = vpop.xlane.xlu0 %1733  ;;  %v1824_v32 = vmul.f32 %v2981_v40, %v3931_v47 }
 0x27b   : > { %v2985_v36 = vpop.eup %2984  ;;  %v1670_v30 = vpop.xlane.xlu2 %1669  ;;  %2990 = vrcp.f32 %v1734_v34  ;;  %v1855_v60 = vmul.f32 %v2983_v15, %v3900_v46 }
 0x27c   : > { %v2987_v6 = vpop.eup %2986  ;;  %2992 = vrcp.f32 %v1670_v30  ;;  %v1888_v5 = vpack.c.bf16 %v1824_v32, %v1824_v32  ;;  %v1871_v48 = vmul.f32 %v2985_v36, %v3927_v18 }
 0x27d   : > { %v1839_v28 = vmul.f32 %v2987_v6, %v3929_v51  ;;  %v1919_v14 = vpack.c.bf16 %v1855_v60, %v1855_v60  ;;  %v4569_v60 = vld [vmem:[#allocation51_spill] sm:$0xff] }
 0x27e   : > { %v1968_v9 = vunpack.c.l.b16 %v1888_v5  ;;  %v1935_v45 = vpack.c.bf16 %v1871_v48, %v1871_v48 }
 0x27f   : > { %v1903_v16 = vpack.c.bf16 %v1839_v28, %v1839_v28  ;;  %v2257_v27 = vunpack.c.l.b16 %v1919_v14 }
 0x280   : > { %v2989_v43 = vpop.eup %2988  ;;  %v1981_v19 = vpack.c.b16 %v1968_v9, %v1967_v13  ;;  %v2402_v0 = vunpack.c.l.b16 %v1935_v45 }
 0x281   : > { %v2991_v10 = vpop.eup %2990  ;;  %v1704_v54 = vpop.xlane.xlu1 %1703  ;;  %v1856_v47 = vmul.f32 %v2989_v43, %v3948_v26  ;;  %v2112_v44 = vunpack.c.l.b16 %v1903_v16 }
 0x282   : > { %v2993_v33 = vpop.eup %2992  ;;  %v1640_v12 = vpop.xlane.xlu0 %1639  ;;  %v1872_v37 = vmul.f32 %v2991_v10, %v3950_v53 }
 0x283   : > { %v1672_v17 = vpop.xlane.xlu2 %1671  ;;  %2061 = vmatmul.bf16.gmra.mxu0 %v1981_v19  ;;  %v1840_v46 = vmul.f32 %v2993_v33, %v3953_v8  ;;  %v1920_v18 = vpack.c.bf16 %v1856_v47, %v1856_v47  ;;  %2994 = vrcp.f32 %v1640_v12 }
 0x284   : > { %v1936_v51 = vpack.c.bf16 %v1872_v37, %v1872_v37  ;;  %2996 = vrcp.f32 %v1704_v54  ;;  %v4570_v54 = vld [vmem:[#allocation53_spill] sm:$0xff]  ;;  %v4571_v37 = vld [vmem:[#allocation52_spill] sm:$0xff] }
 0x285   : > { %v1904_v3 = vpack.c.bf16 %v1840_v46, %v1840_v46  ;;  %v2258_v41 = vunpack.c.l.b16 %v1920_v18 }
 0x286   : > { %v2403_v26 = vunpack.c.l.b16 %v1936_v51 }
 0x287   : > { %v2113_v57 = vunpack.c.l.b16 %v1904_v3  ;;  %v2271_v50 = vpack.c.b16 %v2258_v41, %v2257_v27 }
 0x288   : > { %v2416_v20 = vpack.c.b16 %v2403_v26, %v2402_v0  ;;  %v4573_v26 = vld [vmem:[#allocation54_spill] sm:$0xff] }
 0x289   : > { %v2126_v53 = vpack.c.b16 %v2113_v57, %v2112_v44  ;;  %2351 = vmatmul.bf16.gmra.mxu2 %v2271_v50  ;;  %v1642_v40 = vpop.xlane.xlu1 %1641  ;;  %v2995_v35 = vpop.eup %2994 }
 0x28a   : > { %2998 = vrcp.f32 %v1642_v40  ;;  %v1736_v8 = vpop.xlane.xlu0 %1735  ;;  %2496 = vmatmul.bf16.gmra.mxu3 %v2416_v20  ;;  %v2997_v34 = vpop.eup %2996  ;;  %v1825_v32 = vmul.f32 %v2995_v35, %v3977_v24  ;;  %v4574_v20 = vld [vmem:[#allocation55_spill] sm:$0xff] }
 0x28b   : > { %v1706_v15 = vpop.xlane.xlu2 %1705  ;;  %2206 = vmatmul.bf16.gmra.mxu1 %v2126_v53  ;;  %3000 = vrcp.f32 %v1736_v8  ;;  %v1857_v36 = vmul.f32 %v2997_v34, %v4568_v25 }
 0x28c   : > { %3002 = vrcp.f32 %v1706_v15  ;;  %v1889_v9 = vpack.c.bf16 %v1825_v32, %v1825_v32 }
 0x28d   : > { %3004 = vrcp.f32 %v1672_v17  ;;  %v1921_v14 = vpack.c.bf16 %v1857_v36, %v1857_v36  ;;  %v4572_v17 = vld [vmem:[#allocation50_spill] sm:$0xff] }
 0x28e   : > { %v1969_v33 = vunpack.c.l.b16 %v1889_v9 }
 0x28f   : > { %v2259_v18 = vunpack.c.l.b16 %v1921_v14 }
 0x290   : > { %v2999_v30 = vpop.eup %2998 }
 0x291   : > { %v3001_v6 = vpop.eup %3000  ;;  %v1738_v5 = vpop.xlane.xlu1 %1737  ;;  %v1826_v13 = vmul.f32 %v2999_v30, %v4569_v60 }
 0x292   : > { %v3003_v48 = vpop.eup %3002  ;;  %3006 = vrcp.f32 %v1738_v5  ;;  %v1674_v28 = vpop.xlane.xlu0 %1673  ;;  %v1873_v45 = vmul.f32 %v3001_v6, %v4571_v37 }
 0x293   : > { %v3005_v43 = vpop.eup %3004  ;;  %v1708_v19 = vpop.xlane.xlu2 %1707  ;;  %3008 = vrcp.f32 %v1674_v28  ;;  %v1890_v10 = vpack.c.bf16 %v1826_v13, %v1826_v13  ;;  %v1858_v47 = vmul.f32 %v3003_v48, %v4570_v54  ;;  %v4575_v13 = vld [vmem:[#allocation13_spill] sm:$0xff] }
 0x294   : > { %v1841_v46 = vmul.f32 %v3005_v43, %v4572_v17  ;;  %v1937_v57 = vpack.c.bf16 %v1873_v45, %v1873_v45 }
 0x295   : > { %v1970_v24 = vunpack.c.l.b16 %v1890_v10  ;;  %v1922_v12 = vpack.c.bf16 %v1858_v47, %v1858_v47 }
 0x296   : > { %v1905_v40 = vpack.c.bf16 %v1841_v46, %v1841_v46  ;;  %v2404_v34 = vunpack.c.l.b16 %v1937_v57 }
 0x297   : > { %v1982_v16 = vpack.c.b16 %v1970_v24, %v1969_v33  ;;  %v2260_v51 = vunpack.c.l.b16 %v1922_v12  ;;  %v4577_v24 = vld [vmem:[#allocation56_spill] sm:$0xff] }
 0x298   : > { %v3007_v3 = vpop.eup %3006  ;;  %v2114_v25 = vunpack.c.l.b16 %v1905_v40 }
 0x299   : > { %v3009_v27 = vpop.eup %3008  ;;  %2066 = vmatmul.bf16.gmra.mxu0 %v1982_v16  ;;  %v2272_v41 = vpack.c.b16 %v2260_v51, %v2259_v18  ;;  %v1644_v0 = vpop.xlane.xlu1 %1643  ;;  %v1874_v44 = vmul.f32 %v3007_v3, %v4573_v26  ;;  %v4578_v51 = vld [vmem:[#allocation15_spill] sm:$0xff] }
 0x29a   : > { %3010 = vrcp.f32 %v1644_v0  ;;  %v1676_v50 = vpop.xlane.xlu0 %1675  ;;  %v1842_v53 = vmul.f32 %v3009_v27, %v4574_v20  ;;  %v4579_v0 = vld [vmem:[#allocation18_spill] sm:$0xff] }
 0x29b   : > { %v1646_v35 = vpop.xlane.xlu2 %1645  ;;  %2356 = vmatmul.bf16.gmra.mxu2 %v2272_v41  ;;  %v1938_v8 = vpack.c.bf16 %v1874_v44, %v1874_v44 }
 0x29c   : > { %3012 = vrcp.f32 %v1646_v35  ;;  %v1906_v15 = vpack.c.bf16 %v1842_v53, %v1842_v53 }
 0x29d   : > { %3014 = vrcp.f32 %v1708_v19  ;;  %v2405_v32 = vunpack.c.l.b16 %v1938_v8  ;;  %v4576_v19 = vld [vmem:[#allocation14_spill] sm:$0xff] }
 0x29e   : > { %v2115_v36 = vunpack.c.l.b16 %v1906_v15  ;;  %3016 = vrcp.f32 %v1676_v50  ;;  %v4580_v50 = vld [vmem:[#allocation19_spill] sm:$0xff]  ;;  %v4581_v15 = vld [vmem:[#allocation16_spill] sm:$0xff] }
 0x29f   : > { %v2417_v30 = vpack.c.b16 %v2405_v32, %v2404_v34 }
 0x2a0   : > { %v3011_v6 = vpop.eup %3010  ;;  %v2127_v5 = vpack.c.b16 %v2115_v36, %v2114_v25 }
 0x2a1   : > { %2501 = vmatmul.bf16.gmra.mxu3 %v2417_v30  ;;  %v1740_v60 = vpop.xlane.xlu1 %1739  ;;  %v1827_v9 = vmul.f32 %v3011_v6, %v4575_v13  ;;  %v4582_v13 = vld [vmem:[#allocation22_spill] sm:$0xff] }
 0x2a2   : > { %v3013_v48 = vpop.eup %3012  ;;  %3018 = vrcp.f32 %v1740_v60  ;;  %v1710_v28 = vpop.xlane.xlu0 %1709  ;;  %2211 = vmatmul.bf16.gmra.mxu1 %v2127_v5 }
 0x2a3   : > { %v3015_v43 = vpop.eup %3014  ;;  %v1742_v10 = vpop.xlane.xlu2 %1741  ;;  %3020 = vrcp.f32 %v1710_v28  ;;  %v1828_v54 = vmul.f32 %v3013_v48, %v4576_v19  ;;  %v1891_v47 = vpack.c.bf16 %v1827_v9, %v1827_v9 }
 0x2a4   : > { %3022 = vrcp.f32 %v1742_v10  ;;  %v1859_v12 = vmul.f32 %v3015_v43, %v4577_v24  ;;  %v3017_v37 = vpop.eup %3016 }
 0x2a5   : > { %v1892_v14 = vpack.c.bf16 %v1828_v54, %v1828_v54  ;;  %v1971_v33 = vunpack.c.l.b16 %v1891_v47  ;;  %v1843_v34 = vmul.f32 %v3017_v37, %v4581_v15 }
 0x2a6   : > { %v1923_v44 = vpack.c.bf16 %v1859_v12, %v1859_v12 }
 0x2a7   : > { %v1972_v45 = vunpack.c.l.b16 %v1892_v14  ;;  %v1907_v48 = vpack.c.bf16 %v1843_v34, %v1843_v34 }
 0x2a8   : > { %v3019_v17 = vpop.eup %3018  ;;  %v2261_v32 = vunpack.c.l.b16 %v1923_v44 }
 0x2a9   : > { %v3021_v46 = vpop.eup %3020  ;;  %v1983_v16 = vpack.c.b16 %v1972_v45, %v1971_v33  ;;  %v1678_v18 = vpop.xlane.xlu1 %1677  ;;  %v1875_v3 = vmul.f32 %v3019_v17, %v4578_v51  ;;  %v2116_v19 = vunpack.c.l.b16 %v1907_v48 }
 0x2aa   : > { %v3023_v27 = vpop.eup %3022  ;;  %3024 = vrcp.f32 %v1678_v18  ;;  %v1648_v41 = vpop.xlane.xlu0 %1647  ;;  %v1860_v26 = vmul.f32 %v3021_v46, %v4579_v0  ;;  %v4583_v18 = vld [vmem:[#allocation17_spill] sm:$0xff] }
 0x2ab   : > { %v1680_v57 = vpop.xlane.xlu2 %1679  ;;  %2071 = vmatmul.bf16.gmra.mxu0 %v1983_v16  ;;  %v1876_v20 = vmul.f32 %v3023_v27, %v4580_v50  ;;  %v1939_v53 = vpack.c.bf16 %v1875_v3, %v1875_v3  ;;  %3026 = vrcp.f32 %v1648_v41  ;;  %v4584_v3 = vld [vmem:[#allocation57_spill] sm:$0xff] }
 0x2ac   : > { %v1924_v40 = vpack.c.bf16 %v1860_v26, %v1860_v26 }
 0x2ad   : > { %v1940_v35 = vpack.c.bf16 %v1876_v20, %v1876_v20  ;;  %v2406_v8 = vunpack.c.l.b16 %v1939_v53 }
 0x2ae   : > { %v2262_v25 = vunpack.c.l.b16 %v1924_v40 }
 0x2af   : > { %v2407_v36 = vunpack.c.l.b16 %v1940_v35 }
 0x2b0   : > { %v3025_v30 = vpop.eup %3024  ;;  %v2273_v6 = vpack.c.b16 %v2262_v25, %v2261_v32 }
 0x2b1   : > { %v2418_v5 = vpack.c.b16 %v2407_v36, %v2406_v8  ;;  %v1744_v60 = vpop.xlane.xlu1 %1743  ;;  %v1844_v9 = vmul.f32 %v3025_v30, %v4582_v13  ;;  %v3027_v14 = vpop.eup %3026 }
 0x2b2   : > { %v1682_v28 = vpop.xlane.xlu0 %1681  ;;  %2361 = vmatmul.bf16.gmra.mxu2 %v2273_v6  ;;  %v1829_v51 = vmul.f32 %v3027_v14, %v4583_v18 }
 0x2b3   : > { %v1712_v43 = vpop.xlane.xlu2 %1711  ;;  %2506 = vmatmul.bf16.gmra.mxu3 %v2418_v5  ;;  %3028 = vrcp.f32 %v1682_v28  ;;  %v1908_v10 = vpack.c.bf16 %v1844_v9, %v1844_v9 }
 0x2b4   : > { %3030 = vrcp.f32 %v1680_v57  ;;  %v1893_v57 = vpack.c.bf16 %v1829_v51, %v1829_v51 }
 0x2b5   : > { %3032 = vrcp.f32 %v1712_v43  ;;  %v2117_v54 = vunpack.c.l.b16 %v1908_v10 }
 0x2b6   : > { %3034 = vrcp.f32 %v1744_v60  ;;  %v1973_v30 = vunpack.c.l.b16 %v1893_v57 }
 0x2b7   : > { %v2128_v47 = vpack.c.b16 %v2117_v54, %v2116_v19 }
 0x2b9   : > { %v3029_v33 = vpop.eup %3028  ;;  %2216 = vmatmul.bf16.gmra.mxu1 %v2128_v47  ;;  %v1650_v24 = vpop.xlane.xlu1 %1649 }
 0x2ba   : > { %v3031_v12 = vpop.eup %3030  ;;  %3036 = vrcp.f32 %v1650_v24  ;;  %v1714_v37 = vpop.xlane.xlu0 %1713  ;;  %v1846_v46 = vmul.f32 %v3029_v33, %v4141_v11 }
 0x2bb   : > { %v3033_v45 = vpop.eup %3032  ;;  %v1746_v17 = vpop.xlane.xlu2 %1745  ;;  %3038 = vrcp.f32 %v1714_v37  ;;  %v1845_v27 = vmul.f32 %v3031_v12, %v4584_v3 }
 0x2bc   : > { %v3035_v16 = vpop.eup %3034  ;;  %3040 = vrcp.f32 %v1746_v17  ;;  %v1861_v41 = vmul.f32 %v3033_v45, %v4145_v1  ;;  %v1910_v0 = vpack.c.bf16 %v1846_v46, %v1846_v46 }
 0x2bd   : > { %v1877_v26 = vmul.f32 %v3035_v16, %v4135_v42  ;;  %v1909_v40 = vpack.c.bf16 %v1845_v27, %v1845_v27 }
 0x2be   : > { %v1925_v15 = vpack.c.bf16 %v1861_v41, %v1861_v41  ;;  %v2119_v25 = vunpack.c.l.b16 %v1910_v0 }
 0x2bf   : > { %v1941_v36 = vpack.c.bf16 %v1877_v26, %v1877_v26  ;;  %v2118_v5 = vunpack.c.l.b16 %v1909_v40 }
 0x2c0   : > { %v3037_v44 = vpop.eup %3036  ;;  %v2263_v13 = vunpack.c.l.b16 %v1925_v15 }
 0x2c1   : > { %v3039_v50 = vpop.eup %3038  ;;  %v1684_v20 = vpop.xlane.xlu1 %1683  ;;  %v1830_v53 = vmul.f32 %v3037_v44, %v4160_v2  ;;  %v2129_v48 = vpack.c.b16 %v2119_v25, %v2118_v5  ;;  %v2408_v28 = vunpack.c.l.b16 %v1941_v36 }
 0x2c2   : > { %v3041_v35 = vpop.eup %3040  ;;  %v1748_v11 = vpop.xlane.xlu0 %1747  ;;  %v1862_v8 = vmul.f32 %v3039_v50, %v4162_v55 }
 0x2c3   : > { %v1652_v34 = vpop.xlane.xlu2 %1651  ;;  %v1894_v32 = vpack.c.bf16 %v1830_v53, %v1830_v53  ;;  %v1878_v1 = vmul.f32 %v3041_v35, %v4166_v62 }
 0x2c4   : > { %v1926_v42 = vpack.c.bf16 %v1862_v8, %v1862_v8  ;;  %3042 = vrcp.f32 %v1652_v34 }
 0x2c5   : > { %v1974_v6 = vunpack.c.l.b16 %v1894_v32  ;;  %v1942_v60 = vpack.c.bf16 %v1878_v1, %v1878_v1  ;;  %3044 = vrcp.f32 %v1748_v11 }
 0x2c6   : > { %v2264_v2 = vunpack.c.l.b16 %v1926_v42 }
 0x2c7   : > { %v1984_v9 = vpack.c.b16 %v1974_v6, %v1973_v30  ;;  %v2409_v43 = vunpack.c.l.b16 %v1942_v60 }
 0x2c8   : > { %v2274_v55 = vpack.c.b16 %v2264_v2, %v2263_v13 }
 0x2c9   : > { %2076 = vmatmul.bf16.gmra.mxu0 %v1984_v9  ;;  %2221 = vmatmul.bf16.gmra.mxu1 %v2129_v48  ;;  %v2419_v10 = vpack.c.b16 %v2409_v43, %v2408_v28  ;;  %v1716_v19 = vpop.xlane.xlu1 %1715 }
 0x2ca   : > { %3046 = vrcp.f32 %v1716_v19  ;;  %v1654_v62 = vpop.xlane.xlu0 %1653  ;;  %2366 = vmatmul.bf16.gmra.mxu2 %v2274_v55  ;;  %v3043_v54 = vpop.eup %3042 }
 0x2cb   : > { %v1718_v47 = vpop.xlane.xlu2 %1717  ;;  %2511 = vmatmul.bf16.gmra.mxu3 %v2419_v10  ;;  %3048 = vrcp.f32 %v1654_v62  ;;  %v1831_v14 = vmul.f32 %v3043_v54, %v4184_v59  ;;  %v3045_v33 = vpop.eup %3044 }
 0x2cc   : > { %3050 = vrcp.f32 %v1718_v47  ;;  %v1879_v44 = vmul.f32 %v3045_v33, %v4179_v49 }
 0x2cd   : > { %3052 = vrcp.f32 %v1684_v20  ;;  %v1895_v18 = vpack.c.bf16 %v1831_v14, %v1831_v14 }
 0x2ce   : > { %v1943_v49 = vpack.c.bf16 %v1879_v44, %v1879_v44 }
 0x2d0   : > { %v3047_v24 = vpop.eup %3046  ;;  %v2410_v30 = vunpack.c.l.b16 %v1943_v49 }
 0x2d1   : > { %v3049_v12 = vpop.eup %3048  ;;  %v1750_v37 = vpop.xlane.xlu1 %1749  ;;  %v1863_v45 = vmul.f32 %v3047_v24, %v4199_v58  ;;  %v1975_v58 = vunpack.c.l.b16 %v1895_v18 }
 0x2d2   : > { %v3051_v17 = vpop.eup %3050  ;;  %3054 = vrcp.f32 %v1750_v37  ;;  %v1720_v46 = vpop.xlane.xlu0 %1719  ;;  %v1832_v16 = vmul.f32 %v3049_v12, %v4202_v39 }
 0x2d3   : > { %v1686_v51 = vpop.xlane.xlu2 %1685  ;;  %v1864_v3 = vmul.f32 %v3051_v17, %v4205_v7  ;;  %v1927_v27 = vpack.c.bf16 %v1863_v45, %v1863_v45  ;;  %v3053_v41 = vpop.eup %3052 }
 0x2d4   : > { %3056 = vrcp.f32 %v1686_v51  ;;  %v1896_v59 = vpack.c.bf16 %v1832_v16, %v1832_v16  ;;  %v1847_v20 = vmul.f32 %v3053_v41, %v4176_v56 }
 0x2d5   : > { %v1928_v0 = vpack.c.bf16 %v1864_v3, %v1864_v3  ;;  %v2265_v26 = vunpack.c.l.b16 %v1927_v27  ;;  %3058 = vrcp.f32 %v1720_v46 }
 0x2d6   : > { %v2197_v57 = vpop.f32.mrf.mxu1  ;;  %v1976_v50 = vunpack.c.l.b16 %v1896_v59  ;;  %v1911_v56 = vpack.c.bf16 %v1847_v20, %v1847_v20 }
 0x2d7   : > { %2543 = vst [vmem:[%s4298_s17 + $0x80] sm:$0xff] %v2197_v57  ;;  %v2266_v39 = vunpack.c.l.b16 %v1928_v0 }
 0x2d8   : > { %v3055_v7 = vpop.eup %3054  ;;  %v2052_v53 = vpop.f32.mrf.mxu0  ;;  %v1985_v40 = vpack.c.b16 %v1976_v50, %v1975_v58  ;;  %v2120_v6 = vunpack.c.l.b16 %v1911_v56 }
 0x2d9   : > { %2527 = vst [vmem:[%s4298_s17] sm:$0xff] %v2052_v53  ;;  %v1656_v35 = vpop.xlane.xlu1 %1655  ;;  %v2275_v11 = vpack.c.b16 %v2266_v39, %v2265_v26  ;;  %v1880_v8 = vmul.f32 %v3055_v7, %v4214_v52 }
 0x2da   : > { %v3057_v15 = vpop.eup %3056  ;;  %v1754_v34 = vpop.xlane.xlu0 %1753  ;;  %2081 = vmatmul.bf16.gmra.mxu0 %v1985_v40 }
 0x2db   : > { %v1752_v32 = vpop.xlane.xlu2 %1751  ;;  %3060 = vrcp.f32 %v1754_v34  ;;  %2371 = vmatmul.bf16.gmra.mxu2 %v2275_v11  ;;  %v1848_v25 = vmul.f32 %v3057_v15, %v4219_v61  ;;  %v1944_v1 = vpack.c.bf16 %v1880_v8, %v1880_v8  ;;  %v3059_v13 = vpop.eup %3058 }
 0x2dc   : > { %3062 = vrcp.f32 %v1752_v32  ;;  %v1865_v54 = vmul.f32 %v3059_v13, %v4216_v21 }
 0x2dd   : > { %v1912_v36 = vpack.c.bf16 %v1848_v25, %v1848_v25  ;;  %v2411_v42 = vunpack.c.l.b16 %v1944_v1  ;;  %3064 = vrcp.f32 %v1656_v35 }
 0x2de   : > { %v2199_v52 = vpop.f32.mrf.mxu1  ;;  %v1929_v37 = vpack.c.bf16 %v1865_v54, %v1865_v54 }
 0x2df   : > { %2544 = vst [vmem:[%s4298_s17 + $0x88] sm:$0xff] %v2199_v52  ;;  %v2121_v5 = vunpack.c.l.b16 %v1912_v36  ;;  %v2420_v60 = vpack.c.b16 %v2411_v42, %v2410_v30 }
 0x2e0   : > { %v2054_v2 = vpop.f32.mrf.mxu0 }
 0x2e1   : > { %v3061_v9 = vpop.eup %3060  ;;  %2528 = vst [vmem:[%s4298_s17 + $0x8] sm:$0xff] %v2054_v2  ;;  %v2130_v48 = vpack.c.b16 %v2121_v5, %v2120_v6  ;;  %2516 = vmatmul.bf16.gmra.mxu3 %v2420_v60  ;;  %v1722_v61 = vpop.xlane.xlu1 %1721 }
 0x2e2   : > { %v3063_v28 = vpop.eup %3062  ;;  %3066 = vrcp.f32 %v1722_v61  ;;  %v1688_v43 = vpop.xlane.xlu0 %1687  ;;  %v1882_v10 = vmul.f32 %v3061_v9, %v4231_v29 }
 0x2e3   : > { %v1658_v55 = vpop.xlane.xlu2 %1657  ;;  %2226 = vmatmul.bf16.gmra.mxu1 %v2130_v48  ;;  %3068 = vrcp.f32 %v1688_v43  ;;  %v3065_v19 = vpop.eup %3064  ;;  %v1881_v47 = vmul.f32 %v3063_v28, %v4234_v38 }
 0x2e4   : > { %3070 = vrcp.f32 %v1658_v55  ;;  %v2487_v62 = vpop.f32.mrf.mxu3  ;;  %v1833_v33 = vmul.f32 %v3065_v19, %v4224_v31  ;;  %v1946_v24 = vpack.c.bf16 %v1882_v10, %v1882_v10  ;;  %v2267_v31 = vunpack.c.l.b16 %v1929_v37 }
 0x2e5   : > { %2575 = vst [vmem:[%s4298_s17 + $0x180] sm:$0xff] %v2487_v62  ;;  %v1945_v46 = vpack.c.bf16 %v1881_v47, %v1881_v47 }
 0x2e6   : > { %v2342_v14 = vpop.f32.mrf.mxu2  ;;  %v1897_v18 = vpack.c.bf16 %v1833_v33, %v1833_v33  ;;  %v2413_v51 = vunpack.c.l.b16 %v1946_v24 }
 0x2e7   : > { %2559 = vst [vmem:[%s4298_s17 + $0x100] sm:$0xff] %v2342_v14  ;;  %v2412_v0 = vunpack.c.l.b16 %v1945_v46 }
 0x2e8   : > { %v3067_v12 = vpop.eup %3066  ;;  %v1977_v44 = vunpack.c.l.b16 %v1897_v18 }
 0x2e9   : > { %v3069_v45 = vpop.eup %3068  ;;  %v1690_v17 = vpop.xlane.xlu1 %1689  ;;  %v1866_v29 = vmul.f32 %v3067_v12, %v4246_v23 }
 0x2ea   : > { %v3071_v16 = vpop.eup %3070  ;;  %3072 = vrcp.f32 %v1690_v17  ;;  %v1849_v27 = vmul.f32 %v3069_v45, %v4249_v63 }
 0x2eb   : > { %v1834_v21 = vmul.f32 %v3071_v16, %v4252_v4  ;;  %v1930_v38 = vpack.c.bf16 %v1866_v29, %v1866_v29  ;;  %v2421_v4 = vpack.c.b16 %v2413_v51, %v2412_v0 }
 0x2ec   : > { %v2489_v3 = vpop.f32.mrf.mxu3  ;;  %v1913_v7 = vpack.c.bf16 %v1849_v27, %v1849_v27 }
 0x2ed   : > { %2576 = vst [vmem:[%s4298_s17 + $0x188] sm:$0xff] %v2489_v3  ;;  %v1898_v41 = vpack.c.bf16 %v1834_v21, %v1834_v21  ;;  %v2268_v59 = vunpack.c.l.b16 %v1930_v38 }
 0x2ee   : > { %v2344_v23 = vpop.f32.mrf.mxu2  ;;  %v2202_v26 = vpop.f32.mrf.mxu1  ;;  %v2122_v35 = vunpack.c.l.b16 %v1913_v7 }
 0x2ef   : > { %2560 = vst [vmem:[%s4298_s17 + $0x108] sm:$0xff] %v2344_v23  ;;  %v1978_v57 = vunpack.c.l.b16 %v1898_v41  ;;  %v2276_v58 = vpack.c.b16 %v2268_v59, %v2267_v31 }
 0x2f0   : > { %v3073_v50 = vpop.eup %3072  ;;  %v2057_v39 = vpop.f32.mrf.mxu0  ;;  %2545 = vst [vmem:[%s4298_s17 + $0x90] sm:$0xff] %v2202_v26 }
 0x2f1   : > { %v1850_v20 = vmul.f32 %v3073_v50, %v4257_v22  ;;  %2529 = vst [vmem:[%s4298_s17 + $0x10] sm:$0xff] %v2057_v39  ;;  %v1986_v63 = vpack.c.b16 %v1978_v57, %v1977_v44  ;;  %2376 = vmatmul.bf16.gmra.mxu2 %v2276_v58  ;;  %2521 = vmatmul.bf16.gmra.mxu3 %v2421_v4 }
 0x2f3   : > { %2086 = vmatmul.bf16.gmra.mxu0 %v1986_v63  ;;  %v1914_v53 = vpack.c.bf16 %v1850_v20, %v1850_v20 }
 0x2f5   : > { %v2492_v40 = vpop.f32.mrf.mxu3  ;;  %v2123_v11 = vunpack.c.l.b16 %v1914_v53 }
 0x2f6   : > { %v2204_v8 = vpop.f32.mrf.mxu1  ;;  %2577 = vst [vmem:[%s4298_s17 + $0x190] sm:$0xff] %v2492_v40 }
 0x2f7   : > { %2546 = vst [vmem:[%s4298_s17 + $0x98] sm:$0xff] %v2204_v8  ;;  %v2131_v22 = vpack.c.b16 %v2123_v11, %v2122_v35 }
 0x2f8   : > { %v2059_v49 = vpop.f32.mrf.mxu0 }
 0x2f9   : > { %2530 = vst [vmem:[%s4298_s17 + $0x18] sm:$0xff] %v2059_v49  ;;  %2231 = vmatmul.bf16.gmra.mxu1 %v2131_v22 }
 0x2fc   : > { %v2347_v15 = vpop.f32.mrf.mxu2 }
 0x2fd   : > { %2561 = vst [vmem:[%s4298_s17 + $0x110] sm:$0xff] %v2347_v15  ;;  %v2494_v34 = vpop.f32.mrf.mxu3 }
 0x2fe   : > { %2578 = vst [vmem:[%s4298_s17 + $0x198] sm:$0xff] %v2494_v34 }
 0x300   : > { %v2062_v32 = vpop.f32.mrf.mxu0 }
 0x301   : > { %2531 = vst [vmem:[%s4298_s17 + $0x20] sm:$0xff] %v2062_v32 }
 0x304   : > { %v2349_v25 = vpop.f32.mrf.mxu2 }
 0x305   : > { %2562 = vst [vmem:[%s4298_s17 + $0x118] sm:$0xff] %v2349_v25 }
 0x308   : > { %v2207_v56 = vpop.f32.mrf.mxu1  ;;  %v2064_v1 = vpop.f32.mrf.mxu0 }
 0x309   : > { %2547 = vst [vmem:[%s4298_s17 + $0xa0] sm:$0xff] %v2207_v56 }
 0x30a   : > { %2532 = vst [vmem:[%s4298_s17 + $0x28] sm:$0xff] %v2064_v1 }
 0x30c   : > { %v2352_v36 = vpop.f32.mrf.mxu2 }
 0x30d   : > { %2563 = vst [vmem:[%s4298_s17 + $0x120] sm:$0xff] %v2352_v36  ;;  %v2497_v30 = vpop.f32.mrf.mxu3 }
 0x30e   : > { %2579 = vst [vmem:[%s4298_s17 + $0x1a0] sm:$0xff] %v2497_v30 }
 0x310   : > { %v2209_v42 = vpop.f32.mrf.mxu1 }
 0x311   : > { %2548 = vst [vmem:[%s4298_s17 + $0xa8] sm:$0xff] %v2209_v42 }
 0x314   : > { %v2354_v52 = vpop.f32.mrf.mxu2 }
 0x315   : > { %2564 = vst [vmem:[%s4298_s17 + $0x128] sm:$0xff] %v2354_v52  ;;  %v2499_v6 = vpop.f32.mrf.mxu3 }
 0x316   : > { %v2067_v5 = vpop.f32.mrf.mxu0  ;;  %2580 = vst [vmem:[%s4298_s17 + $0x1a8] sm:$0xff] %v2499_v6 }
 0x317   : > { %2533 = vst [vmem:[%s4298_s17 + $0x30] sm:$0xff] %v2067_v5 }
 0x31e   : > { %v2357_v60 = vpop.f32.mrf.mxu2  ;;  %v2069_v13 = vpop.f32.mrf.mxu0 }
 0x31f   : > { %2565 = vst [vmem:[%s4298_s17 + $0x130] sm:$0xff] %v2357_v60  ;;  %v2212_v2 = vpop.f32.mrf.mxu1 }
 0x320   : > { %2534 = vst [vmem:[%s4298_s17 + $0x38] sm:$0xff] %v2069_v13 }
 0x321   : > { %2549 = vst [vmem:[%s4298_s17 + $0xb0] sm:$0xff] %v2212_v2 }
 0x324   : > { %v2502_v9 = vpop.f32.mrf.mxu3 }
 0x325   : > { %2581 = vst [vmem:[%s4298_s17 + $0x1b0] sm:$0xff] %v2502_v9 }
 0x326   : > { %v2359_v48 = vpop.f32.mrf.mxu2 }
 0x327   : > { %2566 = vst [vmem:[%s4298_s17 + $0x138] sm:$0xff] %v2359_v48  ;;  %v2214_v61 = vpop.f32.mrf.mxu1 }
 0x328   : > { %v2072_v28 = vpop.f32.mrf.mxu0  ;;  %2550 = vst [vmem:[%s4298_s17 + $0xb8] sm:$0xff] %v2214_v61 }
 0x329   : > { %2535 = vst [vmem:[%s4298_s17 + $0x40] sm:$0xff] %v2072_v28 }
 0x32c   : > { %v2504_v43 = vpop.f32.mrf.mxu3 }
 0x32d   : > { %2582 = vst [vmem:[%s4298_s17 + $0x1b8] sm:$0xff] %v2504_v43 }
 0x330   : > { %v2074_v55 = vpop.f32.mrf.mxu0 }
 0x331   : > { %2536 = vst [vmem:[%s4298_s17 + $0x48] sm:$0xff] %v2074_v55 }
 0x335   : > { %v2362_v10 = vpop.f32.mrf.mxu2 }
 0x336   : > { %v2507_v19 = vpop.f32.mrf.mxu3  ;;  %v2217_v62 = vpop.f32.mrf.mxu1  ;;  %2567 = vst [vmem:[%s4298_s17 + $0x140] sm:$0xff] %v2362_v10 }
 0x337   : > { %2583 = vst [vmem:[%s4298_s17 + $0x1c0] sm:$0xff] %v2507_v19 }
 0x338   : > { %2551 = vst [vmem:[%s4298_s17 + $0xc0] sm:$0xff] %v2217_v62 }
 0x33d   : > { %v2364_v54 = vpop.f32.mrf.mxu2 }
 0x33e   : > { %v2509_v47 = vpop.f32.mrf.mxu3  ;;  %v2219_v14 = vpop.f32.mrf.mxu1  ;;  %2568 = vst [vmem:[%s4298_s17 + $0x148] sm:$0xff] %v2364_v54 }
 0x33f   : > { %2584 = vst [vmem:[%s4298_s17 + $0x1c8] sm:$0xff] %v2509_v47 }
 0x340   : > { %2552 = vst [vmem:[%s4298_s17 + $0xc8] sm:$0xff] %v2219_v14 }
 0x346   : > { %v2077_v33 = vpop.f32.mrf.mxu0  ;;  %v2222_v24 = vpop.f32.mrf.mxu1 }
 0x347   : > { %2537 = vst [vmem:[%s4298_s17 + $0x50] sm:$0xff] %v2077_v33 }
 0x348   : > { %2553 = vst [vmem:[%s4298_s17 + $0xd0] sm:$0xff] %v2222_v24 }
 0x34d   : > { %v2367_v12 = vpop.f32.mrf.mxu2 }
 0x34e   : > { %v2512_v37 = vpop.f32.mrf.mxu3  ;;  %v2079_v45 = vpop.f32.mrf.mxu0  ;;  %2569 = vst [vmem:[%s4298_s17 + $0x150] sm:$0xff] %v2367_v12 }
 0x34f   : > { %2585 = vst [vmem:[%s4298_s17 + $0x1d0] sm:$0xff] %v2512_v37  ;;  %v2224_v17 = vpop.f32.mrf.mxu1 }
 0x350   : > { %2538 = vst [vmem:[%s4298_s17 + $0x58] sm:$0xff] %v2079_v45 }
 0x351   : > { %2554 = vst [vmem:[%s4298_s17 + $0xd8] sm:$0xff] %v2224_v17 }
 0x355   : > { %v2369_v29 = vpop.f32.mrf.mxu2 }
 0x356   : > { %v2514_v46 = vpop.f32.mrf.mxu3  ;;  %2570 = vst [vmem:[%s4298_s17 + $0x158] sm:$0xff] %v2369_v29 }
 0x357   : > { %2586 = vst [vmem:[%s4298_s17 + $0x1d8] sm:$0xff] %v2514_v46  ;;  %v2082_v16 = vpop.f32.mrf.mxu0 }
 0x358   : > { %2539 = vst [vmem:[%s4298_s17 + $0x60] sm:$0xff] %v2082_v16 }
 0x35e   : > { %v2372_v21 = vpop.f32.mrf.mxu2 }
 0x35f   : > { %2571 = vst [vmem:[%s4298_s17 + $0x160] sm:$0xff] %v2372_v21  ;;  %v2084_v18 = vpop.f32.mrf.mxu0 }
 0x360   : > { %v2227_v38 = vpop.f32.mrf.mxu1  ;;  %2540 = vst [vmem:[%s4298_s17 + $0x68] sm:$0xff] %v2084_v18 }
 0x361   : > { %2555 = vst [vmem:[%s4298_s17 + $0xe0] sm:$0xff] %v2227_v38 }
 0x364   : > { %v2517_v51 = vpop.f32.mrf.mxu3 }
 0x365   : > { %2587 = vst [vmem:[%s4298_s17 + $0x1e0] sm:$0xff] %v2517_v51 }
 0x366   : > { %v2374_v3 = vpop.f32.mrf.mxu2 }
 0x367   : > { %2572 = vst [vmem:[%s4298_s17 + $0x168] sm:$0xff] %v2374_v3 }
 0x368   : > { %v2229_v31 = vpop.f32.mrf.mxu1 }
 0x369   : > { %2556 = vst [vmem:[%s4298_s17 + $0xe8] sm:$0xff] %v2229_v31 }
 0x36c   : > { %v2519_v27 = vpop.f32.mrf.mxu3 }
 0x36d   : > { %2588 = vst [vmem:[%s4298_s17 + $0x1e8] sm:$0xff] %v2519_v27 }
 0x370   : > { %v2087_v41 = vpop.f32.mrf.mxu0 }
 0x371   : > { %2541 = vst [vmem:[%s4298_s17 + $0x70] sm:$0xff] %v2087_v41 }
 0x374   : > { %v2377_v59 = vpop.f32.mrf.mxu2  ;;  %v2522_v0 = vpop.f32.mrf.mxu3 }
 0x375   : > { %2573 = vst [vmem:[%s4298_s17 + $0x170] sm:$0xff] %v2377_v59 }
 0x376   : > { %2589 = vst [vmem:[%s4298_s17 + $0x1f0] sm:$0xff] %v2522_v0  ;;  %v2232_v23 = vpop.f32.mrf.mxu1 }
 0x377   : > { %2557 = vst [vmem:[%s4298_s17 + $0xf0] sm:$0xff] %v2232_v23 }
 0x378   : > { %v2089_v26 = vpop.f32.mrf.mxu0 }
 0x379   : > { %2542 = vst [vmem:[%s4298_s17 + $0x78] sm:$0xff] %v2089_v26 }
 0x37c   : > { %v2379_v44 = vpop.f32.mrf.mxu2  ;;  %v2524_v57 = vpop.f32.mrf.mxu3 }
 0x37d   : > { %2574 = vst [vmem:[%s4298_s17 + $0x178] sm:$0xff] %v2379_v44 }
 0x37e   : > { %2590 = vst [vmem:[%s4298_s17 + $0x1f8] sm:$0xff] %v2524_v57  ;;  %v2234_v58 = vpop.f32.mrf.mxu1 }
 0x37f   : > { %2558 = vst [vmem:[%s4298_s17 + $0xf8] sm:$0xff] %v2234_v58 }
 0x380   : > { %3191 = shalt.err (!%p3188_p7)
}
 0x381   : > { %s3238_s0 = smov 128   ;;  %s3239_s26 = smov 8  }
 0x382   : > { %2764 = dma.vmem_to_hbm [thread:$0]  (%p3306_p11), %s2606_s29, 8192, %s2608_s1, %s2592_s16, %s3238_s0, %s3238_s0, %s3239_s26  }
 0x383 PF: > { %s2622_s27 = sand.u32 1, %s3222_s12   ;;  %p2777_p0 = pnand %p2726_p9, %p3310_p12 }
 0x384   : > { %s2623_s28 = scalar_lea.sflag [#allocation4], %s2622_s27 }
 0x385   : > { %p2778_p8 = pneg %p2777_p0 }
 0x387   : > { %3217 = dma.done.wait (%p2778_p8), %s2623_s28, 8192  }
 0x388   : > { %3219 = vsyncadd (%p2778_p8), %s2623_s28, 4294959104  ;;  %s4585_s9 = sld [smem:[#allocation12_spill]]  ;;  %p19_p10 = scmp.ge.s32.totalorder %s3285_s18, 4  }
 0x389   : > { %s4586_s12 = smov %s3226_s13  ;;  %s4587_s13 = smov %s3230_s14 }
 0x38a   : > { %s4589_s15 = smov %s3285_s18  ;;  %21 = sbr.rel (!%p19_p10) target bundleno = 10 (0xa), region = 101 }
 0x38e   : > { %s4588_s14 = smov %s4585_s9 }
 0x38f   :  { %2629 = vsyncpa [#allocation3], 1 }
 0x390   :  { %2631 = vsyncpa [#allocation3 + $0x1], 1 }
 0x391   :  { %2632 = vsyncpa [#allocation6], 1 }
 0x392   :  { %2634 = vsyncpa [#allocation6 + $0x1], 1 }
 0x393   :  { %2635 = vsyncpa [#allocation4], 1 }
 0x394   :  { %2637 = vsyncpa [#allocation4 + $0x1], 1 }

</bundles_post_ra>
